<compile_context>
chip_gen: v6e
topology: v6e:2x2x1
jax: 0.10.0
libtpu: 0.0.40
codegen_flags: <defaults>
</compile_context>

<pallas_src>
import functools

import jax
import jax.numpy as jnp
from jax.experimental import pallas as pl
from jax.experimental.pallas import tpu as pltpu


def _round_up(x, m):
    return ((x + m - 1) // m) * m


def _sigmoid(x):
    # One EUP op instead of exp + divide (v5e has a single EUP slot).
    return 0.5 * (jnp.tanh(0.5 * x) + 1.0)


def _gru_stats_kernel(x_ref, h_ref, wg_ref, bg_ref, wu_ref, bu_ref, wout_ref,
                      h_out_ref, stat_ref, *, c_ch, ts, hw_true):
    """Pass 1: GRU cell on one (C, ts) channels-first tile + partial BN stats.

    x_ref/h_ref: (C, ts) input-dtype tiles.  wg: (3C, 2C) bf16 fused gate weight,
    bg: (3C, 1) f32 fused bias.  Stats of c = Wout^T @ h_t stored as (C, 2) =
    [sum, sum_sq] per tile (f32).
    """
    f32 = jnp.float32
    bf16 = jnp.bfloat16
    x = x_ref[...]
    hf = h_ref[...].astype(f32)

    # Fused K=2C gate matmul: g = [z ; r ; t] pre-activations, f32 accumulate.
    xh = jnp.concatenate([x.astype(bf16), hf.astype(bf16)], axis=0)       # (2C, ts)
    g = jnp.dot(wg_ref[...], xh, preferred_element_type=f32) + bg_ref[...]  # (3C, ts)

    z = _sigmoid(g[:c_ch])
    r = _sigmoid(g[c_ch:2 * c_ch])
    rh = (r * hf).astype(bf16)                  # only the MXU input is low precision
    h_hat = jnp.tanh(g[2 * c_ch:]
                     + jnp.dot(wu_ref[...], rh, preferred_element_type=f32)
                     + bu_ref[...])
    h_t = (1.0 - z) * hf + z * h_hat            # (C, ts) f32
    h_out_ref[...] = h_t.astype(h_out_ref.dtype)

    # Partial BatchNorm statistics (training-mode batch stats) of c = Wout^T @ h_t.
    c = jnp.dot(wout_ref[...], h_t.astype(bf16), preferred_element_type=f32)
    if hw_true is not None:   # static: only compiled in when spatial padding exists
        col = pl.program_id(1) * ts + jax.lax.broadcasted_iota(jnp.int32, c.shape, 1)
        c = jnp.where(col < hw_true, c, 0.0)
    s = jnp.sum(c, axis=1, keepdims=True)        # (C, 1)
    sq = jnp.sum(c * c, axis=1, keepdims=True)   # (C, 1)
    stat_ref[...] = jnp.concatenate([s, sq], axis=1)


def _bn_act_kernel(h_ref, wout_ref, scale_ref, shift_ref, y_ref):
    """Pass 2: recompute c = Wout^T @ h_t, apply BN affine + LeakyReLU(0.1)."""
    f32 = jnp.float32
    c = jnp.dot(wout_ref[...], h_ref[...].astype(wout_ref.dtype),
                preferred_element_type=f32)
    cn = c * scale_ref[...] + shift_ref[...]
    y_ref[...] = jnp.where(cn >= 0.0, cn, 0.1 * cn).astype(y_ref.dtype)


def pack_params(params, mxu_dtype=jnp.bfloat16):
    """Fuse / transpose weights once (wrapper-side) and pre-cast for the MXU."""
    (wxz, bxz, whz, bhz, wxr, bxr, whr, bhr,
     wt, bt, wu, bu, wout, gamma, beta) = params
    f32 = jnp.float32
    # Channels-first form: conv(a) = W^T @ a_tile, so store (C_out, C_in) matrices.
    wx3 = jnp.concatenate([wxz, wxr, wt], axis=1).T                 # (3C, C)
    wh3 = jnp.concatenate([whz, whr, jnp.zeros_like(wt)], axis=1).T  # (3C, C)
    wg = jnp.concatenate([wx3, wh3], axis=1).astype(mxu_dtype)       # (3C, 2C)
    bg = jnp.concatenate([bxz + bhz, bxr + bhr, bt], axis=1).T.astype(f32)  # (3C, 1)
    return dict(
        wg=wg, bg=bg,
        wu=wu.T.astype(mxu_dtype), bu=bu.T.astype(f32),              # (C, C), (C, 1)
        wout=wout.T.astype(mxu_dtype),                               # (C, C)
        gamma=gamma.reshape(-1).astype(f32),
        beta=beta.reshape(-1).astype(f32),
    )


def convgru_forward(x_nchw, h_nchw, packed, *, block_cols=512):
    """ConvGRU forward.  block_cols: spatial-lane tile size (sweep 256/512/1024)."""
    B, C, H, W = x_nchw.shape
    HW = H * W
    M = B * HW
    out_dtype = x_nchw.dtype

    # Spatial tiling (lanes).  If multiple tiles are needed, ts must be a multiple
    # of 128 (lane-dense blocks); pad H*W only in that (uncommon) case.
    ts = min(block_cols, HW)
    if ts < HW:
        ts = max(128, (ts // 128) * 128)
    hw_pad = _round_up(HW, ts)
    nt = hw_pad // ts
    needs_pad = hw_pad != HW

    # Free metadata-only reshape: NCHW stays channels-first, spatial flattened.
    x3 = x_nchw.reshape(B, C, HW)
    h3 = h_nchw.reshape(B, C, HW)
    if needs_pad:
        # TODO(synk): this pad/slice costs an extra HBM copy; only hit when H*W is
        # not a multiple of 128.
        x3 = jnp.pad(x3, ((0, 0), (0, 0), (0, hw_pad - HW)))
        h3 = jnp.pad(h3, ((0, 0), (0, 0), (0, hw_pad - HW)))

    def resident(a):
        # Full-array block, VMEM-resident across all grid steps.
        return pl.BlockSpec(a.shape, lambda b, s: (0,) * a.ndim)

    tile = pl.BlockSpec((None, C, ts), lambda b, s: (b, 0, s))
    stat_spec = pl.BlockSpec((None, None, C, 2), lambda b, s: (b, s, 0, 0))
    parallel = pltpu.CompilerParams(
        dimension_semantics=("parallel", "parallel"))

    # ---- Pass 1: GRU + per-tile BN partial statistics ----
    kern1 = functools.partial(_gru_stats_kernel, c_ch=C, ts=ts,
                              hw_true=(HW if needs_pad else None))
    h_t_pad, stats = pl.pallas_call(
        kern1,
        grid=(B, nt),
        in_specs=[
            tile,                          # x tile (C, ts)
            tile,                          # h tile (C, ts)
            resident(packed["wg"]),
            resident(packed["bg"]),
            resident(packed["wu"]),
            resident(packed["bu"]),
            resident(packed["wout"]),
        ],
        out_specs=(tile, stat_spec),
        out_shape=(
            jax.ShapeDtypeStruct((B, C, hw_pad), out_dtype),   # h_t (returned state)
            jax.ShapeDtypeStruct((B, nt, C, 2), jnp.float32),  # per-tile [sum, ssq]
        ),
        compiler_params=parallel,
    )(x3, h3, packed["wg"], packed["bg"], packed["wu"], packed["bu"],
      packed["wout"])

    # ---- Tiny cross-tile BN reduction (plain JAX; O(B*nt*C)) ----
    # TODO(synk): for very large M use shifted/Welford stats; E[x^2]-E[x]^2 in f32
    # can cancel at millions of rows.
    total = jnp.sum(stats[..., 0], axis=(0, 1))      # (C,)
    total_sq = jnp.sum(stats[..., 1], axis=(0, 1))   # (C,)
    mean = total / M
    var = jnp.maximum(total_sq / M - mean * mean, 0.0)   # biased var, training-mode BN
    inv = jax.lax.rsqrt(var + 1e-5)
    gamma = packed["gamma"]
    beta = packed["beta"]
    scale = (gamma * inv).reshape(C, 1)
    shift = (beta - mean * gamma * inv).reshape(C, 1)

    # ---- Pass 2: normalize + LeakyReLU(0.1), write y in NCHW directly ----
    y_pad = pl.pallas_call(
        _bn_act_kernel,
        grid=(B, nt),
        in_specs=[
            tile,                              # h_t tile
            resident(packed["wout"]),
            pl.BlockSpec((C, 1), lambda b, s: (0, 0)),   # scale
            pl.BlockSpec((C, 1), lambda b, s: (0, 0)),   # shift
        ],
        out_specs=tile,
        out_shape=jax.ShapeDtypeStruct((B, C, hw_pad), out_dtype),
        compiler_params=parallel,
    )(h_t_pad, packed["wout"], scale, shift)

    def back(a):
        if needs_pad:
            a = a[:, :, :HW]
        return a.reshape(B, C, H, W)

    return back(y_pad), back(h_t_pad)


def make_params(key, c_in, c_out, dtype=jnp.float32):
    """Synthetic parameters mirroring ConvGRU.__init__ shapes.

    Each Conv2d(c_in, c_out, 1) weight [c_out, c_in, 1, 1] is stored as its squeezed
    transpose [c_in, c_out]; biases as [1, c_out].  BatchNorm: gamma=1, beta=0.
    """
    keys = jax.random.split(key, 13)
    scale = 0.05

    def w(k):
        return (scale * jax.random.normal(k, (c_in, c_out))).astype(dtype)

    def b(k):
        return (scale * jax.random.normal(k, (1, c_out))).astype(dtype)

    wxz, bxz = w(keys[0]), b(keys[1])
    whz, bhz = w(keys[2]), b(keys[3])
    wxr, bxr = w(keys[4]), b(keys[5])
    whr, bhr = w(keys[6]), b(keys[7])
    wt, bt = w(keys[8]), b(keys[9])
    wu, bu = w(keys[10]), b(keys[11])
    wout = w(keys[12])                      # conv_out conv: bias=False
    gamma = jnp.ones((1, c_out), dtype)
    beta = jnp.zeros((1, c_out), dtype)
    return (wxz, bxz, whz, bhz, wxr, bxr, whr, bhr,
            wt, bt, wu, bu, wout, gamma, beta)


def _reference_forward(x_nchw, h_nchw, params, mxu_dtype=jnp.bfloat16):
    """Pure-JAX reference with identical math (bf16 only on matmul operands)."""
    (wxz, bxz, whz, bhz, wxr, bxr, whr, bhr,
     wt, bt, wu, bu, wout, gamma, beta) = params
    f32 = jnp.float32

    def q(a):
        return a.astype(mxu_dtype).astype(f32)

    B, C, H, W = x_nchw.shape
    M = B * H * W
    x = jnp.transpose(x_nchw, (0, 2, 3, 1)).reshape(M, C).astype(f32)
    h = jnp.transpose(h_nchw, (0, 2, 3, 1)).reshape(M, C).astype(f32)

    def conv(a, w, b=None):
        r = q(a) @ q(w)
        return r + b.astype(f32) if b is not None else r

    z = jax.nn.sigmoid(conv(x, wxz, bxz) + conv(h, whz, bhz))
    r = jax.nn.sigmoid(conv(x, wxr, bxr) + conv(h, whr, bhr))
    h_hat = jnp.tanh(conv(x, wt, bt) + conv(r * h, wu, bu))
    h_t = (1.0 - z) * h + z * h_hat
    c = q(h_t) @ q(wout)
    mean = jnp.mean(c, axis=0, keepdims=True)
    var = jnp.mean((c - mean) ** 2, axis=0, keepdims=True)
    cn = (c - mean) * jax.lax.rsqrt(var + 1e-5) * gamma + beta
    y = jnp.where(cn >= 0, cn, 0.1 * cn)

    def back(a):
        return jnp.transpose(a.reshape(B, H, W, C), (0, 3, 1, 2))

    return back(y), back(h_t)


if __name__ == "__main__":
    key = jax.random.PRNGKey(0)
    k_x, k_h, k_p = jax.random.split(key, 3)

    # in_channels == out_channels == 128, spatial 16x16 -> HW = 256 lanes per batch.
    B, C, H, W = 2, 128, 16, 16
    x = jax.random.normal(k_x, (B, C, H, W), dtype=jnp.float32)
    h_prev = jax.random.normal(k_h, (B, C, H, W), dtype=jnp.float32)
    params = make_params(k_p, C, C)
    packed = pack_params(params)

    fwd = jax.jit(functools.partial(convgru_forward, block_cols=512))
    y, h_t = fwd(x, h_prev, packed)
    jax.block_until_ready((y, h_t))

    y_ref, h_ref = _reference_forward(x, h_prev, params)
    assert y.shape == (B, C, H, W) and h_t.shape == (B, C, H, W)
    assert jnp.allclose(h_t, h_ref, atol=2e-3, rtol=2e-3), \
        float(jnp.max(jnp.abs(h_t - h_ref)))
    assert jnp.allclose(y, y_ref, atol=5e-3, rtol=5e-3), \
        float(jnp.max(jnp.abs(y - y_ref)))

    print("KERNEL_OK")
</pallas_src>

<mosaic_0001>
module attributes {stable_mosaic.version = 11 : i64} {
  func.func @_gru_stats_kernel(%arg0: i32, %arg1: i32, %arg2: memref<1x128x256xf32, #tpu.memory_space<vmem>>, %arg3: memref<1x128x256xf32, #tpu.memory_space<vmem>>, %arg4: memref<384x256xbf16, #tpu.memory_space<vmem>>, %arg5: memref<384x1xf32, #tpu.memory_space<vmem>>, %arg6: memref<128x128xbf16, #tpu.memory_space<vmem>>, %arg7: memref<128x1xf32, #tpu.memory_space<vmem>>, %arg8: memref<128x128xbf16, #tpu.memory_space<vmem>>, %arg9: memref<1x128x256xf32, #tpu.memory_space<vmem>>, %arg10: memref<1x1x128x2xf32, #tpu.memory_space<vmem>>) attributes {dimension_semantics = [#tpu.dimension_semantics<parallel>, #tpu.dimension_semantics<parallel>], iteration_bounds = array<i64: 2, 1>, scalar_prefetch = 0 : i64, scratch_operands = 0 : i64, tpu.core_type = #tpu.core_type<tc>, window_params = [{transform_indices = @transform_0, window_bounds = array<i64: 1, 128, 256>}, {transform_indices = @transform_1, window_bounds = array<i64: 1, 128, 256>}, {pipeline_mode = #tpu.pipeline_mode<synchronous>, transform_indices = @transform_2, window_bounds = array<i64: 384, 256>}, {pipeline_mode = #tpu.pipeline_mode<synchronous>, transform_indices = @transform_3, window_bounds = array<i64: 384, 1>}, {pipeline_mode = #tpu.pipeline_mode<synchronous>, transform_indices = @transform_4, window_bounds = array<i64: 128, 128>}, {pipeline_mode = #tpu.pipeline_mode<synchronous>, transform_indices = @transform_5, window_bounds = array<i64: 128, 1>}, {pipeline_mode = #tpu.pipeline_mode<synchronous>, transform_indices = @transform_6, window_bounds = array<i64: 128, 128>}, {transform_indices = @transform_7, window_bounds = array<i64: 1, 128, 256>}, {transform_indices = @transform_8, window_bounds = array<i64: 1, 1, 128, 2>}]} {
    %c0 = arith.constant 0 : index
    %c0_0 = arith.constant 0 : index
    %c0_1 = arith.constant 0 : index
    %0 = vector.load %arg2[%c0, %c0_0, %c0_1] : memref<1x128x256xf32, #tpu.memory_space<vmem>>, vector<1x128x256xf32>
    %1 = vector.shape_cast %0 : vector<1x128x256xf32> to vector<128x256xf32>
    %c0_2 = arith.constant 0 : index
    %c0_3 = arith.constant 0 : index
    %c0_4 = arith.constant 0 : index
    %2 = vector.load %arg3[%c0_2, %c0_3, %c0_4] : memref<1x128x256xf32, #tpu.memory_space<vmem>>, vector<1x128x256xf32>
    %3 = vector.shape_cast %2 : vector<1x128x256xf32> to vector<128x256xf32>
    %4 = arith.truncf %1 : vector<128x256xf32> to vector<128x256xbf16>
    %5 = arith.truncf %3 : vector<128x256xf32> to vector<128x256xbf16>
    %6 = tpu.concatenate %4, %5 in 0 : vector<128x256xbf16>, vector<128x256xbf16> -> vector<256x256xbf16>
    %c0_5 = arith.constant 0 : index
    %c0_6 = arith.constant 0 : index
    %7 = vector.load %arg4[%c0_5, %c0_6] : memref<384x256xbf16, #tpu.memory_space<vmem>>, vector<384x256xbf16>
    %cst = arith.constant dense<0.000000e+00> : vector<384x256xf32>
    %8 = tpu.matmul %7, %6, %cst {dimension_numbers = #tpu.dot_dimension_numbers<[1], [0], [0], [1], [0, 0, 1, 1], [], []>} : vector<384x256xbf16>, vector<256x256xbf16>, vector<384x256xf32> -> vector<384x256xf32>
    %c0_7 = arith.constant 0 : index
    %c0_8 = arith.constant 0 : index
    %9 = vector.load %arg5[%c0_7, %c0_8] : memref<384x1xf32, #tpu.memory_space<vmem>>, vector<384x1xf32>
    %10 = vector.broadcast %9 : vector<384x1xf32> to vector<384x256xf32>
    %11 = arith.addf %8, %10 : vector<384x256xf32>
    %12 = vector.extract_strided_slice %11 {offsets = [0, 0], sizes = [128, 256], strides = [1, 1]} : vector<384x256xf32> to vector<128x256xf32>
    %cst_9 = arith.constant 5.000000e-01 : f32
    %13 = vector.broadcast %cst_9 : f32 to vector<128x256xf32>
    %14 = arith.mulf %13, %12 : vector<128x256xf32>
    %15 = math.tanh %14 : vector<128x256xf32>
    %cst_10 = arith.constant 1.000000e+00 : f32
    %16 = vector.broadcast %cst_10 : f32 to vector<128x256xf32>
    %17 = arith.addf %15, %16 : vector<128x256xf32>
    %cst_11 = arith.constant 5.000000e-01 : f32
    %18 = vector.broadcast %cst_11 : f32 to vector<128x256xf32>
    %19 = arith.mulf %18, %17 : vector<128x256xf32>
    %20 = vector.extract_strided_slice %11 {offsets = [128, 0], sizes = [128, 256], strides = [1, 1]} : vector<384x256xf32> to vector<128x256xf32>
    %cst_12 = arith.constant 5.000000e-01 : f32
    %21 = vector.broadcast %cst_12 : f32 to vector<128x256xf32>
    %22 = arith.mulf %21, %20 : vector<128x256xf32>
    %23 = math.tanh %22 : vector<128x256xf32>
    %cst_13 = arith.constant 1.000000e+00 : f32
    %24 = vector.broadcast %cst_13 : f32 to vector<128x256xf32>
    %25 = arith.addf %23, %24 : vector<128x256xf32>
    %cst_14 = arith.constant 5.000000e-01 : f32
    %26 = vector.broadcast %cst_14 : f32 to vector<128x256xf32>
    %27 = arith.mulf %26, %25 : vector<128x256xf32>
    %28 = arith.mulf %27, %3 : vector<128x256xf32>
    %29 = arith.truncf %28 : vector<128x256xf32> to vector<128x256xbf16>
    %30 = vector.extract_strided_slice %11 {offsets = [256, 0], sizes = [128, 256], strides = [1, 1]} : vector<384x256xf32> to vector<128x256xf32>
    %c0_15 = arith.constant 0 : index
    %c0_16 = arith.constant 0 : index
    %31 = vector.load %arg6[%c0_15, %c0_16] : memref<128x128xbf16, #tpu.memory_space<vmem>>, vector<128x128xbf16>
    %cst_17 = arith.constant dense<0.000000e+00> : vector<128x256xf32>
    %32 = tpu.matmul %31, %29, %cst_17 {dimension_numbers = #tpu.dot_dimension_numbers<[1], [0], [0], [1], [0, 0, 1, 1], [], []>} : vector<128x128xbf16>, vector<128x256xbf16>, vector<128x256xf32> -> vector<128x256xf32>
    %33 = arith.addf %30, %32 : vector<128x256xf32>
    %c0_18 = arith.constant 0 : index
    %c0_19 = arith.constant 0 : index
    %34 = vector.load %arg7[%c0_18, %c0_19] : memref<128x1xf32, #tpu.memory_space<vmem>>, vector<128x1xf32>
    %35 = vector.broadcast %34 : vector<128x1xf32> to vector<128x256xf32>
    %36 = arith.addf %33, %35 : vector<128x256xf32>
    %37 = math.tanh %36 : vector<128x256xf32>
    %cst_20 = arith.constant 1.000000e+00 : f32
    %38 = vector.broadcast %cst_20 : f32 to vector<128x256xf32>
    %39 = arith.subf %38, %19 : vector<128x256xf32>
    %40 = arith.mulf %39, %3 : vector<128x256xf32>
    %41 = arith.mulf %19, %37 : vector<128x256xf32>
    %42 = arith.addf %40, %41 : vector<128x256xf32>
    %c0_21 = arith.constant 0 : index
    %c0_22 = arith.constant 0 : index
    %c0_23 = arith.constant 0 : index
    %43 = vector.load %arg9[%c0_21, %c0_22, %c0_23] : memref<1x128x256xf32, #tpu.memory_space<vmem>>, vector<1x128x256xf32>
    %44 = vector.shape_cast %43 : vector<1x128x256xf32> to vector<128x256xf32>
    %45 = vector.shape_cast %42 : vector<128x256xf32> to vector<1x128x256xf32>
    tpu.vector_store %arg9[%c0_21, %c0_22, %c0_23], %45 {strides = array<i32>} : memref<1x128x256xf32, #tpu.memory_space<vmem>>, vector<1x128x256xf32>,
    %c0_24 = arith.constant 0 : index
    %c0_25 = arith.constant 0 : index
    %46 = vector.load %arg8[%c0_24, %c0_25] : memref<128x128xbf16, #tpu.memory_space<vmem>>, vector<128x128xbf16>
    %47 = arith.truncf %42 : vector<128x256xf32> to vector<128x256xbf16>
    %cst_26 = arith.constant dense<0.000000e+00> : vector<128x256xf32>
    %48 = tpu.matmul %46, %47, %cst_26 {dimension_numbers = #tpu.dot_dimension_numbers<[1], [0], [0], [1], [0, 0, 1, 1], [], []>} : vector<128x128xbf16>, vector<128x256xbf16>, vector<128x256xf32> -> vector<128x256xf32>
    %cst_27 = arith.constant dense<0.000000e+00> : vector<128xf32>
    %49 = vector.multi_reduction <add>, %48, %cst_27 [1] : vector<128x256xf32> to vector<128xf32>
    %50 = vector.shape_cast %49 : vector<128xf32> to vector<128x1xf32>
    %51 = arith.mulf %48, %48 : vector<128x256xf32>
    %cst_28 = arith.constant dense<0.000000e+00> : vector<128xf32>
    %52 = vector.multi_reduction <add>, %51, %cst_28 [1] : vector<128x256xf32> to vector<128xf32>
    %53 = vector.shape_cast %52 : vector<128xf32> to vector<128x1xf32>
    %54 = tpu.concatenate %50, %53 in 1 : vector<128x1xf32>, vector<128x1xf32> -> vector<128x2xf32>
    %c0_29 = arith.constant 0 : index
    %c0_30 = arith.constant 0 : index
    %c0_31 = arith.constant 0 : index
    %c0_32 = arith.constant 0 : index
    %55 = vector.load %arg10[%c0_29, %c0_30, %c0_31, %c0_32] : memref<1x1x128x2xf32, #tpu.memory_space<vmem>>, vector<1x1x128x2xf32>
    %56 = vector.shape_cast %55 : vector<1x1x128x2xf32> to vector<128x2xf32>
    %57 = vector.shape_cast %54 : vector<128x2xf32> to vector<1x1x128x2xf32>
    tpu.vector_store %arg10[%c0_29, %c0_30, %c0_31, %c0_32], %57 {strides = array<i32>} : memref<1x1x128x2xf32, #tpu.memory_space<vmem>>, vector<1x1x128x2xf32>,
    return
  }
  func.func @transform_0(%arg0: i32, %arg1: i32) -> (i32, i32, i32) {
    %c0_i32 = arith.constant 0 : i32
    %c0_i32_0 = arith.constant 0 : i32
    return %arg0, %c0_i32, %arg1 : i32, i32, i32
  }
  func.func @transform_1(%arg0: i32, %arg1: i32) -> (i32, i32, i32) {
    %c0_i32 = arith.constant 0 : i32
    %c0_i32_0 = arith.constant 0 : i32
    return %arg0, %c0_i32, %arg1 : i32, i32, i32
  }
  func.func @transform_2(%arg0: i32, %arg1: i32) -> (i32, i32) {
    %c0_i32 = arith.constant 0 : i32
    %c0_i32_0 = arith.constant 0 : i32
    %c0_i32_1 = arith.constant 0 : i32
    return %c0_i32, %c0_i32_0 : i32, i32
  }
  func.func @transform_3(%arg0: i32, %arg1: i32) -> (i32, i32) {
    %c0_i32 = arith.constant 0 : i32
    %c0_i32_0 = arith.constant 0 : i32
    %c0_i32_1 = arith.constant 0 : i32
    return %c0_i32, %c0_i32_0 : i32, i32
  }
  func.func @transform_4(%arg0: i32, %arg1: i32) -> (i32, i32) {
    %c0_i32 = arith.constant 0 : i32
    %c0_i32_0 = arith.constant 0 : i32
    %c0_i32_1 = arith.constant 0 : i32
    return %c0_i32, %c0_i32_0 : i32, i32
  }
  func.func @transform_5(%arg0: i32, %arg1: i32) -> (i32, i32) {
    %c0_i32 = arith.constant 0 : i32
    %c0_i32_0 = arith.constant 0 : i32
    %c0_i32_1 = arith.constant 0 : i32
    return %c0_i32, %c0_i32_0 : i32, i32
  }
  func.func @transform_6(%arg0: i32, %arg1: i32) -> (i32, i32) {
    %c0_i32 = arith.constant 0 : i32
    %c0_i32_0 = arith.constant 0 : i32
    %c0_i32_1 = arith.constant 0 : i32
    return %c0_i32, %c0_i32_0 : i32, i32
  }
  func.func @transform_7(%arg0: i32, %arg1: i32) -> (i32, i32, i32) {
    %c0_i32 = arith.constant 0 : i32
    %c0_i32_0 = arith.constant 0 : i32
    return %arg0, %c0_i32, %arg1 : i32, i32, i32
  }
  func.func @transform_8(%arg0: i32, %arg1: i32) -> (i32, i32, i32, i32) {
    %c0_i32 = arith.constant 0 : i32
    %c0_i32_0 = arith.constant 0 : i32
    %c0_i32_1 = arith.constant 0 : i32
    return %arg0, %arg1, %c0_i32, %c0_i32_0 : i32, i32, i32, i32
  }
}

module attributes {stable_mosaic.version = 11 : i64} {
  func.func @_bn_act_kernel(%arg0: i32, %arg1: i32, %arg2: memref<1x128x256xf32, #tpu.memory_space<vmem>>, %arg3: memref<128x128xbf16, #tpu.memory_space<vmem>>, %arg4: memref<128x1xf32, #tpu.memory_space<vmem>>, %arg5: memref<128x1xf32, #tpu.memory_space<vmem>>, %arg6: memref<1x128x256xf32, #tpu.memory_space<vmem>>) attributes {dimension_semantics = [#tpu.dimension_semantics<parallel>, #tpu.dimension_semantics<parallel>], iteration_bounds = array<i64: 2, 1>, scalar_prefetch = 0 : i64, scratch_operands = 0 : i64, tpu.core_type = #tpu.core_type<tc>, window_params = [{transform_indices = @transform_0, window_bounds = array<i64: 1, 128, 256>}, {pipeline_mode = #tpu.pipeline_mode<synchronous>, transform_indices = @transform_1, window_bounds = array<i64: 128, 128>}, {pipeline_mode = #tpu.pipeline_mode<synchronous>, transform_indices = @transform_2, window_bounds = array<i64: 128, 1>}, {pipeline_mode = #tpu.pipeline_mode<synchronous>, transform_indices = @transform_3, window_bounds = array<i64: 128, 1>}, {transform_indices = @transform_4, window_bounds = array<i64: 1, 128, 256>}]} {
    %c0 = arith.constant 0 : index
    %c0_0 = arith.constant 0 : index
    %0 = vector.load %arg3[%c0, %c0_0] : memref<128x128xbf16, #tpu.memory_space<vmem>>, vector<128x128xbf16>
    %c0_1 = arith.constant 0 : index
    %c0_2 = arith.constant 0 : index
    %c0_3 = arith.constant 0 : index
    %1 = vector.load %arg2[%c0_1, %c0_2, %c0_3] : memref<1x128x256xf32, #tpu.memory_space<vmem>>, vector<1x128x256xf32>
    %2 = vector.shape_cast %1 : vector<1x128x256xf32> to vector<128x256xf32>
    %3 = arith.truncf %2 : vector<128x256xf32> to vector<128x256xbf16>
    %cst = arith.constant dense<0.000000e+00> : vector<128x256xf32>
    %4 = tpu.matmul %0, %3, %cst {dimension_numbers = #tpu.dot_dimension_numbers<[1], [0], [0], [1], [0, 0, 1, 1], [], []>} : vector<128x128xbf16>, vector<128x256xbf16>, vector<128x256xf32> -> vector<128x256xf32>
    %c0_4 = arith.constant 0 : index
    %c0_5 = arith.constant 0 : index
    %5 = vector.load %arg4[%c0_4, %c0_5] : memref<128x1xf32, #tpu.memory_space<vmem>>, vector<128x1xf32>
    %6 = vector.broadcast %5 : vector<128x1xf32> to vector<128x256xf32>
    %7 = arith.mulf %4, %6 : vector<128x256xf32>
    %c0_6 = arith.constant 0 : index
    %c0_7 = arith.constant 0 : index
    %8 = vector.load %arg5[%c0_6, %c0_7] : memref<128x1xf32, #tpu.memory_space<vmem>>, vector<128x1xf32>
    %9 = vector.broadcast %8 : vector<128x1xf32> to vector<128x256xf32>
    %10 = arith.addf %7, %9 : vector<128x256xf32>
    %cst_8 = arith.constant 0.000000e+00 : f32
    %11 = vector.broadcast %cst_8 : f32 to vector<128x256xf32>
    %12 = arith.cmpf oge, %10, %11 : vector<128x256xf32>
    %cst_9 = arith.constant 1.000000e-01 : f32
    %13 = vector.broadcast %cst_9 : f32 to vector<128x256xf32>
    %14 = arith.mulf %13, %10 : vector<128x256xf32>
    %15 = arith.select %12, %10, %14 : vector<128x256xi1>, vector<128x256xf32>
    %c0_10 = arith.constant 0 : index
    %c0_11 = arith.constant 0 : index
    %c0_12 = arith.constant 0 : index
    %16 = vector.load %arg6[%c0_10, %c0_11, %c0_12] : memref<1x128x256xf32, #tpu.memory_space<vmem>>, vector<1x128x256xf32>
    %17 = vector.shape_cast %16 : vector<1x128x256xf32> to vector<128x256xf32>
    %18 = vector.shape_cast %15 : vector<128x256xf32> to vector<1x128x256xf32>
    tpu.vector_store %arg6[%c0_10, %c0_11, %c0_12], %18 {strides = array<i32>} : memref<1x128x256xf32, #tpu.memory_space<vmem>>, vector<1x128x256xf32>,
    return
  }
  func.func @transform_0(%arg0: i32, %arg1: i32) -> (i32, i32, i32) {
    %c0_i32 = arith.constant 0 : i32
    %c0_i32_0 = arith.constant 0 : i32
    return %arg0, %c0_i32, %arg1 : i32, i32, i32
  }
  func.func @transform_1(%arg0: i32, %arg1: i32) -> (i32, i32) {
    %c0_i32 = arith.constant 0 : i32
    %c0_i32_0 = arith.constant 0 : i32
    %c0_i32_1 = arith.constant 0 : i32
    return %c0_i32, %c0_i32_0 : i32, i32
  }
  func.func @transform_2(%arg0: i32, %arg1: i32) -> (i32, i32) {
    %c0_i32 = arith.constant 0 : i32
    %c0_i32_0 = arith.constant 0 : i32
    %c0_i32_1 = arith.constant 0 : i32
    return %c0_i32, %c0_i32_0 : i32, i32
  }
  func.func @transform_3(%arg0: i32, %arg1: i32) -> (i32, i32) {
    %c0_i32 = arith.constant 0 : i32
    %c0_i32_0 = arith.constant 0 : i32
    %c0_i32_1 = arith.constant 0 : i32
    return %c0_i32, %c0_i32_0 : i32, i32
  }
  func.func @transform_4(%arg0: i32, %arg1: i32) -> (i32, i32, i32) {
    %c0_i32 = arith.constant 0 : i32
    %c0_i32_0 = arith.constant 0 : i32
    return %arg0, %c0_i32, %arg1 : i32, i32, i32
  }
}

</mosaic_0001>

<bundles_post_ra>
// kernel: convgru_forward.3
= control target key start
LH: loop header
LB: loop body
LE: loop exit
PB: predicated region body
PF: predicated region fallthrough
CT: control target
= control target key end

     0   :  { %s1056_s15 = smov 0   ;;  %s1058_s16 = smov 0   ;;  %s1366_s0 = inlined_call_operand.vmem [shape: f32[2,128,256], index: 0, kind: input, shape index: {}]   ;;  %s1367_s1 = inlined_call_operand.vmem [shape: bf16[128,128], index: 1, kind: input, shape index: {}]   ;;  %s1368_s2 = inlined_call_operand.vmem [shape: f32[128,1], index: 2, kind: input, shape index: {}]   ;;  %s1369_s3 = inlined_call_operand.vmem [shape: f32[128,1], index: 3, kind: input, shape index: {}]   ;;  %s1370_s4 = inlined_call_operand.vmem [shape: f32[2,128,256], index: 4, kind: output, shape index: {}]  }
   0x1   :  { %s1060_s17 = smov 0  }
   0x2 LB: > { %s26_s18 = sadd.s32 1, %s1024_s16  ;;  %p938_p0 = scmp.ge.s32.totalorder %s1028_s17, 1  ;;  %s1028_s17 = sphi %s1060_s17, %s14_s17   ;;  %s1024_s16 = sphi %s1058_s16, %s1372_s16   ;;  %s1020_s15 = sphi %s1056_s15, %s1371_s15  }
   0x3   : > { %p28_p1 = scmp.ge.s32.totalorder %s26_s18, 2  ;;  %p183_p2 = scmp.lt.s32.totalorder %s1028_s17, 3 }
   0x5   : > { %s1374_s18 = smov (%p28_p1, %s26_s18), 0  ;;  %p184_p3 = pnand %p938_p0, %p183_p2 }
   0x6   : > { %p218_p4 = scmp.lt.s32.totalorder (!%p184_p3), %s1020_s15, 1 }
   0x7   : > { %187 = sbr.rel (%p184_p3) target bundleno = 289 (0x121), region = 36 }
   0xc   : > { %v465_v0 = vld [vmem:[%s1368_s2 + $0x10] sm:$0xff]  ;;  %v463_v1 = vld [vmem:[%s1368_s2] sm:$0xff]  ;;  %v1030_v2 = vmov 0   ;;  %s1376_s15 = smov (!%p218_p4, %s1020_s15), 1  ;;  %v466_v3 = vld [vmem:[%s1368_s2 + $0x18] sm:$0xff] }
   0xd   : > { %997 = vset.pattern.permute.xlu1 %v1030_v2  ;;  %996 = vset.pattern.permute.xlu0 %v1030_v2  ;;  %v464_v4 = vld [vmem:[%s1368_s2 + $0x8] sm:$0xff]  ;;  %s953_s27 = sshll.u32 %s1376_s15, 8  ;;  %v467_v19 = vld [vmem:[%s1368_s2 + $0x20] sm:$0xff]  ;;  %v470_v26 = vld [vmem:[%s1368_s2 + $0x38] sm:$0xff] }
   0xe   : > { %491 = vperm.xlu1 %997, %v465_v0   ;;  %481 = vperm.xlu0 %996, %v463_v1   ;;  %s1098_s30 = scalar_lea.vmem %s1366_s0, %s953_s27  ;;  %v468_v18 = vld [vmem:[%s1368_s2 + $0x28] sm:$0xff]  ;;  %v469_v27 = vld [vmem:[%s1368_s2 + $0x30] sm:$0xff]  ;;  %v471_v35 = vld [vmem:[%s1368_s2 + $0x40] sm:$0xff]  ;;  %s1287_s20 = scalar_lea.vmem %s1370_s4, %s953_s27 }
   0xf   : > { %382 = vmatprep.mubr.bf16.mxu0 %v1030_v2  ;;  %422 = vmatprep.mubr.bf16.mxu1 %v1030_v2  ;;  %v283_v5 = vld [vmem:[%s1098_s30 + $0xe8] sm:$0xff]  ;;  %v285_v6 = vld [vmem:[%s1098_s30 + $0xf8] sm:$0xff]  ;;  %v282_v7 = vld [vmem:[%s1098_s30 + $0xe0] sm:$0xff] }
  0x10   : > { %v301_v8 = vpack.c.bf16 %v285_v6, %v283_v5  ;;  %v284_v9 = vld [vmem:[%s1098_s30 + $0xf0] sm:$0xff]  ;;  %v279_v10 = vld [vmem:[%s1098_s30 + $0xc8] sm:$0xff]  ;;  %v281_v11 = vld [vmem:[%s1098_s30 + $0xd8] sm:$0xff] }
  0x11   : > { %v300_v12 = vpack.c.bf16 %v284_v9, %v282_v7  ;;  %v299_v13 = vpack.c.bf16 %v281_v11, %v279_v10  ;;  %v278_v14 = vld [vmem:[%s1098_s30 + $0xc0] sm:$0xff]  ;;  %v280_v15 = vld [vmem:[%s1098_s30 + $0xd0] sm:$0xff]  ;;  %v275_v16 = vld [vmem:[%s1098_s30 + $0xa8] sm:$0xff] }
  0x12   : > { %496 = vperm.xlu1 %997, %v466_v3   ;;  %486 = vperm.xlu0 %996, %v464_v4   ;;  %v277_v17 = vld [vmem:[%s1098_s30 + $0xb8] sm:$0xff]  ;;  %v298_v20 = vpack.c.bf16 %v280_v15, %v278_v14  ;;  %v274_v22 = vld [vmem:[%s1098_s30 + $0xa0] sm:$0xff]  ;;  %v276_v23 = vld [vmem:[%s1098_s30 + $0xb0] sm:$0xff] }
  0x13   : > { %350 = vmatprep.subr.bf16.mxu0 %v301_v8  ;;  %955 = vmatprep.subr.bf16.mxu1 %v301_v8  ;;  %v297_v21 = vpack.c.bf16 %v277_v17, %v275_v16  ;;  %v271_v24 = vld [vmem:[%s1098_s30 + $0x88] sm:$0xff]  ;;  %v273_v25 = vld [vmem:[%s1098_s30 + $0x98] sm:$0xff]  ;;  %v296_v28 = vpack.c.bf16 %v276_v23, %v274_v22  ;;  %v270_v30 = vld [vmem:[%s1098_s30 + $0x80] sm:$0xff] }
  0x14   : > { %351 = vmatpush1.bf16.msra.mxu0 %v300_v12  ;;  %963 = vmatpush1.bf16.msra.mxu1 %v300_v12  ;;  %v295_v29 = vpack.c.bf16 %v273_v25, %v271_v24  ;;  %v272_v31 = vld [vmem:[%s1098_s30 + $0x90] sm:$0xff]  ;;  %v267_v32 = vld [vmem:[%s1098_s30 + $0x68] sm:$0xff]  ;;  %v269_v33 = vld [vmem:[%s1098_s30 + $0x78] sm:$0xff] }
  0x15   : > { %352 = vmatprep.subr.bf16.mxu0 %v299_v13  ;;  %956 = vmatprep.subr.bf16.mxu1 %v299_v13  ;;  %v472_v34 = vld [vmem:[%s1368_s2 + $0x48] sm:$0xff]  ;;  %v294_v36 = vpack.c.bf16 %v272_v31, %v270_v30  ;;  %v293_v37 = vpack.c.bf16 %v269_v33, %v267_v32  ;;  %v266_v38 = vld [vmem:[%s1098_s30 + $0x60] sm:$0xff]  ;;  %v268_v39 = vld [vmem:[%s1098_s30 + $0x70] sm:$0xff] }
  0x16   : > { %506 = vperm.xlu1 %997, %v468_v18   ;;  %501 = vperm.xlu0 %996, %v467_v19   ;;  %v474_v40 = vld [vmem:[%s1368_s2 + $0x58] sm:$0xff]  ;;  %v263_v41 = vld [vmem:[%s1098_s30 + $0x48] sm:$0xff]  ;;  %v473_v43 = vld [vmem:[%s1368_s2 + $0x50] sm:$0xff]  ;;  %v292_v44 = vpack.c.bf16 %v268_v39, %v266_v38 }
  0x17   : > { %v265_v42 = vld [vmem:[%s1098_s30 + $0x58] sm:$0xff]  ;;  %v262_v45 = vld [vmem:[%s1098_s30 + $0x40] sm:$0xff]  ;;  %v264_v47 = vld [vmem:[%s1098_s30 + $0x50] sm:$0xff] }
  0x18   : > { %353 = vmatpush1.bf16.msra.mxu0 %v298_v20  ;;  %964 = vmatpush1.bf16.msra.mxu1 %v298_v20  ;;  %v291_v46 = vpack.c.bf16 %v265_v42, %v263_v41  ;;  %v259_v48 = vld [vmem:[%s1098_s30 + $0x28] sm:$0xff]  ;;  %v261_v49 = vld [vmem:[%s1098_s30 + $0x38] sm:$0xff]  ;;  %v475_v51 = vld [vmem:[%s1368_s2 + $0x60] sm:$0xff]  ;;  %v290_v52 = vpack.c.bf16 %v264_v47, %v262_v45 }
  0x19   : > { %354 = vmatprep.subr.bf16.mxu0 %v297_v21  ;;  %957 = vmatprep.subr.bf16.mxu1 %v297_v21  ;;  %v476_v50 = vld [vmem:[%s1368_s2 + $0x68] sm:$0xff]  ;;  %v289_v53 = vpack.c.bf16 %v261_v49, %v259_v48  ;;  %v258_v54 = vld [vmem:[%s1098_s30 + $0x20] sm:$0xff]  ;;  %v260_v55 = vld [vmem:[%s1098_s30 + $0x30] sm:$0xff] }
  0x1a   : > { %516 = vperm.xlu1 %997, %v470_v26   ;;  %511 = vperm.xlu0 %996, %v469_v27   ;;  %v255_v56 = vld [vmem:[%s1098_s30 + $0x8] sm:$0xff]  ;;  %v257_v57 = vld [vmem:[%s1098_s30 + $0x18] sm:$0xff]  ;;  %v477_v59 = vld [vmem:[%s1368_s2 + $0x70] sm:$0xff]  ;;  %v288_v60 = vpack.c.bf16 %v260_v55, %v258_v54 }
  0x1b   : > { %v478_v58 = vld [vmem:[%s1368_s2 + $0x78] sm:$0xff]  ;;  %v287_v61 = vpack.c.bf16 %v257_v57, %v255_v56  ;;  %v254_v62 = vld [vmem:[%s1098_s30] sm:$0xff]  ;;  %v256_v63 = vld [vmem:[%s1098_s30 + $0x10] sm:$0xff] }
  0x1c   : > { %355 = vmatpush1.bf16.msra.mxu0 %v296_v28  ;;  %965 = vmatpush1.bf16.msra.mxu1 %v296_v28  ;;  %v592_v0 = vld [vmem:[%s1369_s3 + $0x8] sm:$0xff]  ;;  %v591_v1 = vld [vmem:[%s1369_s3] sm:$0xff]  ;;  %v286_v3 = vpack.c.bf16 %v256_v63, %v254_v62  ;;  %v594_v6 = vld [vmem:[%s1369_s3 + $0x18] sm:$0xff] }
  0x1d   : > { %356 = vmatprep.subr.bf16.mxu0 %v295_v29  ;;  %958 = vmatprep.subr.bf16.mxu1 %v295_v29  ;;  %v998_v4 = vld [vmem:[%s1367_s1] sm:$0xff]   ;;  %v593_v7 = vld [vmem:[%s1369_s3 + $0x10] sm:$0xff]  ;;  %v596_v8 = vld [vmem:[%s1369_s3 + $0x28] sm:$0xff] }
  0x1e   : > { %526 = vperm.xlu1 %997, %v472_v34   ;;  %521 = vperm.xlu0 %996, %v471_v35   ;;  %v999_v5 = vld [vmem:[%s1367_s1 + $0x20] sm:$0xff]   ;;  %v1000_v10 = vld [vmem:[%s1367_s1 + $0x8] sm:$0xff]   ;;  %v598_v12 = vld [vmem:[%s1369_s3 + $0x38] sm:$0xff] }
  0x1f   : > { %v595_v9 = vld [vmem:[%s1369_s3 + $0x20] sm:$0xff]  ;;  %v1001_v11 = vld [vmem:[%s1367_s1 + $0x28] sm:$0xff]   ;;  %v597_v13 = vld [vmem:[%s1369_s3 + $0x30] sm:$0xff] }
  0x20   : > { %357 = vmatpush1.bf16.msra.mxu0 %v294_v36  ;;  %966 = vmatpush1.bf16.msra.mxu1 %v294_v36  ;;  %v600_v14 = vld [vmem:[%s1369_s3 + $0x48] sm:$0xff]  ;;  %v599_v15 = vld [vmem:[%s1369_s3 + $0x40] sm:$0xff]  ;;  %v1002_v16 = vld [vmem:[%s1367_s1 + $0x10] sm:$0xff]  }
  0x21   : > { %358 = vmatprep.subr.bf16.mxu0 %v293_v37  ;;  %959 = vmatprep.subr.bf16.mxu1 %v293_v37  ;;  %v1003_v17 = vld [vmem:[%s1367_s1 + $0x30] sm:$0xff]   ;;  %v602_v18 = vld [vmem:[%s1369_s3 + $0x58] sm:$0xff]  ;;  %v604_v20 = vld [vmem:[%s1369_s3 + $0x68] sm:$0xff] }
  0x22   : > { %536 = vperm.xlu1 %997, %v474_v40   ;;  %531 = vperm.xlu0 %996, %v473_v43   ;;  %v601_v19 = vld [vmem:[%s1369_s3 + $0x50] sm:$0xff]  ;;  %v603_v21 = vld [vmem:[%s1369_s3 + $0x60] sm:$0xff]  ;;  %v1004_v22 = vld [vmem:[%s1367_s1 + $0x18] sm:$0xff]  }
  0x23   : > { %v1005_v23 = vld [vmem:[%s1367_s1 + $0x38] sm:$0xff]   ;;  %v605_v25 = vld [vmem:[%s1369_s3 + $0x70] sm:$0xff] }
  0x24   : > { %359 = vmatpush1.bf16.msra.mxu0 %v292_v44  ;;  %967 = vmatpush1.bf16.msra.mxu1 %v292_v44  ;;  %v606_v24 = vld [vmem:[%s1369_s3 + $0x78] sm:$0xff] }
  0x25   : > { %360 = vmatprep.subr.bf16.mxu0 %v291_v46  ;;  %960 = vmatprep.subr.bf16.mxu1 %v291_v46 }
  0x26   : > { %546 = vperm.xlu1 %997, %v476_v50   ;;  %541 = vperm.xlu0 %996, %v475_v51  }
  0x28   : > { %361 = vmatpush1.bf16.msra.mxu0 %v290_v52  ;;  %968 = vmatpush1.bf16.msra.mxu1 %v290_v52 }
  0x29   : > { %362 = vmatprep.subr.bf16.mxu0 %v289_v53  ;;  %961 = vmatprep.subr.bf16.mxu1 %v289_v53 }
  0x2a   : > { %556 = vperm.xlu1 %997, %v478_v58   ;;  %551 = vperm.xlu0 %996, %v477_v59  }
  0x2c   : > { %363 = vmatpush1.bf16.msra.mxu0 %v288_v60  ;;  %969 = vmatpush1.bf16.msra.mxu1 %v288_v60 }
  0x2d   : > { %364 = vmatprep.subr.bf16.mxu0 %v287_v61  ;;  %962 = vmatprep.subr.bf16.mxu1 %v287_v61 }
  0x2e   : > { %614 = vperm.xlu1 %997, %v592_v0   ;;  %609 = vperm.xlu0 %996, %v591_v1  }
  0x30   : > { %365 = vmatpush1.bf16.msra.mxu0 %v286_v3  ;;  %970 = vmatpush1.bf16.msra.mxu1 %v286_v3 }
  0x32   : > { %624 = vperm.xlu1 %997, %v594_v6   ;;  %619 = vperm.xlu0 %996, %v593_v7  }
  0x33   : > { %383 = vmatmul.mubr.bf16.vlgmr.msra.gmra.mxu0 %v998_v4  ;;  %423 = vmatmul.mubr.bf16.vlgmr.msra.gmra.mxu1 %v999_v5 }
  0x34   : > { %392 = vmatprep.mubr.bf16.mxu0 %v1030_v2  ;;  %432 = vmatprep.mubr.bf16.mxu1 %v1030_v2 }
  0x36   : > { %634 = vperm.xlu1 %997, %v596_v8   ;;  %629 = vperm.xlu0 %996, %v595_v9  }
  0x3a   : > { %644 = vperm.xlu1 %997, %v598_v12   ;;  %639 = vperm.xlu0 %996, %v597_v13  }
  0x3b   : > { %393 = vmatmul.mubr.bf16.gmra.mxu0 %v1000_v10  ;;  %433 = vmatmul.mubr.bf16.gmra.mxu1 %v1001_v11 }
  0x3c   : > { %402 = vmatprep.mubr.bf16.mxu0 %v1030_v2  ;;  %442 = vmatprep.mubr.bf16.mxu1 %v1030_v2 }
  0x3e   : > { %654 = vperm.xlu1 %997, %v600_v14   ;;  %649 = vperm.xlu0 %996, %v599_v15  }
  0x42   : > { %664 = vperm.xlu1 %997, %v602_v18   ;;  %659 = vperm.xlu0 %996, %v601_v19  }
  0x43   : > { %403 = vmatmul.mubr.bf16.gmra.mxu0 %v1002_v16  ;;  %443 = vmatmul.mubr.bf16.gmra.mxu1 %v1003_v17 }
  0x44   : > { %412 = vmatprep.mubr.bf16.mxu0 %v1030_v2  ;;  %452 = vmatprep.mubr.bf16.mxu1 %v1030_v2 }
  0x46   : > { %674 = vperm.xlu1 %997, %v604_v20   ;;  %669 = vperm.xlu0 %996, %v603_v21  }
  0x4a   : > { %684 = vperm.xlu1 %997, %v606_v24   ;;  %679 = vperm.xlu0 %996, %v605_v25  }
  0x4b   : > { %413 = vmatmul.mubr.bf16.gmra.mxu0 %v1004_v22  ;;  %453 = vmatmul.mubr.bf16.gmra.mxu1 %v1005_v23 }
  0x89   : > { %v482_v2 = vpop.permute.xlu0 %481  ;;  %v1246_v26 = vpop.permute.xlu1 %491 }
  0x8d   : > { %v487_v27 = vpop.permute.xlu0 %486  ;;  %v1248_v28 = vpop.permute.xlu1 %496 }
  0x91   : > { %v1250_v29 = vpop.permute.xlu0 %501  ;;  %v1252_v30 = vpop.permute.xlu1 %506 }
  0x95   : > { %v1254_v31 = vpop.permute.xlu0 %511  ;;  %v1256_v32 = vpop.permute.xlu1 %516 }
  0x99   : > { %v522_v33 = vpop.permute.xlu0 %521  ;;  %v527_v34 = vpop.permute.xlu1 %526 }
  0x9d   : > { %v1258_v35 = vpop.permute.xlu0 %531  ;;  %v1260_v36 = vpop.permute.xlu1 %536 }
  0xa1   : > { %v1262_v37 = vpop.permute.xlu0 %541  ;;  %v1264_v38 = vpop.permute.xlu1 %546 }
  0xa5   : > { %v1266_v39 = vpop.permute.xlu0 %551  ;;  %v1268_v40 = vpop.permute.xlu1 %556 }
  0xa9   : > { %v610_v41 = vpop.permute.xlu0 %609  ;;  %v615_v42 = vpop.permute.xlu1 %614 }
  0xad   : > { %v1270_v43 = vpop.permute.xlu0 %619  ;;  %v1272_v44 = vpop.permute.xlu1 %624 }
  0xb1   : > { %v1274_v45 = vpop.permute.xlu0 %629  ;;  %v1276_v46 = vpop.permute.xlu1 %634 }
  0xb5   : > { %v1278_v47 = vpop.permute.xlu0 %639  ;;  %v1280_v50 = vpop.permute.xlu1 %644 }
  0xb9   : > { %v650_v51 = vpop.permute.xlu0 %649  ;;  %v655_v7 = vpop.permute.xlu1 %654 }
  0xf3   : > { %v384_v48 = vpop.f32.mrf.mxu0  ;;  %v424_v49 = vpop.f32.mrf.mxu1 }
  0xf4   : > { %v559_v52 = vmul.f32 %v482_v2, %v384_v48  ;;  %v575_v53 = vmul.f32 %v522_v33, %v424_v49 }
  0xf5   : > { %v386_v54 = vpop.f32.mrf.mxu0  ;;  %v426_v55 = vpop.f32.mrf.mxu1 }
  0xf6   : > { %v687_v56 = vadd.f32 %v610_v41, %v559_v52  ;;  %v703_v57 = vadd.f32 %v650_v51, %v575_v53  ;;  %v560_v58 = vmul.f32 %v482_v2, %v386_v54  ;;  %v576_v59 = vmul.f32 %v522_v33, %v426_v55  ;;  %v660_v2 = vpop.permute.xlu0 %659 }
  0xf7   : > { %v388_v60 = vpop.f32.mrf.mxu0  ;;  %v428_v61 = vpop.f32.mrf.mxu1 }
  0xf8   : > { %vm719_vm0 = vcmp.ge.f32.partialorder %v687_v56, 0.0  ;;  %v751_v62 = vmul.f32 0.1, %v687_v56  ;;  %vm735_vm1 = vcmp.ge.f32.partialorder %v703_v57, 0.0  ;;  %v767_v63 = vmul.f32 0.1, %v703_v57 }
  0xf9   : > { %v688_v0 = vadd.f32 %v610_v41, %v560_v58  ;;  %v704_v1 = vadd.f32 %v650_v51, %v576_v59  ;;  %v561_v3 = vmul.f32 %v487_v27, %v388_v60  ;;  %v577_v4 = vmul.f32 %v527_v34, %v428_v61  ;;  %v390_v5 = vpop.f32.mrf.mxu0  ;;  %v430_v6 = vpop.f32.mrf.mxu1 }
  0xfa   : > { %v783_v8 = vsel %vm719_vm0, %v687_v56, %v751_v62  ;;  %v799_v9 = vsel %vm735_vm1, %v703_v57, %v767_v63  ;;  %v562_v10 = vmul.f32 %v487_v27, %v390_v5  ;;  %v578_v11 = vmul.f32 %v527_v34, %v430_v6 }
  0xfb   : > { %815 = vst [vmem:[%s1287_s20] sm:$0xff] %v783_v8  ;;  %831 = vst [vmem:[%s1287_s20 + $0x80] sm:$0xff] %v799_v9  ;;  %vm720_vm2 = vcmp.ge.f32.partialorder %v688_v0, 0.0  ;;  %v752_v12 = vmul.f32 0.1, %v688_v0  ;;  %vm736_vm3 = vcmp.ge.f32.partialorder %v704_v1, 0.0  ;;  %v394_v14 = vpop.f32.mrf.mxu0  ;;  %v434_v15 = vpop.f32.mrf.mxu1  ;;  %v689_v16 = vadd.f32 %v615_v42, %v561_v3 }
  0xfc   : > { %v768_v13 = vmul.f32 0.1, %v704_v1  ;;  %v705_v17 = vadd.f32 %v655_v7, %v577_v4  ;;  %v690_v18 = vadd.f32 %v615_v42, %v562_v10  ;;  %v706_v19 = vadd.f32 %v655_v7, %v578_v11 }
  0xfd   : > { %v784_v20 = vsel %vm720_vm2, %v688_v0, %v752_v12  ;;  %v563_v22 = vmul.f32 %v1246_v26, %v394_v14  ;;  %v579_v23 = vmul.f32 %v1258_v35, %v434_v15  ;;  %v396_v24 = vpop.f32.mrf.mxu0  ;;  %v436_v25 = vpop.f32.mrf.mxu1  ;;  %vm721_vm4 = vcmp.ge.f32.partialorder %v689_v16, 0.0 }
  0xfe   : > { %v800_v21 = vsel %vm736_vm3, %v704_v1, %v768_v13  ;;  %816 = vst [vmem:[%s1287_s20 + $0x8] sm:$0xff] %v784_v20  ;;  %v753_v27 = vmul.f32 0.1, %v689_v16  ;;  %vm737_vm5 = vcmp.ge.f32.partialorder %v705_v17, 0.0  ;;  %v769_v33 = vmul.f32 0.1, %v705_v17 }
  0xff   : > { %832 = vst [vmem:[%s1287_s20 + $0x88] sm:$0xff] %v800_v21  ;;  %vm722_vm6 = vcmp.ge.f32.partialorder %v690_v18, 0.0  ;;  %v754_v34 = vmul.f32 0.1, %v690_v18  ;;  %vm738_vm7 = vcmp.ge.f32.partialorder %v706_v19, 0.0  ;;  %v398_v42 = vpop.f32.mrf.mxu0  ;;  %v438_v48 = vpop.f32.mrf.mxu1  ;;  %v691_v52 = vadd.f32 %v1270_v43, %v563_v22 }
 0x100   : > { %v770_v41 = vmul.f32 0.1, %v706_v19  ;;  %v785_v49 = vsel %vm721_vm4, %v689_v16, %v753_v27  ;;  %v801_v51 = vsel %vm737_vm5, %v705_v17, %v769_v33  ;;  %v707_v53 = vadd.f32 %v660_v2, %v579_v23 }
 0x101   : > { %817 = vst [vmem:[%s1287_s20 + $0x10] sm:$0xff] %v785_v49  ;;  %833 = vst [vmem:[%s1287_s20 + $0x90] sm:$0xff] %v801_v51  ;;  %v786_v54 = vsel %vm722_vm6, %v690_v18, %v754_v34  ;;  %v564_v56 = vmul.f32 %v1246_v26, %v396_v24  ;;  %v580_v57 = vmul.f32 %v1258_v35, %v436_v25  ;;  %v400_v58 = vpop.f32.mrf.mxu0  ;;  %v440_v59 = vpop.f32.mrf.mxu1  ;;  %vm723_vm8 = vcmp.ge.f32.partialorder %v691_v52, 0.0 }
 0x102   : > { %v802_v55 = vsel %vm738_vm7, %v706_v19, %v770_v41  ;;  %818 = vst [vmem:[%s1287_s20 + $0x18] sm:$0xff] %v786_v54  ;;  %v755_v60 = vmul.f32 0.1, %v691_v52  ;;  %vm739_vm9 = vcmp.ge.f32.partialorder %v707_v53, 0.0  ;;  %v771_v61 = vmul.f32 0.1, %v707_v53  ;;  %v665_v35 = vpop.permute.xlu1 %664  ;;  %v670_v19 = vpop.permute.xlu0 %669 }
 0x103   : > { %834 = vst [vmem:[%s1287_s20 + $0x98] sm:$0xff] %v802_v55  ;;  %v692_v62 = vadd.f32 %v1270_v43, %v564_v56  ;;  %v708_v63 = vadd.f32 %v660_v2, %v580_v57  ;;  %v565_v0 = vmul.f32 %v1248_v28, %v398_v42  ;;  %v581_v1 = vmul.f32 %v1260_v36, %v438_v48  ;;  %v404_v26 = vpop.f32.mrf.mxu0  ;;  %v444_v3 = vpop.f32.mrf.mxu1 }
 0x104   : > { %v787_v4 = vsel %vm723_vm8, %v691_v52, %v755_v60  ;;  %v803_v5 = vsel %vm739_vm9, %v707_v53, %v771_v61  ;;  %v566_v6 = vmul.f32 %v1248_v28, %v400_v58  ;;  %v582_v7 = vmul.f32 %v1260_v36, %v440_v59 }
 0x105   : > { %819 = vst [vmem:[%s1287_s20 + $0x20] sm:$0xff] %v787_v4  ;;  %835 = vst [vmem:[%s1287_s20 + $0xa0] sm:$0xff] %v803_v5  ;;  %vm724_vm10 = vcmp.ge.f32.partialorder %v692_v62, 0.0  ;;  %v756_v8 = vmul.f32 0.1, %v692_v62  ;;  %vm740_vm11 = vcmp.ge.f32.partialorder %v708_v63, 0.0  ;;  %v406_v9 = vpop.f32.mrf.mxu0  ;;  %v446_v10 = vpop.f32.mrf.mxu1  ;;  %v693_v11 = vadd.f32 %v1272_v44, %v565_v0 }
 0x106   : > { %v772_v43 = vmul.f32 0.1, %v708_v63  ;;  %v709_v12 = vadd.f32 %v665_v35, %v581_v1  ;;  %v694_v13 = vadd.f32 %v1272_v44, %v566_v6  ;;  %v710_v14 = vadd.f32 %v665_v35, %v582_v7 }
 0x107   : > { %v788_v15 = vsel %vm724_vm10, %v692_v62, %v756_v8  ;;  %v567_v36 = vmul.f32 %v1250_v29, %v404_v26  ;;  %v583_v16 = vmul.f32 %v1262_v37, %v444_v3  ;;  %v408_v17 = vpop.f32.mrf.mxu0  ;;  %v448_v18 = vpop.f32.mrf.mxu1  ;;  %vm725_vm12 = vcmp.ge.f32.partialorder %v693_v11, 0.0 }
 0x108   : > { %v804_v28 = vsel %vm740_vm11, %v708_v63, %v772_v43  ;;  %820 = vst [vmem:[%s1287_s20 + $0x28] sm:$0xff] %v788_v15  ;;  %v757_v20 = vmul.f32 0.1, %v693_v11  ;;  %vm741_vm13 = vcmp.ge.f32.partialorder %v709_v12, 0.0  ;;  %v773_v21 = vmul.f32 0.1, %v709_v12  ;;  %v675_v62 = vpop.permute.xlu1 %674  ;;  %v680_v43 = vpop.permute.xlu0 %679 }
 0x109   : > { %836 = vst [vmem:[%s1287_s20 + $0xa8] sm:$0xff] %v804_v28  ;;  %vm726_vm14 = vcmp.ge.f32.partialorder %v694_v13, 0.0  ;;  %v758_v44 = vmul.f32 0.1, %v694_v13  ;;  %vm742_vm15 = vcmp.ge.f32.partialorder %v710_v14, 0.0  ;;  %v410_v23 = vpop.f32.mrf.mxu0  ;;  %v450_v24 = vpop.f32.mrf.mxu1  ;;  %v695_v27 = vadd.f32 %v1274_v45, %v567_v36 }
 0x10a   : > { %v774_v22 = vmul.f32 0.1, %v710_v14  ;;  %v789_v25 = vsel %vm725_vm12, %v693_v11, %v757_v20  ;;  %v805_v2 = vsel %vm741_vm13, %v709_v12, %v773_v21  ;;  %v711_v33 = vadd.f32 %v670_v19, %v583_v16 }
 0x10b   : > { %821 = vst [vmem:[%s1287_s20 + $0x30] sm:$0xff] %v789_v25  ;;  %837 = vst [vmem:[%s1287_s20 + $0xb0] sm:$0xff] %v805_v2  ;;  %v790_v34 = vsel %vm726_vm14, %v694_v13, %v758_v44  ;;  %v568_v42 = vmul.f32 %v1250_v29, %v406_v9  ;;  %v584_v48 = vmul.f32 %v1262_v37, %v446_v10  ;;  %v414_v49 = vpop.f32.mrf.mxu0  ;;  %v454_v51 = vpop.f32.mrf.mxu1  ;;  %vm727_vm0 = vcmp.ge.f32.partialorder %v695_v27, 0.0 }
 0x10c   : > { %v806_v41 = vsel %vm742_vm15, %v710_v14, %v774_v22  ;;  %822 = vst [vmem:[%s1287_s20 + $0x38] sm:$0xff] %v790_v34  ;;  %v759_v52 = vmul.f32 0.1, %v695_v27  ;;  %vm743_vm1 = vcmp.ge.f32.partialorder %v711_v33, 0.0  ;;  %v775_v53 = vmul.f32 0.1, %v711_v33  ;;  %v685_v25 = vpop.permute.xlu1 %684 }
 0x10d   : > { %838 = vst [vmem:[%s1287_s20 + $0xb8] sm:$0xff] %v806_v41  ;;  %v696_v54 = vadd.f32 %v1274_v45, %v568_v42  ;;  %v712_v55 = vadd.f32 %v670_v19, %v584_v48  ;;  %v569_v56 = vmul.f32 %v1252_v30, %v408_v17  ;;  %v585_v57 = vmul.f32 %v1264_v38, %v448_v18  ;;  %v416_v29 = vpop.f32.mrf.mxu0  ;;  %v456_v58 = vpop.f32.mrf.mxu1 }
 0x10e   : > { %v791_v37 = vsel %vm727_vm0, %v695_v27, %v759_v52  ;;  %v807_v59 = vsel %vm743_vm1, %v711_v33, %v775_v53  ;;  %v570_v60 = vmul.f32 %v1252_v30, %v410_v23  ;;  %v586_v61 = vmul.f32 %v1264_v38, %v450_v24 }
 0x10f   : > { %823 = vst [vmem:[%s1287_s20 + $0x40] sm:$0xff] %v791_v37  ;;  %839 = vst [vmem:[%s1287_s20 + $0xc0] sm:$0xff] %v807_v59  ;;  %vm728_vm2 = vcmp.ge.f32.partialorder %v696_v54, 0.0  ;;  %v760_v45 = vmul.f32 0.1, %v696_v54  ;;  %vm744_vm3 = vcmp.ge.f32.partialorder %v712_v55, 0.0  ;;  %v697_v0 = vadd.f32 %v1276_v46, %v569_v56  ;;  %v418_v5 = vpop.f32.mrf.mxu0  ;;  %v458_v6 = vpop.f32.mrf.mxu1 }
 0x110   : > { %v776_v63 = vmul.f32 0.1, %v712_v55  ;;  %v713_v1 = vadd.f32 %v675_v62, %v585_v57  ;;  %v698_v26 = vadd.f32 %v1276_v46, %v570_v60  ;;  %v714_v3 = vadd.f32 %v675_v62, %v586_v61 }
 0x111   : > { %v792_v35 = vsel %vm728_vm2, %v696_v54, %v760_v45  ;;  %v571_v30 = vmul.f32 %v1254_v31, %v414_v49  ;;  %v587_v38 = vmul.f32 %v1266_v39, %v454_v51  ;;  %vm729_vm4 = vcmp.ge.f32.partialorder %v697_v0, 0.0  ;;  %v420_v16 = vpop.f32.mrf.mxu0  ;;  %v460_v17 = vpop.f32.mrf.mxu1 }
 0x112   : > { %v808_v4 = vsel %vm744_vm3, %v712_v55, %v776_v63  ;;  %824 = vst [vmem:[%s1287_s20 + $0x48] sm:$0xff] %v792_v35  ;;  %v761_v7 = vmul.f32 0.1, %v697_v0  ;;  %vm745_vm5 = vcmp.ge.f32.partialorder %v713_v1, 0.0  ;;  %v777_v8 = vmul.f32 0.1, %v713_v1 }
 0x113   : > { %840 = vst [vmem:[%s1287_s20 + $0xc8] sm:$0xff] %v808_v4  ;;  %vm730_vm6 = vcmp.ge.f32.partialorder %v698_v26, 0.0  ;;  %v762_v46 = vmul.f32 0.1, %v698_v26  ;;  %vm746_vm7 = vcmp.ge.f32.partialorder %v714_v3, 0.0  ;;  %v699_v12 = vadd.f32 %v1278_v47, %v571_v30 }
 0x114   : > { %v778_v9 = vmul.f32 0.1, %v714_v3  ;;  %v793_v10 = vsel %vm729_vm4, %v697_v0, %v761_v7  ;;  %v809_v11 = vsel %vm745_vm5, %v713_v1, %v777_v8  ;;  %v715_v13 = vadd.f32 %v680_v43, %v587_v38 }
 0x115   : > { %825 = vst [vmem:[%s1287_s20 + $0x50] sm:$0xff] %v793_v10  ;;  %841 = vst [vmem:[%s1287_s20 + $0xd0] sm:$0xff] %v809_v11  ;;  %v794_v14 = vsel %vm730_vm6, %v698_v26, %v762_v46  ;;  %v572_v28 = vmul.f32 %v1254_v31, %v416_v29  ;;  %v588_v36 = vmul.f32 %v1266_v39, %v456_v58  ;;  %vm731_vm8 = vcmp.ge.f32.partialorder %v699_v12, 0.0 }
 0x116   : > { %v810_v15 = vsel %vm746_vm7, %v714_v3, %v778_v9  ;;  %826 = vst [vmem:[%s1287_s20 + $0x58] sm:$0xff] %v794_v14  ;;  %v763_v18 = vmul.f32 0.1, %v699_v12  ;;  %vm747_vm9 = vcmp.ge.f32.partialorder %v715_v13, 0.0  ;;  %v779_v19 = vmul.f32 0.1, %v715_v13 }
 0x117   : > { %842 = vst [vmem:[%s1287_s20 + $0xd8] sm:$0xff] %v810_v15  ;;  %v700_v20 = vadd.f32 %v1278_v47, %v572_v28  ;;  %v716_v21 = vadd.f32 %v680_v43, %v588_v36  ;;  %v573_v44 = vmul.f32 %v1256_v32, %v418_v5  ;;  %v589_v22 = vmul.f32 %v1268_v40, %v458_v6 }
 0x118   : > { %v795_v31 = vsel %vm731_vm8, %v699_v12, %v763_v18  ;;  %v811_v23 = vsel %vm747_vm9, %v715_v13, %v779_v19  ;;  %v574_v39 = vmul.f32 %v1256_v32, %v420_v16  ;;  %v590_v24 = vmul.f32 %v1268_v40, %v460_v17 }
 0x119   : > { %827 = vst [vmem:[%s1287_s20 + $0x60] sm:$0xff] %v795_v31  ;;  %843 = vst [vmem:[%s1287_s20 + $0xe0] sm:$0xff] %v811_v23  ;;  %vm732_vm10 = vcmp.ge.f32.partialorder %v700_v20, 0.0  ;;  %v764_v2 = vmul.f32 0.1, %v700_v20  ;;  %vm748_vm11 = vcmp.ge.f32.partialorder %v716_v21, 0.0  ;;  %v701_v27 = vadd.f32 %v1280_v50, %v573_v44 }
 0x11a   : > { %v780_v47 = vmul.f32 0.1, %v716_v21  ;;  %v717_v33 = vadd.f32 %v685_v25, %v589_v22  ;;  %v702_v34 = vadd.f32 %v1280_v50, %v574_v39  ;;  %v718_v41 = vadd.f32 %v685_v25, %v590_v24 }
 0x11b   : > { %v796_v42 = vsel %vm732_vm10, %v700_v20, %v764_v2  ;;  %vm733_vm12 = vcmp.ge.f32.partialorder %v701_v27, 0.0  ;;  %v765_v40 = vmul.f32 0.1, %v701_v27 }
 0x11c   : > { %v812_v32 = vsel %vm748_vm11, %v716_v21, %v780_v47  ;;  %828 = vst [vmem:[%s1287_s20 + $0x68] sm:$0xff] %v796_v42  ;;  %vm749_vm13 = vcmp.ge.f32.partialorder %v717_v33, 0.0  ;;  %v781_v48 = vmul.f32 0.1, %v717_v33  ;;  %vm734_vm14 = vcmp.ge.f32.partialorder %v702_v34, 0.0 }
 0x11d   : > { %844 = vst [vmem:[%s1287_s20 + $0xe8] sm:$0xff] %v812_v32  ;;  %v766_v49 = vmul.f32 0.1, %v702_v34  ;;  %vm750_vm15 = vcmp.ge.f32.partialorder %v718_v41, 0.0  ;;  %v782_v51 = vmul.f32 0.1, %v718_v41  ;;  %v797_v52 = vsel %vm733_vm12, %v701_v27, %v765_v40 }
 0x11e   : > { %v813_v53 = vsel %vm749_vm13, %v717_v33, %v781_v48  ;;  %829 = vst [vmem:[%s1287_s20 + $0x70] sm:$0xff] %v797_v52 }
 0x11f   : > { %845 = vst [vmem:[%s1287_s20 + $0xf0] sm:$0xff] %v813_v53  ;;  %v798_v50 = vsel %vm734_vm14, %v702_v34, %v766_v49  ;;  %v814_v54 = vsel %vm750_vm15, %v718_v41, %v782_v51 }
 0x120   : > { %830 = vst [vmem:[%s1287_s20 + $0x78] sm:$0xff] %v798_v50  ;;  %846 = vst [vmem:[%s1287_s20 + $0xf8] sm:$0xff] %v814_v54 }
 0x121 PF: > { %s14_s17 = sadd.s32 1, %s1028_s17   ;;  %s1371_s15 = smov %s1024_s16 }
 0x122   : > { %p11_p5 = scmp.ge.s32.totalorder %s14_s17, 4   ;;  %s1372_s16 = smov %s1374_s18 }
 0x124   :  { %13 = sbr.rel (!%p11_p5) target bundleno = 2 (0x2), region = 66 }

// kernel: convgru_forward.2
= control target key start
LH: loop header
LB: loop body
LE: loop exit
PB: predicated region body
PF: predicated region fallthrough
CT: control target
= control target key end

     0   :  { %s3233_s27 = smov 0   ;;  %s3235_s28 = smov 0   ;;  %s4741_s0 = inlined_call_operand.vmem [shape: f32[2,128,256], index: 0, kind: input, shape index: {}]   ;;  %s4742_s1 = inlined_call_operand.vmem [shape: f32[2,128,256], index: 1, kind: input, shape index: {}]   ;;  %s4743_s2 = inlined_call_operand.vmem [shape: bf16[384,256], index: 2, kind: input, shape index: {}]   ;;  %s4744_s3 = inlined_call_operand.vmem [shape: f32[384,1], index: 3, kind: input, shape index: {}]   ;;  %s4745_s4 = inlined_call_operand.vmem [shape: bf16[128,128], index: 4, kind: input, shape index: {}]   ;;  %s4746_s5 = inlined_call_operand.vmem [shape: f32[128,1], index: 5, kind: input, shape index: {}]   ;;  %s4747_s6 = inlined_call_operand.vmem [shape: bf16[128,128], index: 6, kind: input, shape index: {}]   ;;  %s4748_s7 = inlined_call_operand.vmem [shape: f32[2,128,256], index: 7, kind: output, shape index: {0}]   ;;  %s4749_s8 = inlined_call_operand.vmem [shape: f32[2,1,128,2], index: 8, kind: output, shape index: {1}]  }
   0x1   :  { %s3237_s29 = smov 0  }
   0x2 LB: > { %s31_s30 = sadd.s32 1, %s3181_s28  ;;  %p2700_p0 = scmp.ge.s32.totalorder %s3185_s29, 1  ;;  %s3185_s29 = sphi %s3237_s29, %s19_s29   ;;  %s3181_s28 = sphi %s3235_s28, %s4903_s28   ;;  %s3177_s27 = sphi %s3233_s27, %s4902_s27  }
   0x3   : > { %p33_p1 = scmp.ge.s32.totalorder %s31_s30, 2  ;;  %p305_p2 = scmp.lt.s32.totalorder %s3185_s29, 3 }
   0x5   : > { %s4905_s30 = smov (%p33_p1, %s31_s30), 0  ;;  %p306_p3 = pnand %p2700_p0, %p305_p2 }
   0x7   : > { %309 = sbr.rel (%p306_p3) target bundleno = 1175 (0x497), region = 48 }
   0xc   : > { %p366_p4 = scmp.lt.s32.totalorder %s3177_s27, 1  ;;  %v579_v0 = vld [vmem:[%s4744_s3 + $0xf0] sm:$0xff]  ;;  %v577_v1 = vld [vmem:[%s4744_s3 + $0xe0] sm:$0xff]  ;;  %v4750_v2 = vmov 0   ;;  %v580_v3 = vld [vmem:[%s4744_s3 + $0xf8] sm:$0xff]  ;;  %vm2504_vm0 = vcmask 7168  }
   0xd   : > { %2836 = vset.pattern.permute.xlu0 %v4750_v2  ;;  %2837 = vset.pattern.permute.xlu1 %v4750_v2  ;;  %v578_v4 = vld [vmem:[%s4744_s3 + $0xe8] sm:$0xff]  ;;  %v575_v5 = vld [vmem:[%s4744_s3 + $0xd0] sm:$0xff]  ;;  %v576_v9 = vld [vmem:[%s4744_s3 + $0xd8] sm:$0xff]  ;;  %vm2521_vm1 = vcmask 15360  }
   0xe   : > { %s4907_s27 = smov (!%p366_p4, %s3177_s27), 1  ;;  %749 = vperm.xlu0 %2836, %v579_v0   ;;  %739 = vperm.xlu1 %2837, %v577_v1   ;;  %v573_v24 = vld [vmem:[%s4744_s3 + $0xc0] sm:$0xff]  ;;  %v574_v27 = vld [vmem:[%s4744_s3 + $0xc8] sm:$0xff]  ;;  %v571_v32 = vld [vmem:[%s4744_s3 + $0xb0] sm:$0xff] }
   0xf   : > { %s3268_s17 = sshll.u32 %s4907_s27, 8  ;;  %v572_v35 = vld [vmem:[%s4744_s3 + $0xb8] sm:$0xff]  ;;  %v569_v40 = vld [vmem:[%s4744_s3 + $0xa0] sm:$0xff]  ;;  %v570_v43 = vld [vmem:[%s4744_s3 + $0xa8] sm:$0xff]  ;;  %s2778_s15 = sshll.u32 %s4907_s27, 7 }
  0x10   : > { %s3274_s20 = scalar_lea.vmem %s4741_s0, %s3268_s17  ;;  %v567_v48 = vld [vmem:[%s4744_s3 + $0x90] sm:$0xff]  ;;  %v568_v51 = vld [vmem:[%s4744_s3 + $0x98] sm:$0xff]  ;;  %v565_v53 = vld [vmem:[%s4744_s3 + $0x80] sm:$0xff]  ;;  %s3346_s13 = scalar_lea.vmem %s4742_s1, %s3268_s17 }
  0x11   : > { %v434_v6 = vld [vmem:[%s3274_s20 + $0xe8] sm:$0xff]  ;;  %v436_v7 = vld [vmem:[%s3274_s20 + $0xf8] sm:$0xff]  ;;  %v433_v8 = vld [vmem:[%s3274_s20 + $0xe0] sm:$0xff]  ;;  %s4317_s16 = scalar_lea.vmem %s4748_s7, %s3268_s17 }
  0x12   : > { %754 = vperm.xlu0 %2836, %v580_v3   ;;  %744 = vperm.xlu1 %2837, %v578_v4   ;;  %v484_v10 = vpack.c.bf16 %v436_v7, %v434_v6  ;;  %v435_v11 = vld [vmem:[%s3274_s20 + $0xf0] sm:$0xff]  ;;  %v430_v12 = vld [vmem:[%s3274_s20 + $0xc8] sm:$0xff]  ;;  %v432_v13 = vld [vmem:[%s3274_s20 + $0xd8] sm:$0xff] }
  0x13   : > { %v483_v14 = vpack.c.bf16 %v435_v11, %v433_v8  ;;  %v482_v15 = vpack.c.bf16 %v432_v13, %v430_v12  ;;  %v429_v16 = vld [vmem:[%s3274_s20 + $0xc0] sm:$0xff]  ;;  %v431_v17 = vld [vmem:[%s3274_s20 + $0xd0] sm:$0xff]  ;;  %v426_v18 = vld [vmem:[%s3274_s20 + $0xa8] sm:$0xff] }
  0x14   : > { %1077 = vmatprep.subr.bf16.mxu0 %v484_v10  ;;  %v428_v19 = vld [vmem:[%s3274_s20 + $0xb8] sm:$0xff]  ;;  %2779 = vmatprep.subr.bf16.mxu1 %v484_v10  ;;  %v481_v20 = vpack.c.bf16 %v431_v17, %v429_v16  ;;  %v425_v22 = vld [vmem:[%s3274_s20 + $0xa0] sm:$0xff]  ;;  %v427_v23 = vld [vmem:[%s3274_s20 + $0xb0] sm:$0xff] }
  0x15   : > { %1078 = vmatpush1.bf16.msra.mxu0 %v483_v14  ;;  %v480_v21 = vpack.c.bf16 %v428_v19, %v426_v18  ;;  %v422_v25 = vld [vmem:[%s3274_s20 + $0x88] sm:$0xff]  ;;  %v424_v26 = vld [vmem:[%s3274_s20 + $0x98] sm:$0xff]  ;;  %2795 = vmatpush1.bf16.msra.mxu1 %v483_v14  ;;  %v479_v28 = vpack.c.bf16 %v427_v23, %v425_v22  ;;  %v421_v30 = vld [vmem:[%s3274_s20 + $0x80] sm:$0xff] }
  0x16   : > { %729 = vperm.xlu0 %2836, %v575_v5   ;;  %1079 = vmatprep.subr.bf16.mxu0 %v482_v15  ;;  %v478_v29 = vpack.c.bf16 %v424_v26, %v422_v25  ;;  %v423_v31 = vld [vmem:[%s3274_s20 + $0x90] sm:$0xff]  ;;  %v418_v33 = vld [vmem:[%s3274_s20 + $0x68] sm:$0xff]  ;;  %v420_v34 = vld [vmem:[%s3274_s20 + $0x78] sm:$0xff] }
  0x17   : > { %734 = vperm.xlu1 %2837, %v576_v9   ;;  %2780 = vmatprep.subr.bf16.mxu1 %v482_v15  ;;  %v477_v36 = vpack.c.bf16 %v423_v31, %v421_v30  ;;  %v476_v37 = vpack.c.bf16 %v420_v34, %v418_v33  ;;  %v417_v38 = vld [vmem:[%s3274_s20 + $0x60] sm:$0xff]  ;;  %v419_v39 = vld [vmem:[%s3274_s20 + $0x70] sm:$0xff]  ;;  %v414_v41 = vld [vmem:[%s3274_s20 + $0x48] sm:$0xff] }
  0x18   : > { %v416_v42 = vld [vmem:[%s3274_s20 + $0x58] sm:$0xff]  ;;  %v475_v44 = vpack.c.bf16 %v419_v39, %v417_v38  ;;  %v413_v46 = vld [vmem:[%s3274_s20 + $0x40] sm:$0xff]  ;;  %v415_v47 = vld [vmem:[%s3274_s20 + $0x50] sm:$0xff] }
  0x19   : > { %1080 = vmatpush1.bf16.msra.mxu0 %v481_v20  ;;  %2796 = vmatpush1.bf16.msra.mxu1 %v481_v20  ;;  %v474_v45 = vpack.c.bf16 %v416_v42, %v414_v41  ;;  %v410_v49 = vld [vmem:[%s3274_s20 + $0x28] sm:$0xff]  ;;  %v412_v50 = vld [vmem:[%s3274_s20 + $0x38] sm:$0xff]  ;;  %v473_v52 = vpack.c.bf16 %v415_v47, %v413_v46  ;;  %v409_v56 = vld [vmem:[%s3274_s20 + $0x20] sm:$0xff] }
  0x1a   : > { %719 = vperm.xlu0 %2836, %v573_v24   ;;  %1081 = vmatprep.subr.bf16.mxu0 %v480_v21  ;;  %v566_v54 = vld [vmem:[%s4744_s3 + $0x88] sm:$0xff]  ;;  %v472_v55 = vpack.c.bf16 %v412_v50, %v410_v49  ;;  %v411_v57 = vld [vmem:[%s3274_s20 + $0x30] sm:$0xff]  ;;  %v408_v59 = vld [vmem:[%s3274_s20 + $0x18] sm:$0xff] }
  0x1b   : > { %724 = vperm.xlu1 %2837, %v574_v27   ;;  %2781 = vmatprep.subr.bf16.mxu1 %v480_v21  ;;  %v406_v58 = vld [vmem:[%s3274_s20 + $0x8] sm:$0xff]  ;;  %v471_v61 = vpack.c.bf16 %v411_v57, %v409_v56  ;;  %v405_v62 = vld [vmem:[%s3274_s20] sm:$0xff]  ;;  %v563_v63 = vld [vmem:[%s4744_s3 + $0x70] sm:$0xff] }
  0x1c   : > { %v2840_v60 = vld [vmem:[%s4743_s2 + $0x4] ss:$8 sps:$4 sm:$0xff]   ;;  %v470_v0 = vpack.c.bf16 %v408_v59, %v406_v58  ;;  %v407_v1 = vld [vmem:[%s3274_s20 + $0x10] sm:$0xff]  ;;  %v468_v4 = vld [vmem:[%s3346_s13 + $0xf8] sm:$0xff] }
  0x1d   : > { %1082 = vmatpush1.bf16.msra.mxu0 %v479_v28  ;;  %2797 = vmatpush1.bf16.msra.mxu1 %v479_v28  ;;  %v466_v3 = vld [vmem:[%s3346_s13 + $0xe8] sm:$0xff]  ;;  %v564_v5 = vld [vmem:[%s4744_s3 + $0x78] sm:$0xff]  ;;  %v469_v6 = vpack.c.bf16 %v407_v1, %v405_v62  ;;  %v465_v7 = vld [vmem:[%s3346_s13 + $0xe0] sm:$0xff] }
  0x1e   : > { %709 = vperm.xlu0 %2836, %v571_v32   ;;  %1083 = vmatprep.subr.bf16.mxu0 %v478_v29  ;;  %v467_v8 = vld [vmem:[%s3346_s13 + $0xf0] sm:$0xff]  ;;  %v500_v9 = vpack.c.bf16 %v468_v4, %v466_v3  ;;  %v561_v10 = vld [vmem:[%s4744_s3 + $0x60] sm:$0xff]  ;;  %v462_v11 = vld [vmem:[%s3346_s13 + $0xc8] sm:$0xff] }
  0x1f   : > { %714 = vperm.xlu1 %2837, %v572_v35   ;;  %2782 = vmatprep.subr.bf16.mxu1 %v478_v29  ;;  %v464_v12 = vld [vmem:[%s3346_s13 + $0xd8] sm:$0xff]  ;;  %v562_v13 = vld [vmem:[%s4744_s3 + $0x68] sm:$0xff]  ;;  %v499_v14 = vpack.c.bf16 %v467_v8, %v465_v7  ;;  %v461_v15 = vld [vmem:[%s3346_s13 + $0xc0] sm:$0xff] }
  0x20   : > { %1109 = vmatprep.mubr.bf16.mxu0 %v2840_v60  ;;  %v463_v16 = vld [vmem:[%s3346_s13 + $0xd0] sm:$0xff]  ;;  %v498_v17 = vpack.c.bf16 %v464_v12, %v462_v11  ;;  %v458_v18 = vld [vmem:[%s3346_s13 + $0xa8] sm:$0xff]  ;;  %v460_v19 = vld [vmem:[%s3346_s13 + $0xb8] sm:$0xff] }
  0x21   : > { %1084 = vmatpush1.bf16.msra.mxu0 %v477_v36  ;;  %2798 = vmatpush1.bf16.msra.mxu1 %v477_v36  ;;  %v595_v20 = vld [vmem:[%s4744_s3 + $0x170] sm:$0xff]  ;;  %v596_v21 = vld [vmem:[%s4744_s3 + $0x178] sm:$0xff]  ;;  %v497_v22 = vpack.c.bf16 %v463_v16, %v461_v15  ;;  %v457_v23 = vld [vmem:[%s3346_s13 + $0xa0] sm:$0xff]  ;;  %v496_v25 = vpack.c.bf16 %v460_v19, %v458_v18 }
  0x22   : > { %699 = vperm.xlu0 %2836, %v569_v40   ;;  %1085 = vmatprep.subr.bf16.mxu0 %v476_v37  ;;  %v459_v24 = vld [vmem:[%s3346_s13 + $0xb0] sm:$0xff]  ;;  %v454_v27 = vld [vmem:[%s3346_s13 + $0x88] sm:$0xff]  ;;  %v456_v28 = vld [vmem:[%s3346_s13 + $0x98] sm:$0xff] }
  0x23   : > { %704 = vperm.xlu1 %2837, %v570_v43   ;;  %2783 = vmatprep.subr.bf16.mxu1 %v476_v37  ;;  %v559_v26 = vld [vmem:[%s4744_s3 + $0x50] sm:$0xff]  ;;  %v560_v29 = vld [vmem:[%s4744_s3 + $0x58] sm:$0xff]  ;;  %v495_v30 = vpack.c.bf16 %v459_v24, %v457_v23  ;;  %v453_v31 = vld [vmem:[%s3346_s13 + $0x80] sm:$0xff]  ;;  %v494_v33 = vpack.c.bf16 %v456_v28, %v454_v27 }
  0x24   : > { %v455_v32 = vld [vmem:[%s3346_s13 + $0x90] sm:$0xff]  ;;  %v450_v34 = vld [vmem:[%s3346_s13 + $0x68] sm:$0xff]  ;;  %v452_v35 = vld [vmem:[%s3346_s13 + $0x78] sm:$0xff] }
  0x25   : > { %1086 = vmatpush1.bf16.msra.mxu0 %v475_v44  ;;  %2799 = vmatpush1.bf16.msra.mxu1 %v475_v44  ;;  %v593_v36 = vld [vmem:[%s4744_s3 + $0x160] sm:$0xff]  ;;  %v594_v37 = vld [vmem:[%s4744_s3 + $0x168] sm:$0xff]  ;;  %v493_v38 = vpack.c.bf16 %v455_v32, %v453_v31  ;;  %v451_v40 = vld [vmem:[%s3346_s13 + $0x70] sm:$0xff]  ;;  %v492_v42 = vpack.c.bf16 %v452_v35, %v450_v34 }
  0x26   : > { %689 = vperm.xlu0 %2836, %v567_v48   ;;  %1087 = vmatprep.subr.bf16.mxu0 %v474_v45  ;;  %v449_v39 = vld [vmem:[%s3346_s13 + $0x60] sm:$0xff]  ;;  %v446_v41 = vld [vmem:[%s3346_s13 + $0x48] sm:$0xff]  ;;  %v1877_v43 = vld [vmem:[%s4746_s5 + $0x70] sm:$0xff] }
  0x27   : > { %694 = vperm.xlu1 %2837, %v568_v51   ;;  %2784 = vmatprep.subr.bf16.mxu1 %v474_v45  ;;  %v448_v44 = vld [vmem:[%s3346_s13 + $0x58] sm:$0xff]  ;;  %v445_v46 = vld [vmem:[%s3346_s13 + $0x40] sm:$0xff]  ;;  %v447_v47 = vld [vmem:[%s3346_s13 + $0x50] sm:$0xff]  ;;  %v491_v48 = vpack.c.bf16 %v451_v40, %v449_v39 }
  0x28   : > { %v1878_v45 = vld [vmem:[%s4746_s5 + $0x78] sm:$0xff]  ;;  %v3414_v49 = vld [vmem:[%s3346_s13 + $0x28] sm:$0xff]  ;;  %v490_v51 = vpack.c.bf16 %v448_v44, %v446_v41  ;;  %v489_v57 = vpack.c.bf16 %v447_v47, %v445_v46  ;;  %v591_v60 = vld [vmem:[%s4744_s3 + $0x150] sm:$0xff] }
  0x29   : > { %1088 = vmatpush1.bf16.msra.mxu0 %v473_v52  ;;  %2800 = vmatpush1.bf16.msra.mxu1 %v473_v52  ;;  %v3417_v50 = vld [vmem:[%s3346_s13 + $0x38] sm:$0xff]  ;;  %v557_v52 = vld [vmem:[%s4744_s3 + $0x40] sm:$0xff]  ;;  %v3435_v58 = vld [vmem:[%s3346_s13 + $0x8] sm:$0xff] }
  0x2a   : > { %679 = vperm.xlu0 %2836, %v565_v53   ;;  %1089 = vmatprep.subr.bf16.mxu0 %v472_v55  ;;  %v558_v53 = vld [vmem:[%s4744_s3 + $0x48] sm:$0xff]  ;;  %v488_v59 = vpack.c.bf16 %v3417_v50, %v3414_v49  ;;  %v592_v62 = vld [vmem:[%s4744_s3 + $0x158] sm:$0xff]  ;;  %v3454_v1 = vld [vmem:[%s3346_s13 + $0x10] sm:$0xff] }
  0x2b   : > { %684 = vperm.xlu1 %2837, %v566_v54   ;;  %2785 = vmatprep.subr.bf16.mxu1 %v472_v55  ;;  %v3426_v54 = vld [vmem:[%s3346_s13 + $0x20] sm:$0xff]  ;;  %v3429_v55 = vld [vmem:[%s3346_s13 + $0x30] sm:$0xff]  ;;  %v1874_v16 = vld [vmem:[%s4746_s5 + $0x58] sm:$0xff] }
  0x2c   : > { %v2878_v56 = vld [vmem:[%s4743_s2 + $0x144] ss:$8 sps:$4 sm:$0xff]   ;;  %v555_v7 = vld [vmem:[%s4744_s3 + $0x30] sm:$0xff]  ;;  %v2838_v8 = vld [vmem:[%s4743_s2] ss:$8 sps:$4 sm:$0xff]  }
  0x2d   : > { %1090 = vmatpush1.bf16.msra.mxu0 %v471_v61  ;;  %2801 = vmatpush1.bf16.msra.mxu1 %v471_v61  ;;  %v3443_v61 = vld [vmem:[%s3346_s13 + $0x18] sm:$0xff]  ;;  %v1875_v4 = vld [vmem:[%s4746_s5 + $0x60] sm:$0xff]  ;;  %v1873_v15 = vld [vmem:[%s4746_s5 + $0x50] sm:$0xff] }
  0x2e   : > { %669 = vperm.xlu0 %2836, %v563_v63   ;;  %1091 = vmatprep.subr.bf16.mxu0 %v470_v0  ;;  %v487_v63 = vpack.c.bf16 %v3429_v55, %v3426_v54  ;;  %v486_v3 = vpack.c.bf16 %v3443_v61, %v3435_v58  ;;  %v589_v11 = vld [vmem:[%s4744_s3 + $0x140] sm:$0xff]  ;;  %v587_v23 = vld [vmem:[%s4744_s3 + $0x130] sm:$0xff]  ;;  %v588_v24 = vld [vmem:[%s4744_s3 + $0x138] sm:$0xff] }
  0x2f   : > { %674 = vperm.xlu1 %2837, %v564_v5   ;;  %2786 = vmatprep.subr.bf16.mxu1 %v470_v0  ;;  %v3451_v0 = vld [vmem:[%s3346_s13] sm:$0xff]  ;;  %v1876_v5 = vld [vmem:[%s4746_s5 + $0x68] sm:$0xff]  ;;  %v551_v31 = vld [vmem:[%s4744_s3 + $0x10] sm:$0xff] }
  0x30   : > { %1309 = vmatprep.mubr.bf16.mxu1 %v2878_v56  ;;  %v2876_v12 = vld [vmem:[%s4743_s2 + $0x140] ss:$8 sps:$4 sm:$0xff]   ;;  %v2844_v18 = vld [vmem:[%s4743_s2 + $0x24] ss:$8 sps:$4 sm:$0xff]   ;;  %v552_v32 = vld [vmem:[%s4744_s3 + $0x18] sm:$0xff] }
  0x31   : > { %1092 = vmatpush1.bf16.msra.mxu0 %v469_v6  ;;  %2802 = vmatpush1.bf16.msra.mxu1 %v469_v6  ;;  %v485_v6 = vpack.c.bf16 %v3454_v1, %v3451_v0  ;;  %v553_v19 = vld [vmem:[%s4744_s3 + $0x20] sm:$0xff]  ;;  %v1870_v39 = vld [vmem:[%s4746_s5 + $0x38] sm:$0xff]  ;;  %v583_v44 = vld [vmem:[%s4744_s3 + $0x110] sm:$0xff] }
  0x32   : > { %659 = vperm.xlu0 %2836, %v561_v10   ;;  %1093 = vmatprep.subr.bf16.mxu0 %v500_v9  ;;  %v2841_v10 = vld [vmem:[%s4743_s2 + $0x14] ss:$8 sps:$4 sm:$0xff]   ;;  %v1871_v27 = vld [vmem:[%s4746_s5 + $0x40] sm:$0xff]  ;;  %v2855_v46 = vld [vmem:[%s4743_s2 + $0x50] ss:$8 sps:$4 sm:$0xff]  }
  0x33   : > { %664 = vperm.xlu1 %2837, %v562_v13   ;;  %2787 = vmatprep.subr.bf16.mxu1 %v500_v9  ;;  %v556_v9 = vld [vmem:[%s4744_s3 + $0x38] sm:$0xff]  ;;  %v590_v13 = vld [vmem:[%s4744_s3 + $0x148] sm:$0xff]  ;;  %v585_v35 = vld [vmem:[%s4744_s3 + $0x120] sm:$0xff] }
  0x34   : > { %v2891_v28 = vld [vmem:[%s4743_s2 + $0x160] ss:$8 sps:$4 sm:$0xff]   ;;  %v2850_v34 = vld [vmem:[%s4743_s2 + $0x44] ss:$8 sps:$4 sm:$0xff]   ;;  %v2853_v41 = vld [vmem:[%s4743_s2 + $0x54] ss:$8 sps:$4 sm:$0xff]  }
  0x35   : > { %1094 = vmatpush2.bf16.msra.mxu0 %v499_v14  ;;  %2803 = vmatpush2.bf16.msra.mxu1 %v499_v14  ;;  %v2882_v14 = vld [vmem:[%s4743_s2 + $0x154] ss:$8 sps:$4 sm:$0xff]   ;;  %v2852_v40 = vld [vmem:[%s4743_s2 + $0x40] ss:$8 sps:$4 sm:$0xff]   ;;  %v2856_v47 = vld [vmem:[%s4743_s2 + $0x64] ss:$8 sps:$4 sm:$0xff]  }
  0x36   : > { %829 = vperm.xlu0 %2836, %v595_v20   ;;  %1095 = vmatprep.subr.bf16.mxu0 %v498_v17  ;;  %v2885_v20 = vld [vmem:[%s4743_s2 + $0x150] ss:$8 sps:$4 sm:$0xff]   ;;  %v2858_v56 = vld [vmem:[%s4743_s2 + $0x60] ss:$8 sps:$4 sm:$0xff]  }
  0x37   : > { %834 = vperm.xlu1 %2837, %v596_v21   ;;  %2788 = vmatprep.subr.bf16.mxu1 %v498_v17  ;;  %v2843_v17 = vld [vmem:[%s4743_s2 + $0x10] ss:$8 sps:$4 sm:$0xff]   ;;  %v554_v21 = vld [vmem:[%s4744_s3 + $0x28] sm:$0xff] }
  0x39   : > { %1096 = vmatpush2.bf16.msra.mxu0 %v497_v22  ;;  %2804 = vmatpush2.bf16.msra.mxu1 %v497_v22  ;;  %v2888_v22 = vld [vmem:[%s4743_s2 + $0x164] ss:$8 sps:$4 sm:$0xff]  }
  0x3a   : > { %649 = vperm.xlu0 %2836, %v559_v26   ;;  %1097 = vmatprep.subr.bf16.mxu0 %v496_v25  ;;  %v2847_v26 = vld [vmem:[%s4743_s2 + $0x34] ss:$8 sps:$4 sm:$0xff]  }
  0x3b   : > { %654 = vperm.xlu1 %2837, %v560_v29   ;;  %2789 = vmatprep.subr.bf16.mxu1 %v496_v25  ;;  %v2846_v25 = vld [vmem:[%s4743_s2 + $0x20] ss:$8 sps:$4 sm:$0xff]  }
  0x3c   : > { %v1872_v29 = vld [vmem:[%s4746_s5 + $0x48] sm:$0xff] }
  0x3d   : > { %1098 = vmatpush2.bf16.msra.mxu0 %v495_v30  ;;  %2805 = vmatpush2.bf16.msra.mxu1 %v495_v30  ;;  %v2894_v30 = vld [vmem:[%s4743_s2 + $0x174] ss:$8 sps:$4 sm:$0xff]  }
  0x3e   : > { %819 = vperm.xlu0 %2836, %v593_v36   ;;  %1099 = vmatprep.subr.bf16.mxu0 %v494_v33  ;;  %v2897_v36 = vld [vmem:[%s4743_s2 + $0x170] ss:$8 sps:$4 sm:$0xff]  }
  0x3f   : > { %824 = vperm.xlu1 %2837, %v594_v37   ;;  %2790 = vmatprep.subr.bf16.mxu1 %v494_v33  ;;  %v2849_v33 = vld [vmem:[%s4743_s2 + $0x30] ss:$8 sps:$4 sm:$0xff]   ;;  %v586_v37 = vld [vmem:[%s4744_s3 + $0x128] sm:$0xff] }
  0x41   : > { %1100 = vmatpush2.bf16.msra.mxu0 %v493_v38  ;;  %2806 = vmatpush2.bf16.msra.mxu1 %v493_v38  ;;  %v1869_v38 = vld [vmem:[%s4746_s5 + $0x30] sm:$0xff] }
  0x42   : > { %1951 = vperm.xlu0 %2836, %v1877_v43   ;;  %1101 = vmatprep.subr.bf16.mxu0 %v492_v42  ;;  %v550_v43 = vld [vmem:[%s4744_s3 + $0x8] sm:$0xff] }
  0x43   : > { %1956 = vperm.xlu1 %2837, %v1878_v45   ;;  %2791 = vmatprep.subr.bf16.mxu1 %v492_v42  ;;  %v549_v42 = vld [vmem:[%s4744_s3] sm:$0xff]  ;;  %v584_v45 = vld [vmem:[%s4744_s3 + $0x118] sm:$0xff] }
  0x45   : > { %1102 = vmatpush2.bf16.msra.mxu0 %v491_v48  ;;  %2807 = vmatpush2.bf16.msra.mxu1 %v491_v48  ;;  %v1867_v48 = vld [vmem:[%s4746_s5 + $0x20] sm:$0xff] }
  0x46   : > { %639 = vperm.xlu0 %2836, %v557_v52   ;;  %1103 = vmatprep.subr.bf16.mxu0 %v490_v51  ;;  %v581_v52 = vld [vmem:[%s4744_s3 + $0x100] sm:$0xff] }
  0x47   : > { %644 = vperm.xlu1 %2837, %v558_v53   ;;  %2792 = vmatprep.subr.bf16.mxu1 %v490_v51  ;;  %v1868_v51 = vld [vmem:[%s4746_s5 + $0x28] sm:$0xff] }
  0x48   : > { %v582_v53 = vld [vmem:[%s4744_s3 + $0x108] sm:$0xff] }
  0x49   : > { %1104 = vmatpush2.bf16.msra.mxu0 %v489_v57  ;;  %2808 = vmatpush2.bf16.msra.mxu1 %v489_v57  ;;  %v2859_v57 = vld [vmem:[%s4743_s2 + $0x74] ss:$8 sps:$4 sm:$0xff]  }
  0x4a   : > { %809 = vperm.xlu0 %2836, %v591_v60   ;;  %1105 = vmatprep.subr.bf16.mxu0 %v488_v59  ;;  %v1866_v60 = vld [vmem:[%s4746_s5 + $0x18] sm:$0xff] }
  0x4b   : > { %814 = vperm.xlu1 %2837, %v592_v62   ;;  %2793 = vmatprep.subr.bf16.mxu1 %v488_v59  ;;  %v1865_v59 = vld [vmem:[%s4746_s5 + $0x10] sm:$0xff]  ;;  %v1863_v62 = vld [vmem:[%s4746_s5] sm:$0xff] }
  0x4d   : > { %1106 = vmatpush2.bf16.msra.mxu0 %v487_v63  ;;  %2809 = vmatpush2.bf16.msra.mxu1 %v487_v63  ;;  %v2861_v63 = vld [vmem:[%s4743_s2 + $0x70] ss:$8 sps:$4 sm:$0xff]  }
  0x4e   : > { %1941 = vperm.xlu0 %2836, %v1875_v4   ;;  %1107 = vmatprep.subr.bf16.mxu0 %v486_v3  ;;  %v2864_v4 = vld [vmem:[%s4743_s2 + $0x80] ss:$8 sps:$4 sm:$0xff]  }
  0x4f   : > { %1946 = vperm.xlu1 %2837, %v1876_v5   ;;  %2794 = vmatprep.subr.bf16.mxu1 %v486_v3  ;;  %v2862_v3 = vld [vmem:[%s4743_s2 + $0x84] ss:$8 sps:$4 sm:$0xff]   ;;  %v2865_v5 = vld [vmem:[%s4743_s2 + $0x94] ss:$8 sps:$4 sm:$0xff]  }
  0x51   : > { %1108 = vmatpush2.bf16.msra.mxu0 %v485_v6  ;;  %2810 = vmatpush2.bf16.msra.mxu1 %v485_v6  ;;  %v1864_v6 = vld [vmem:[%s4746_s5 + $0x8] sm:$0xff] }
  0x52   : > { %629 = vperm.xlu0 %2836, %v555_v7   ;;  %v2867_v7 = vld [vmem:[%s4743_s2 + $0x90] ss:$8 sps:$4 sm:$0xff]  }
  0x53   : > { %634 = vperm.xlu1 %2837, %v556_v9   ;;  %v2870_v9 = vld [vmem:[%s4743_s2 + $0xa0] ss:$8 sps:$4 sm:$0xff]  }
  0x54   : > { %1110 = vmatmul.mubr.bf16.vlgmr.msra.gmra.mxu0 %v2838_v8  ;;  %1310 = vmatmul.mubr.bf16.vlgmr.msra.gmra.mxu1 %v2876_v12  ;;  %v2868_v8 = vld [vmem:[%s4743_s2 + $0xa4] ss:$8 sps:$4 sm:$0xff]  }
  0x55   : > { %1119 = vmatprep.mubr.bf16.mxu0 %v2841_v10  ;;  %1319 = vmatprep.mubr.bf16.mxu1 %v2882_v14  ;;  %v2871_v10 = vld [vmem:[%s4743_s2 + $0xb4] ss:$8 sps:$4 sm:$0xff]   ;;  %v2874_v12 = vld [vmem:[%s4743_s2 + $0xc4] ss:$8 sps:$4 sm:$0xff]  }
  0x56   : > { %799 = vperm.xlu0 %2836, %v589_v11   ;;  %v2873_v11 = vld [vmem:[%s4743_s2 + $0xb0] ss:$8 sps:$4 sm:$0xff]   ;;  %v2880_v14 = vld [vmem:[%s4743_s2 + $0xd4] ss:$8 sps:$4 sm:$0xff]  }
  0x57   : > { %804 = vperm.xlu1 %2837, %v590_v13   ;;  %v2879_v13 = vld [vmem:[%s4743_s2 + $0xc0] ss:$8 sps:$4 sm:$0xff]  }
  0x5a   : > { %1931 = vperm.xlu0 %2836, %v1873_v15   ;;  %v2884_v15 = vld [vmem:[%s4743_s2 + $0xd0] ss:$8 sps:$4 sm:$0xff]  }
  0x5b   : > { %1936 = vperm.xlu1 %2837, %v1874_v16   ;;  %v2886_v16 = vld [vmem:[%s4743_s2 + $0xe4] ss:$8 sps:$4 sm:$0xff]  }
  0x5c   : > { %1120 = vmatmul.mubr.bf16.gmra.mxu0 %v2843_v17  ;;  %1320 = vmatmul.mubr.bf16.gmra.mxu1 %v2885_v20  ;;  %v2890_v17 = vld [vmem:[%s4743_s2 + $0xe0] ss:$8 sps:$4 sm:$0xff]   ;;  %v2898_v20 = vld [vmem:[%s4743_s2 + $0x104] ss:$8 sps:$4 sm:$0xff]  }
  0x5d   : > { %1129 = vmatprep.mubr.bf16.mxu0 %v2844_v18  ;;  %1329 = vmatprep.mubr.bf16.mxu1 %v2888_v22  ;;  %v2892_v18 = vld [vmem:[%s4743_s2 + $0xf4] ss:$8 sps:$4 sm:$0xff]  }
  0x5e   : > { %619 = vperm.xlu0 %2836, %v553_v19   ;;  %v2896_v19 = vld [vmem:[%s4743_s2 + $0xf0] ss:$8 sps:$4 sm:$0xff]   ;;  %v2901_v22 = vld [vmem:[%s4743_s2 + $0x114] ss:$8 sps:$4 sm:$0xff]  }
  0x5f   : > { %624 = vperm.xlu1 %2837, %v554_v21   ;;  %v2900_v21 = vld [vmem:[%s4743_s2 + $0x100] ss:$8 sps:$4 sm:$0xff]  }
  0x62   : > { %789 = vperm.xlu0 %2836, %v587_v23   ;;  %v2903_v23 = vld [vmem:[%s4743_s2 + $0x110] ss:$8 sps:$4 sm:$0xff]  }
  0x63   : > { %794 = vperm.xlu1 %2837, %v588_v24   ;;  %v2904_v24 = vld [vmem:[%s4743_s2 + $0x124] ss:$8 sps:$4 sm:$0xff]  }
  0x64   : > { %1130 = vmatmul.mubr.bf16.gmra.mxu0 %v2846_v25  ;;  %1330 = vmatmul.mubr.bf16.gmra.mxu1 %v2891_v28  ;;  %v2906_v25 = vld [vmem:[%s4743_s2 + $0x120] ss:$8 sps:$4 sm:$0xff]  }
  0x65   : > { %1139 = vmatprep.mubr.bf16.mxu0 %v2847_v26  ;;  %1339 = vmatprep.mubr.bf16.mxu1 %v2894_v30  ;;  %v2907_v26 = vld [vmem:[%s4743_s2 + $0x134] ss:$8 sps:$4 sm:$0xff]  }
  0x66   : > { %1921 = vperm.xlu0 %2836, %v1871_v27   ;;  %v2909_v27 = vld [vmem:[%s4743_s2 + $0x130] ss:$8 sps:$4 sm:$0xff]  }
  0x67   : > { %1926 = vperm.xlu1 %2837, %v1872_v29  }
  0x6a   : > { %609 = vperm.xlu0 %2836, %v551_v31  }
  0x6b   : > { %614 = vperm.xlu1 %2837, %v552_v32  }
  0x6c   : > { %1140 = vmatmul.mubr.bf16.gmra.mxu0 %v2849_v33  ;;  %1340 = vmatmul.mubr.bf16.gmra.mxu1 %v2897_v36 }
  0x6d   : > { %1149 = vmatprep.mubr.bf16.mxu0 %v2850_v34  ;;  %1750 = vmatprep.mubr.bf16.mxu1 %v4750_v2 }
  0x6e   : > { %779 = vperm.xlu0 %2836, %v585_v35  }
  0x6f   : > { %784 = vperm.xlu1 %2837, %v586_v37  }
  0x72   : > { %1911 = vperm.xlu0 %2836, %v1869_v38  }
  0x73   : > { %1916 = vperm.xlu1 %2837, %v1870_v39  }
  0x74   : > { %1150 = vmatmul.mubr.bf16.gmra.mxu0 %v2852_v40 }
  0x75   : > { %1159 = vmatprep.mubr.bf16.mxu0 %v2853_v41 }
  0x76   : > { %599 = vperm.xlu0 %2836, %v549_v42  }
  0x77   : > { %604 = vperm.xlu1 %2837, %v550_v43  }
  0x7a   : > { %769 = vperm.xlu0 %2836, %v583_v44  }
  0x7b   : > { %774 = vperm.xlu1 %2837, %v584_v45  }
  0x7c   : > { %1160 = vmatmul.mubr.bf16.gmra.mxu0 %v2855_v46 }
  0x7d   : > { %1169 = vmatprep.mubr.bf16.mxu0 %v2856_v47 }
  0x7e   : > { %1901 = vperm.xlu0 %2836, %v1867_v48  }
  0x7f   : > { %1906 = vperm.xlu1 %2837, %v1868_v51  }
  0x82   : > { %759 = vperm.xlu0 %2836, %v581_v52  }
  0x83   : > { %764 = vperm.xlu1 %2837, %v582_v53  }
  0x84   : > { %1170 = vmatmul.mubr.bf16.gmra.mxu0 %v2858_v56 }
  0x85   : > { %1179 = vmatprep.mubr.bf16.mxu0 %v2859_v57 }
  0x86   : > { %1891 = vperm.xlu0 %2836, %v1865_v59  }
  0x87   : > { %1896 = vperm.xlu1 %2837, %v1866_v60  }
  0x89   : > { %v3719_v40 = vpop.permute.xlu0 %749  ;;  %v3725_v43 = vpop.permute.xlu1 %739 }
  0x8a   : > { %1881 = vperm.xlu0 %2836, %v1863_v62  }
  0x8b   : > { %1886 = vperm.xlu1 %2837, %v1864_v6  }
  0x8c   : > { %1180 = vmatmul.mubr.bf16.gmra.mxu0 %v2861_v63 }
  0x8d   : > { %1189 = vmatprep.mubr.bf16.mxu0 %v2862_v3  ;;  %v3729_v45 = vpop.permute.xlu0 %754  ;;  %v3735_v48 = vpop.permute.xlu1 %744 }
  0x91   : > { %v3739_v52 = vpop.permute.xlu0 %729 }
  0x92   : > { %v3745_v57 = vpop.permute.xlu1 %734 }
  0x94   : > { %1190 = vmatmul.mubr.bf16.gmra.mxu0 %v2864_v4 }
  0x95   : > { %1199 = vmatprep.mubr.bf16.mxu0 %v2865_v5  ;;  %v3749_v60 = vpop.permute.xlu0 %719 }
  0x96   : > { %v3755_v3 = vpop.permute.xlu1 %724 }
  0x99   : > { %v3759_v5 = vpop.permute.xlu0 %709 }
  0x9c   : > { %1200 = vmatmul.mubr.bf16.gmra.mxu0 %v2867_v7 }
  0x9d   : > { %1209 = vmatprep.mubr.bf16.mxu0 %v2868_v8  ;;  %v3765_v8 = vpop.permute.xlu1 %714 }
  0xa4   : > { %1210 = vmatmul.mubr.bf16.gmra.mxu0 %v2870_v9 }
  0xa5   : > { %1219 = vmatprep.mubr.bf16.mxu0 %v2871_v10  ;;  %v3769_v10 = vpop.permute.xlu0 %699 }
  0xac   : > { %1220 = vmatmul.mubr.bf16.gmra.mxu0 %v2873_v11 }
  0xad   : > { %1229 = vmatprep.mubr.bf16.mxu0 %v2874_v12 }
  0xb4   : > { %1230 = vmatmul.mubr.bf16.gmra.mxu0 %v2879_v13  ;;  %v3775_v13 = vpop.permute.xlu1 %704 }
  0xb5   : > { %1239 = vmatprep.mubr.bf16.mxu0 %v2880_v14 }
  0xbc   : > { %1240 = vmatmul.mubr.bf16.gmra.mxu0 %v2884_v15  ;;  %v690_v15 = vpop.permute.xlu0 %689 }
  0xbd   : > { %1249 = vmatprep.mubr.bf16.mxu0 %v2886_v16 }
  0xc4   : > { %1250 = vmatmul.mubr.bf16.gmra.mxu0 %v2890_v17 }
  0xc5   : > { %1259 = vmatprep.mubr.bf16.mxu0 %v2892_v18  ;;  %v695_v18 = vpop.permute.xlu1 %694 }
  0xcc   : > { %1260 = vmatmul.mubr.bf16.gmra.mxu0 %v2896_v19 }
  0xcd   : > { %1269 = vmatprep.mubr.bf16.mxu0 %v2898_v20  ;;  %v680_v20 = vpop.permute.xlu0 %679 }
  0xd4   : > { %1270 = vmatmul.mubr.bf16.gmra.mxu0 %v2900_v21 }
  0xd5   : > { %1279 = vmatprep.mubr.bf16.mxu0 %v2901_v22 }
  0xdc   : > { %1280 = vmatmul.mubr.bf16.gmra.mxu0 %v2903_v23 }
  0xdd   : > { %1289 = vmatprep.mubr.bf16.mxu0 %v2904_v24 }
  0xe4   : > { %1290 = vmatmul.mubr.bf16.gmra.mxu0 %v2906_v25 }
  0xe5   : > { %1299 = vmatprep.mubr.bf16.mxu0 %v2907_v26  ;;  %v685_v26 = vpop.permute.xlu1 %684 }
  0xec   : > { %1300 = vmatmul.mubr.bf16.gmra.mxu0 %v2909_v27 }
 0x114   : > { %v3695_v28 = vpop.f32.mrf.mxu0 }
 0x116   : > { %v3697_v29 = vpop.f32.mrf.mxu0 }
 0x118   : > { %v3699_v30 = vpop.f32.mrf.mxu0 }
 0x11a   : > { %v3701_v31 = vpop.f32.mrf.mxu0 }
 0x11c   : > { %v3703_v32 = vpop.f32.mrf.mxu0 }
 0x11e   : > { %v3705_v33 = vpop.f32.mrf.mxu0 }
 0x120   : > { %v3707_v34 = vpop.f32.mrf.mxu0 }
 0x122   : > { %v3709_v35 = vpop.f32.mrf.mxu0 }
 0x124   : > { %v3711_v36 = vpop.f32.mrf.mxu0 }
 0x126   : > { %v3713_v37 = vpop.f32.mrf.mxu0 }
 0x128   : > { %v3715_v38 = vpop.f32.mrf.mxu0 }
 0x12a   : > { %v3717_v39 = vpop.f32.mrf.mxu0 }
 0x12c   : > { %v3721_v41 = vpop.f32.mrf.mxu0 }
 0x12d   : > { %4774 = vst [vmem:[#allocation2_spill] sm:$0xff] %v3721_v41 }
 0x12e   : > { %v3723_v42 = vpop.f32.mrf.mxu0 }
 0x12f   : > { %4775 = vst [vmem:[#allocation3_spill] sm:$0xff] %v3723_v42 }
 0x130   : > { %v3727_v44 = vpop.f32.mrf.mxu0 }
 0x131   : > { %4776 = vst [vmem:[#allocation4_spill] sm:$0xff] %v3727_v44 }
 0x132   : > { %v3731_v46 = vpop.f32.mrf.mxu0 }
 0x133   : > { %4777 = vst [vmem:[#allocation5_spill] sm:$0xff] %v3731_v46 }
 0x134   : > { %v3733_v47 = vpop.f32.mrf.mxu0 }
 0x135   : > { %4778 = vst [vmem:[#allocation6_spill] sm:$0xff] %v3733_v47 }
 0x136   : > { %v3737_v51 = vpop.f32.mrf.mxu0 }
 0x137   : > { %4779 = vst [vmem:[#allocation7_spill] sm:$0xff] %v3737_v51 }
 0x138   : > { %v3741_v53 = vpop.f32.mrf.mxu0 }
 0x139   : > { %4780 = vst [vmem:[#allocation8_spill] sm:$0xff] %v3741_v53 }
 0x13a   : > { %v3743_v56 = vpop.f32.mrf.mxu0 }
 0x13b   : > { %4781 = vst [vmem:[#allocation9_spill] sm:$0xff] %v3743_v56 }
 0x13c   : > { %v3747_v59 = vpop.f32.mrf.mxu0 }
 0x13d   : > { %4782 = vst [vmem:[#allocation10_spill] sm:$0xff] %v3747_v59 }
 0x13e   : > { %v3751_v62 = vpop.f32.mrf.mxu0 }
 0x13f   : > { %4783 = vst [vmem:[#allocation11_spill] sm:$0xff] %v3751_v62 }
 0x140   : > { %v3753_v63 = vpop.f32.mrf.mxu0 }
 0x141   : > { %4784 = vst [vmem:[#allocation12_spill] sm:$0xff] %v3753_v63 }
 0x142   : > { %v3757_v4 = vpop.f32.mrf.mxu0 }
 0x143   : > { %4785 = vst [vmem:[#allocation13_spill] sm:$0xff] %v3757_v4 }
 0x144   : > { %v3761_v6 = vpop.f32.mrf.mxu0 }
 0x145   : > { %4786 = vst [vmem:[#allocation14_spill] sm:$0xff] %v3761_v6 }
 0x146   : > { %v3763_v7 = vpop.f32.mrf.mxu0 }
 0x147   : > { %4787 = vst [vmem:[#allocation15_spill] sm:$0xff] %v3763_v7 }
 0x148   : > { %v3767_v9 = vpop.f32.mrf.mxu0 }
 0x149   : > { %4788 = vst [vmem:[#allocation16_spill] sm:$0xff] %v3767_v9 }
 0x14a   : > { %v3771_v11 = vpop.f32.mrf.mxu0 }
 0x14b   : > { %4789 = vst [vmem:[#allocation17_spill] sm:$0xff] %v3771_v11 }
 0x14c   : > { %v3773_v12 = vpop.f32.mrf.mxu0 }
 0x14d   : > { %4790 = vst [vmem:[#allocation18_spill] sm:$0xff] %v3773_v12 }
 0x14e   : > { %v3777_v14 = vpop.f32.mrf.mxu0 }
 0x14f   : > { %4791 = vst [vmem:[#allocation19_spill] sm:$0xff] %v3777_v14 }
 0x150   : > { %v3779_v16 = vpop.f32.mrf.mxu0 }
 0x151   : > { %4792 = vst [vmem:[#allocation20_spill] sm:$0xff] %v3779_v16 }
 0x152   : > { %v3781_v17 = vpop.f32.mrf.mxu0 }
 0x153   : > { %4793 = vst [vmem:[#allocation21_spill] sm:$0xff] %v3781_v17 }
 0x154   : > { %v1191_v19 = vpop.f32.mrf.mxu0 }
 0x155   : > { %v1192_v21 = vadd.f32 %v1191_v19, %v680_v20 }
 0x156   : > { %v1193_v22 = vpop.f32.mrf.mxu0 }
 0x157   : > { %v1194_v23 = vadd.f32 %v1193_v22, %v680_v20  ;;  %v1478_v24 = vmul.f32 0.5, %v1192_v21 }
 0x158   : > { %v1195_v25 = vpop.f32.mrf.mxu0 }
 0x159   : > { %2926 = vtanh.f32 %v1478_v24  ;;  %v1479_v27 = vmul.f32 0.5, %v1194_v23  ;;  %v1196_v2 = vadd.f32 %v1195_v25, %v685_v26 }
 0x15a   : > { %v1197_v12 = vpop.f32.mrf.mxu0 }
 0x15b   : > { %v1198_v11 = vadd.f32 %v1197_v12, %v685_v26  ;;  %2928 = vtanh.f32 %v1479_v27  ;;  %v1480_v14 = vmul.f32 0.5, %v1196_v2 }
 0x15c   : > { %v1201_v9 = vpop.f32.mrf.mxu0 }
 0x15d   : > { %2930 = vtanh.f32 %v1480_v14  ;;  %v1481_v16 = vmul.f32 0.5, %v1198_v11  ;;  %v1202_v17 = vadd.f32 %v1201_v9, %v690_v15 }
 0x15e   : > { %v1203_v7 = vpop.f32.mrf.mxu0 }
 0x15f   : > { %v1204_v6 = vadd.f32 %v1203_v7, %v690_v15  ;;  %2932 = vtanh.f32 %v1481_v16  ;;  %v1482_v19 = vmul.f32 0.5, %v1202_v17 }
 0x160   : > { %v1205_v4 = vpop.f32.mrf.mxu0 }
 0x161   : > { %v1483_v20 = vmul.f32 0.5, %v1204_v6  ;;  %2934 = vtanh.f32 %v1482_v19  ;;  %v1206_v21 = vadd.f32 %v1205_v4, %v695_v18 }
 0x162   : > { %v1207_v22 = vpop.f32.mrf.mxu0 }
 0x163   : > { %2936 = vtanh.f32 %v1483_v20  ;;  %v1208_v23 = vadd.f32 %v1207_v22, %v695_v18  ;;  %v1484_v24 = vmul.f32 0.5, %v1206_v21 }
 0x164   : > { %v3783_v25 = vpop.f32.mrf.mxu0 }
 0x165   : > { %v1485_v12 = vmul.f32 0.5, %v1208_v23  ;;  %2938 = vtanh.f32 %v1484_v24 }
 0x166   : > { %v3785_v2 = vpop.f32.mrf.mxu0  ;;  %v2927_v11 = vpop.eup %2926 }
 0x167   : > { %2940 = vtanh.f32 %v1485_v12  ;;  %v1542_v9 = vadd.f32 1.0, %v2927_v11 }
 0x168   : > { %v3787_v7 = vpop.f32.mrf.mxu0  ;;  %v2929_v14 = vpop.eup %2928 }
 0x169   : > { %v1543_v15 = vadd.f32 1.0, %v2929_v14  ;;  %v1574_v16 = vmul.f32 0.5, %v1542_v9 }
 0x16a   : > { %v3789_v6 = vpop.f32.mrf.mxu0  ;;  %v2931_v4 = vpop.eup %2930 }
 0x16b   : > { %v1544_v17 = vadd.f32 1.0, %v2931_v4  ;;  %v1575_v27 = vmul.f32 0.5, %v1543_v15  ;;  %v3796_v24 = vmul.f32 %v1574_v16, %v3451_v0 }
 0x16c   : > { %v3791_v18 = vpop.f32.mrf.mxu0  ;;  %v2933_v26 = vpop.eup %2932 }
 0x16d   : > { %v1576_v19 = vmul.f32 0.5, %v1544_v17  ;;  %v1545_v20 = vadd.f32 1.0, %v2933_v26  ;;  %v3806_v15 = vmul.f32 %v1575_v27, %v3435_v58 }
 0x16e   : > { %v3793_v21 = vpop.f32.mrf.mxu0  ;;  %v2935_v22 = vpop.eup %2934 }
 0x16f   : > { %v3799_v12 = vmul.f32 %v1576_v19, %v3454_v1  ;;  %v1577_v11 = vmul.f32 0.5, %v1545_v20  ;;  %v1546_v14 = vadd.f32 1.0, %v2935_v22 }
 0x170   : > { %v2937_v23 = vpop.eup %2936  ;;  %v3801_v9 = vpop.f32.mrf.mxu0 }
 0x171   : > { %v1547_v4 = vadd.f32 1.0, %v2937_v23  ;;  %v3809_v17 = vmul.f32 %v1577_v11, %v3443_v61  ;;  %v1578_v1 = vmul.f32 0.5, %v1546_v14 }
 0x172   : > { %v3803_v63 = vpop.f32.mrf.mxu0  ;;  %v2939_v16 = vpop.eup %2938 }
 0x173   : > { %v1548_v19 = vadd.f32 1.0, %v2939_v16  ;;  %v1579_v62 = vmul.f32 0.5, %v1547_v4  ;;  %v3818_v61 = vmul.f32 %v1578_v1, %v3426_v54 }
 0x174   : > { %v2941_v26 = vpop.eup %2940  ;;  %v3813_v20 = vpop.f32.mrf.mxu0 }
 0x175   : > { %v1549_v23 = vadd.f32 1.0, %v2941_v26  ;;  %v1580_v59 = vmul.f32 0.5, %v1548_v19  ;;  %v3824_v14 = vmul.f32 %v1579_v62, %v3414_v49 }
 0x176   : > { %v1233_v58 = vpop.f32.mrf.mxu0 }
 0x177   : > { %v1581_v27 = vmul.f32 0.5, %v1549_v23  ;;  %v3821_v11 = vmul.f32 %v1580_v59, %v3429_v55 }
 0x178   : > { %v1235_v0 = vpop.f32.mrf.mxu0 }
 0x179   : > { %v3827_v16 = vmul.f32 %v1581_v27, %v3417_v50 }
 0x17a   : > { %v1237_v56 = vpop.f32.mrf.mxu0 }
 0x17b   : > { %v1238_v59 = vadd.f32 %v1237_v56, %v3755_v3 }
 0x17c   : > { %v1241_v26 = vpop.f32.mrf.mxu0 }
 0x17d   : > { %v1497_v53 = vmul.f32 0.5, %v1238_v59 }
 0x17e   : > { %v1243_v54 = vpop.f32.mrf.mxu0 }
 0x17f   : > { %v1244_v22 = vadd.f32 %v1243_v54, %v3739_v52  ;;  %2942 = vtanh.f32 %v1497_v53 }
 0x180   : > { %v1245_v1 = vpop.f32.mrf.mxu0 }
 0x181   : > { %v1499_v4 = vmul.f32 0.5, %v1244_v22  ;;  %v1246_v22 = vadd.f32 %v1245_v1, %v3745_v57 }
 0x182   : > { %v1247_v23 = vpop.f32.mrf.mxu0 }
 0x183   : > { %v1248_v62 = vadd.f32 %v1247_v23, %v3745_v57  ;;  %2944 = vtanh.f32 %v1499_v4  ;;  %v1500_v57 = vmul.f32 0.5, %v1246_v22 }
 0x184   : > { %v1251_v55 = vpop.f32.mrf.mxu0 }
 0x185   : > { %v1501_v47 = vmul.f32 0.5, %v1248_v62  ;;  %v1252_v23 = vadd.f32 %v1251_v55, %v3725_v43 }
 0x186   : > { %v1253_v49 = vpop.f32.mrf.mxu0 }
 0x187   : > { %v1254_v50 = vadd.f32 %v1253_v49, %v3725_v43  ;;  %2946 = vtanh.f32 %v1501_v47  ;;  %v1234_v43 = vadd.f32 %v1233_v58, %v3749_v60  ;;  %v1224_v58 = vadd.f32 %v3793_v21, %v3759_v5 }
 0x188   : > { %v1255_v27 = vpop.f32.mrf.mxu0  ;;  %v1214_v21 = vadd.f32 %v3785_v2, %v3769_v10 }
 0x189   : > { %v1256_v19 = vadd.f32 %v1255_v27, %v3735_v48  ;;  %v1503_v44 = vmul.f32 0.5, %v1254_v50  ;;  %v1491_v50 = vmul.f32 0.5, %v1224_v58 }
 0x18a   : > { %v1257_v51 = vpop.f32.mrf.mxu0 }
 0x18b   : > { %v1258_v46 = vadd.f32 %v1257_v51, %v3735_v48  ;;  %v1504_v49 = vmul.f32 0.5, %v1256_v19  ;;  %2948 = vtanh.f32 %v1503_v44  ;;  %v1502_v51 = vmul.f32 0.5, %v1252_v23 }
 0x18c   : > { %v1261_v42 = vpop.f32.mrf.mxu0  ;;  %v1236_v44 = vadd.f32 %v1235_v0, %v3755_v3  ;;  %v1495_v19 = vmul.f32 0.5, %v1234_v43  ;;  %v2943_v1 = vpop.eup %2942 }
 0x18d   : > { %v1505_v56 = vmul.f32 0.5, %v1258_v46  ;;  %v1262_v54 = vadd.f32 %v1261_v42, %v3719_v40  ;;  %v1242_v46 = vadd.f32 %v1241_v26, %v3739_v52  ;;  %v1232_v52 = vadd.f32 %v3813_v20, %v3749_v60 }
 0x18e   : > { %v1263_v41 = vpop.f32.mrf.mxu0  ;;  %v1496_v3 = vmul.f32 0.5, %v1236_v44  ;;  %v1222_v60 = vadd.f32 %v3791_v18, %v3759_v5  ;;  %v1212_v5 = vadd.f32 %v3783_v25, %v3769_v10 }
 0x18f   : > { %v1506_v59 = vmul.f32 0.5, %v1262_v54  ;;  %v1264_v62 = vadd.f32 %v1263_v41, %v3719_v40  ;;  %2950 = vtanh.f32 %v1505_v56  ;;  %v1228_v40 = vadd.f32 %v3803_v63, %v3765_v8 }
 0x190   : > { %v1265_v27 = vpop.f32.mrf.mxu0  ;;  %v1498_v26 = vmul.f32 0.5, %v1242_v46  ;;  %v1218_v63 = vadd.f32 %v3789_v6, %v3775_v13  ;;  %v1494_v20 = vmul.f32 0.5, %v1232_v52  ;;  %v2945_v55 = vpop.eup %2944  ;;  %v1490_v18 = vmul.f32 0.5, %v1222_v60 }
 0x191   : > { %v1266_v48 = vadd.f32 %v1265_v27, %v3729_v45  ;;  %2952 = vtanh.f32 %v1506_v59  ;;  %v1507_v42 = vmul.f32 0.5, %v1264_v62  ;;  %v1493_v0 = vmul.f32 0.5, %v1228_v40 }
 0x192   : > { %v1267_v53 = vpop.f32.mrf.mxu0  ;;  %2954 = vtanh.f32 %v1504_v49  ;;  %v1489_v54 = vmul.f32 0.5, %v1218_v63  ;;  %v1487_v59 = vmul.f32 0.5, %v1214_v21  ;;  %v1486_v27 = vmul.f32 0.5, %v1212_v5 }
 0x193   : > { %v1508_v47 = vmul.f32 0.5, %v1266_v48  ;;  %v1268_v4 = vadd.f32 %v1267_v53, %v3729_v45  ;;  %2956 = vtanh.f32 %v1507_v42  ;;  %v1226_v45 = vadd.f32 %v3801_v9, %v3765_v8 }
 0x194   : > { %v2947_v56 = vpop.eup %2946  ;;  %v1216_v8 = vadd.f32 %v3787_v7, %v3775_v13  ;;  %v1563_v58 = vadd.f32 1.0, %v2945_v55  ;;  %v1561_v63 = vadd.f32 1.0, %v2943_v1 }
 0x195   : > { %2958 = vtanh.f32 %v1508_v47  ;;  %v1509_v41 = vmul.f32 0.5, %v1268_v4  ;;  %v1492_v9 = vmul.f32 0.5, %v1226_v45  ;;  %v1565_v53 = vadd.f32 1.0, %v2947_v56 }
 0x196   : > { %2960 = vtanh.f32 %v1502_v51  ;;  %v1488_v22 = vmul.f32 0.5, %v1216_v8  ;;  %v3119_v8 = vld [vmem:[%s3346_s13 + $0xe8] sm:$0xff] }
 0x197   : > { %2962 = vtanh.f32 %v1509_v41  ;;  %v1597_v56 = vmul.f32 0.5, %v1565_v53 }
 0x198   : > { %2964 = vtanh.f32 %v1500_v57  ;;  %v2949_v6 = vpop.eup %2948 }
 0x199   : > { %2966 = vtanh.f32 %v1498_v26  ;;  %v1567_v42 = vadd.f32 1.0, %v2949_v6  ;;  %v3120_v6 = vld [vmem:[%s3346_s13 + $0xf8] sm:$0xff] }
 0x19a   : > { %2968 = vtanh.f32 %v1495_v19 }
 0x19b   : > { %2970 = vtanh.f32 %v1496_v3  ;;  %v1599_v19 = vmul.f32 0.5, %v1567_v42  ;;  %v3124_v42 = vld [vmem:[%s3346_s13 + $0xd0] sm:$0xff] }
 0x19c   : > { %2972 = vtanh.f32 %v1493_v0  ;;  %v2951_v23 = vpop.eup %2950 }
 0x19d   : > { %2974 = vtanh.f32 %v1494_v20  ;;  %v1569_v13 = vadd.f32 1.0, %v2951_v23  ;;  %v3118_v20 = vld [vmem:[%s3346_s13 + $0xf0] sm:$0xff]  ;;  %v3121_v23 = vld [vmem:[%s3346_s13 + $0xd8] sm:$0xff] }
 0x19e   : > { %v2953_v49 = vpop.eup %2952  ;;  %2976 = vtanh.f32 %v1491_v50 }
 0x19f   : > { %v2955_v2 = vpop.eup %2954  ;;  %2978 = vtanh.f32 %v1492_v9  ;;  %v1570_v48 = vadd.f32 1.0, %v2953_v49  ;;  %v1601_v4 = vmul.f32 0.5, %v1569_v13 }
 0x1a0   : > { %v2957_v62 = vpop.eup %2956  ;;  %2980 = vtanh.f32 %v1489_v54  ;;  %v1568_v43 = vadd.f32 1.0, %v2955_v2 }
 0x1a1   : > { %2982 = vtanh.f32 %v1490_v18  ;;  %v1571_v46 = vadd.f32 1.0, %v2957_v62  ;;  %v1602_v52 = vmul.f32 0.5, %v1570_v48  ;;  %v1633_v5 = vmul.f32 %v3121_v23, %v1601_v4 }
 0x1a2   : > { %v2959_v7 = vpop.eup %2958  ;;  %2984 = vtanh.f32 %v1487_v59  ;;  %v1600_v60 = vmul.f32 0.5, %v1568_v43  ;;  %v3122_v59 = vld [vmem:[%s3346_s13 + $0xe0] sm:$0xff]  ;;  %v1595_v62 = vmul.f32 0.5, %v1563_v58 }
 0x1a3   : > { %v2961_v51 = vpop.eup %2960  ;;  %v1572_v10 = vadd.f32 1.0, %v2959_v7  ;;  %2986 = vtanh.f32 %v1488_v22  ;;  %v1603_v44 = vmul.f32 0.5, %v1571_v46  ;;  %v1634_v1 = vmul.f32 %v3122_v59, %v1602_v52  ;;  %v3123_v7 = vld [vmem:[%s3346_s13 + $0xc8] sm:$0xff]  ;;  %v3130_v59 = vld [vmem:[%s3346_s13 + $0xa0] sm:$0xff] }
 0x1a4   : > { %v2963_v25 = vpop.eup %2962  ;;  %2988 = vtanh.f32 %v1486_v27  ;;  %v1566_v41 = vadd.f32 1.0, %v2961_v51  ;;  %v1631_v27 = vmul.f32 %v3123_v7, %v1599_v19 }
 0x1a5   : > { %v2965_v47 = vpop.eup %2964  ;;  %v1604_v57 = vmul.f32 0.5, %v1572_v10  ;;  %v1573_v40 = vadd.f32 1.0, %v2963_v25  ;;  %v1635_v9 = vmul.f32 %v3119_v8, %v1603_v44  ;;  %v1632_v10 = vmul.f32 %v3124_v42, %v1600_v60  ;;  %v3125_v44 = vld [vmem:[%s3346_s13 + $0xb8] sm:$0xff] }
 0x1a6   : > { %v2967_v26 = vpop.eup %2966  ;;  %v1564_v0 = vadd.f32 1.0, %v2965_v47  ;;  %v1598_v49 = vmul.f32 0.5, %v1566_v41  ;;  %v1593_v47 = vmul.f32 0.5, %v1561_v63  ;;  %v1651_v4 = vpack.c.bf16 %v1633_v5, %v1631_v27  ;;  %v3129_v5 = vld [vmem:[%s3346_s13 + $0x98] sm:$0xff] }
 0x1a7   : > { %v1605_v45 = vmul.f32 0.5, %v1573_v40  ;;  %v2969_v3 = vpop.eup %2968  ;;  %v1636_v21 = vmul.f32 %v3118_v20, %v1604_v57  ;;  %v1562_v18 = vadd.f32 1.0, %v2967_v26  ;;  %v1629_v57 = vmul.f32 %v3125_v44, %v1597_v56  ;;  %v3126_v26 = vld [vmem:[%s3346_s13 + $0xc0] sm:$0xff] }
 0x1a8   : > { %v2971_v50 = vpop.eup %2970  ;;  %v1559_v22 = vadd.f32 1.0, %v2969_v3  ;;  %v1596_v51 = vmul.f32 0.5, %v1564_v0  ;;  %v1630_v58 = vmul.f32 %v3126_v26, %v1598_v49  ;;  %v3127_v0 = vld [vmem:[%s3346_s13 + $0xa8] sm:$0xff]  ;;  %v3892_v44 = vld [vmem:[%s3346_s13 + $0x80] sm:$0xff] }
 0x1a9   : > { %v1637_v54 = vmul.f32 %v3120_v6, %v1605_v45  ;;  %v2973_v55 = vpop.eup %2972  ;;  %v1560_v46 = vadd.f32 1.0, %v2971_v50  ;;  %v1652_v25 = vpack.c.bf16 %v1636_v21, %v1634_v1  ;;  %v1594_v52 = vmul.f32 0.5, %v1562_v18  ;;  %v3128_v50 = vld [vmem:[%s3346_s13 + $0xb0] sm:$0xff]  ;;  %4796 = vst [vmem:[#allocation24_spill] sm:$0xff] %v3892_v44 }
 0x1aa   : > { %v2975_v2 = vpop.eup %2974  ;;  %v1557_v43 = vadd.f32 1.0, %v2973_v55  ;;  %v1591_v3 = vmul.f32 0.5, %v1559_v22  ;;  %v1627_v60 = vmul.f32 %v3127_v0, %v1595_v62  ;;  %v1628_v56 = vmul.f32 %v3128_v50, %v1596_v51  ;;  %v3904_v0 = vld [vmem:[%s3346_s13 + $0x58] sm:$0xff]  ;;  %v3912_v50 = vld [vmem:[%s3346_s13 + $0x48] sm:$0xff] }
 0x1ab   : > { %v1653_v13 = vpack.c.bf16 %v1637_v54, %v1635_v9  ;;  %v2977_v48 = vpop.eup %2976  ;;  %v1558_v41 = vadd.f32 1.0, %v2975_v2  ;;  %v1592_v21 = vmul.f32 0.5, %v1560_v46  ;;  %v1650_v8 = vpack.c.bf16 %v1632_v10, %v1630_v58  ;;  %v3884_v46 = vld [vmem:[%s3346_s13 + $0x90] sm:$0xff] }
 0x1ac   : > { %v2979_v53 = vpop.eup %2978  ;;  %v1555_v45 = vadd.f32 1.0, %v2977_v48  ;;  %v1589_v54 = vmul.f32 0.5, %v1557_v43  ;;  %v1649_v23 = vpack.c.bf16 %v1629_v57, %v1627_v60  ;;  %v1625_v55 = vmul.f32 %v3129_v5, %v1593_v47  ;;  %4795 = vst [vmem:[#allocation23_spill] sm:$0xff] %v3884_v46  ;;  %v3900_v58 = vld [vmem:[%s3346_s13 + $0x70] sm:$0xff] }
 0x1ad   : > { %1718 = vmatprep.subr.bf16.mxu1 %v1653_v13  ;;  %v2981_v40 = vpop.eup %2980  ;;  %v1556_v20 = vadd.f32 1.0, %v2979_v53  ;;  %v1590_v49 = vmul.f32 0.5, %v1558_v41  ;;  %v1626_v1 = vmul.f32 %v3130_v59, %v1594_v52  ;;  %v3880_v13 = vld [vmem:[%s3346_s13 + $0x88] sm:$0xff]  ;;  %v1624_v51 = vmul.f32 %v3884_v46, %v1592_v21  ;;  %v3888_v53 = vld [vmem:[%s3346_s13 + $0x78] sm:$0xff] }
 0x1ae   : > { %1719 = vmatpush1.bf16.msra.mxu1 %v1652_v25  ;;  %v2983_v19 = vpop.eup %2982  ;;  %v1553_v6 = vadd.f32 1.0, %v2981_v40  ;;  %v1587_v62 = vmul.f32 0.5, %v1555_v45  ;;  %4794 = vst [vmem:[#allocation22_spill] sm:$0xff] %v3880_v13  ;;  %v1623_v7 = vmul.f32 %v3880_v13, %v1591_v3  ;;  %v1621_v43 = vmul.f32 %v3888_v53, %v1589_v54  ;;  %v3896_v41 = vld [vmem:[%s3346_s13 + $0x68] sm:$0xff] }
 0x1af   : > { %1720 = vmatprep.subr.bf16.mxu1 %v1651_v4  ;;  %v2985_v63 = vpop.eup %2984  ;;  %v1554_v18 = vadd.f32 1.0, %v2983_v19  ;;  %v1588_v48 = vmul.f32 0.5, %v1556_v20  ;;  %v1648_v42 = vpack.c.bf16 %v1628_v56, %v1626_v1  ;;  %v1622_v57 = vmul.f32 %v3892_v44, %v1590_v49  ;;  %v3908_v20 = vld [vmem:[%s3346_s13 + $0x60] sm:$0xff] }
 0x1b0   : > { %v2987_v9 = vpop.eup %2986  ;;  %v1551_v22 = vadd.f32 1.0, %v2985_v63  ;;  %v1585_v10 = vmul.f32 0.5, %v1553_v6  ;;  %v1647_v25 = vpack.c.bf16 %v1625_v55, %v1623_v7  ;;  %v1619_v52 = vmul.f32 %v3896_v41, %v1587_v62  ;;  %v2910_v1 = vld [vmem:[%s4745_s4] sm:$0xff]  }
 0x1b1   : > { %v2989_v2 = vpop.eup %2988  ;;  %v1552_v27 = vadd.f32 1.0, %v2987_v9  ;;  %v1586_v4 = vmul.f32 0.5, %v1554_v18  ;;  %v1620_v19 = vmul.f32 %v3900_v58, %v1588_v48  ;;  %v1646_v45 = vpack.c.bf16 %v1624_v51, %v1622_v57 }
 0x1b2   : > { %1721 = vmatpush1.bf16.msra.mxu1 %v1650_v8  ;;  %v1550_v47 = vadd.f32 1.0, %v2989_v2  ;;  %v1583_v40 = vmul.f32 0.5, %v1551_v22  ;;  %v1645_v3 = vpack.c.bf16 %v1621_v43, %v1619_v52  ;;  %v1617_v60 = vmul.f32 %v3904_v0, %v1585_v10  ;;  %v3916_v8 = vld [vmem:[%s3346_s13 + $0x50] sm:$0xff] }
 0x1b3   : > { %1722 = vmatprep.subr.bf16.mxu1 %v1649_v23  ;;  %v1584_v26 = vmul.f32 0.5, %v1552_v27  ;;  %v1618_v21 = vmul.f32 %v3908_v20, %v1586_v4  ;;  %v3920_v23 = vld [vmem:[%s3346_s13 + $0x40] sm:$0xff]  ;;  %v4797_v18 = vpack.c.bf16 %v3827_v16, %v3824_v14  ;;  %v4798_v49 = vpack.c.bf16 %v3821_v11, %v3818_v61  ;;  %v2911_v61 = vld [vmem:[%s4745_s4 + $0x8] sm:$0xff]   ;;  %v3957_v11 = vpop.permute.xlu1 %674  ;;  %v2916_v27 = vld [vmem:[%s4745_s4 + $0x30] sm:$0xff]  }
 0x1b4   : > { %v1582_v63 = vmul.f32 0.5, %v1550_v47  ;;  %v1615_v56 = vmul.f32 %v3912_v50, %v1583_v40  ;;  %v4799_v59 = vpack.c.bf16 %v3809_v17, %v3806_v15  ;;  %v4800_v2 = vpack.c.bf16 %v3799_v12, %v3796_v24  ;;  %v2912_v15 = vld [vmem:[%s4745_s4 + $0x10] sm:$0xff]   ;;  %v2913_v24 = vld [vmem:[%s4745_s4 + $0x18] sm:$0xff]   ;;  %v2914_v12 = vld [vmem:[%s4745_s4 + $0x20] sm:$0xff]   ;;  %v3954_v17 = vpop.permute.xlu0 %669  ;;  %4802 = vst [vmem:[#allocation25_spill] sm:$0xff] %v3957_v11 }
 0x1b5   : > { %v1616_v9 = vmul.f32 %v3916_v8, %v1584_v26  ;;  %v1644_v6 = vpack.c.bf16 %v1620_v19, %v1618_v21  ;;  %v4801_v22 = vmov 0   ;;  %v2915_v14 = vld [vmem:[%s4745_s4 + $0x28] sm:$0xff]  }
 0x1b6   : > { %1723 = vmatpush1.bf16.msra.mxu1 %v1648_v42  ;;  %v1643_v54 = vpack.c.bf16 %v1617_v60, %v1615_v56  ;;  %v1614_v5 = vmul.f32 %v3920_v23, %v1582_v63  ;;  %v2917_v42 = vld [vmem:[%s4745_s4 + $0x38] sm:$0xff]  }
 0x1b7   : > { %1724 = vmatprep.subr.bf16.mxu1 %v1647_v25  ;;  %v3964_v62 = vpop.permute.xlu1 %664 }
 0x1b8   : > { %v1642_v55 = vpack.c.bf16 %v1616_v9, %v1614_v5  ;;  %v3962_v16 = vpop.permute.xlu0 %659 }
 0x1ba   : > { %1725 = vmatpush1.bf16.msra.mxu1 %v1646_v45 }
 0x1bb   : > { %1726 = vmatprep.subr.bf16.mxu1 %v1645_v3  ;;  %v3972_v48 = vpop.permute.xlu1 %834 }
 0x1bc   : > { %v3967_v7 = vpop.permute.xlu0 %829 }
 0x1be   : > { %1727 = vmatpush1.bf16.msra.mxu1 %v1644_v6 }
 0x1bf   : > { %1728 = vmatprep.subr.bf16.mxu1 %v1643_v54  ;;  %v3980_v10 = vpop.permute.xlu1 %654 }
 0x1c0   : > { %v3975_v51 = vpop.permute.xlu0 %649 }
 0x1c2   : > { %1729 = vmatpush1.bf16.msra.mxu1 %v1642_v55 }
 0x1c3   : > { %1730 = vmatprep.subr.bf16.mxu1 %v4797_v18  ;;  %v3985_v43 = vpop.permute.xlu1 %824 }
 0x1c4   : > { %v3982_v25 = vpop.permute.xlu0 %819 }
 0x1c6   : > { %1731 = vmatpush1.bf16.msra.mxu1 %v4798_v49 }
 0x1c7   : > { %1732 = vmatprep.subr.bf16.mxu1 %v4799_v59  ;;  %v3989_v4 = vpop.permute.xlu1 %1956 }
 0x1c8   : > { %v3987_v47 = vpop.permute.xlu0 %1951  ;;  %4804 = vst [vmem:[#allocation27_spill] sm:$0xff] %v3989_v4 }
 0x1c9   : > { %4803 = vst [vmem:[#allocation26_spill] sm:$0xff] %v3987_v47 }
 0x1ca   : > { %1733 = vmatpush1.bf16.msra.mxu1 %v4800_v2  ;;  %v4023_v2 = vpop.f32.mrf.mxu1 }
 0x1cb   : > { %v3993_v40 = vpop.permute.xlu1 %644 }
 0x1cc   : > { %v3991_v57 = vpop.permute.xlu0 %639 }
 0x1cd   : > { %1751 = vmatmul.mubr.bf16.vlgmr.msra.gmra.mxu1 %v2910_v1 }
 0x1ce   : > { %1760 = vmatprep.mubr.bf16.mxu1 %v4801_v22 }
 0x1cf   : > { %v3997_v26 = vpop.permute.xlu1 %814 }
 0x1d0   : > { %v3995_v52 = vpop.permute.xlu0 %809 }
 0x1d3   : > { %v4001_v45 = vpop.permute.xlu1 %1946 }
 0x1d4   : > { %v3999_v19 = vpop.permute.xlu0 %1941  ;;  %4806 = vst [vmem:[#allocation29_spill] sm:$0xff] %v4001_v45 }
 0x1d5   : > { %1761 = vmatmul.mubr.bf16.gmra.mxu1 %v2911_v61  ;;  %4805 = vst [vmem:[#allocation28_spill] sm:$0xff] %v3999_v19 }
 0x1d6   : > { %1770 = vmatprep.mubr.bf16.mxu1 %v4801_v22 }
 0x1d7   : > { %v4005_v60 = vpop.permute.xlu1 %634 }
 0x1d8   : > { %v4003_v3 = vpop.permute.xlu0 %629 }
 0x1db   : > { %v4009_v21 = vpop.permute.xlu1 %804 }
 0x1dc   : > { %v4007_v63 = vpop.permute.xlu0 %799 }
 0x1dd   : > { %1771 = vmatmul.mubr.bf16.gmra.mxu1 %v2912_v15  ;;  %v4027_v15 = vpop.f32.mrf.mxu1 }
 0x1de   : > { %1780 = vmatprep.mubr.bf16.mxu1 %v4801_v22 }
 0x1df   : > { %v4013_v9 = vpop.permute.xlu1 %1936 }
 0x1e0   : > { %v4011_v56 = vpop.permute.xlu0 %1931  ;;  %4808 = vst [vmem:[#allocation31_spill] sm:$0xff] %v4013_v9 }
 0x1e1   : > { %4807 = vst [vmem:[#allocation30_spill] sm:$0xff] %v4011_v56 }
 0x1e3   : > { %v625_v54 = vpop.permute.xlu1 %624 }
 0x1e4   : > { %v620_v6 = vpop.permute.xlu0 %619 }
 0x1e5   : > { %1781 = vmatmul.mubr.bf16.gmra.mxu1 %v2913_v24 }
 0x1e6   : > { %1790 = vmatprep.mubr.bf16.mxu1 %v4801_v22 }
 0x1e7   : > { %v4017_v55 = vpop.permute.xlu1 %794 }
 0x1e8   : > { %v4015_v5 = vpop.permute.xlu0 %789  ;;  %4809 = vst [vmem:[#allocation32_spill] sm:$0xff] %v4017_v55 }
 0x1eb   : > { %v4021_v49 = vpop.permute.xlu1 %1926 }
 0x1ec   : > { %v4019_v18 = vpop.permute.xlu0 %1921  ;;  %4811 = vst [vmem:[#allocation34_spill] sm:$0xff] %v4021_v49 }
 0x1ed   : > { %1791 = vmatmul.mubr.bf16.gmra.mxu1 %v2914_v12  ;;  %4810 = vst [vmem:[#allocation33_spill] sm:$0xff] %v4019_v18 }
 0x1ee   : > { %1800 = vmatprep.mubr.bf16.mxu1 %v4801_v22 }
 0x1ef   : > { %v615_v1 = vpop.permute.xlu1 %614 }
 0x1f0   : > { %v610_v59 = vpop.permute.xlu0 %609 }
 0x1f3   : > { %v4029_v24 = vpop.permute.xlu1 %784 }
 0x1f4   : > { %v4025_v61 = vpop.permute.xlu0 %779 }
 0x1f5   : > { %1801 = vmatmul.mubr.bf16.gmra.mxu1 %v2915_v14  ;;  %v4033_v14 = vpop.f32.mrf.mxu1 }
 0x1f6   : > { %1810 = vmatprep.mubr.bf16.mxu1 %v4801_v22 }
 0x1f8   : > { %v4031_v12 = vpop.permute.xlu0 %1911 }
 0x1f9   : > { %4812 = vst [vmem:[#allocation35_spill] sm:$0xff] %v4031_v12 }
 0x1fd   : > { %1811 = vmatmul.mubr.bf16.gmra.mxu1 %v2916_v27  ;;  %v4035_v27 = vpop.permute.xlu1 %1916 }
 0x1fe   : > { %1820 = vmatprep.mubr.bf16.mxu1 %v4801_v22  ;;  %4813 = vst [vmem:[#allocation36_spill] sm:$0xff] %v4035_v27  ;;  %v1122_v27 = vadd.f32 %v3703_v32, %v610_v59 }
 0x201   : > { %v605_v45 = vpop.permute.xlu1 %604 }
 0x202   : > { %v1116_v9 = vadd.f32 %v3699_v30, %v605_v45  ;;  %v1118_v46 = vadd.f32 %v3701_v31, %v605_v45  ;;  %v1132_v31 = vadd.f32 %v3711_v36, %v620_v6  ;;  %v4057_v45 = vpop.f32.mrf.mxu0 }
 0x204   : > { %v1352_v18 = vmul.f32 0.5, %v1116_v9  ;;  %v1353_v12 = vmul.f32 0.5, %v1118_v46  ;;  %v1136_v9 = vadd.f32 %v3715_v38, %v625_v54 }
 0x205   : > { %1821 = vmatmul.mubr.bf16.gmra.mxu1 %v2917_v42  ;;  %v4037_v42 = vpop.f32.mrf.mxu1 }
 0x206   : > { %2295 = vmatprep.mubr.bf16.mxu1 %v4801_v22  ;;  %v600_v22 = vpop.permute.xlu0 %599 }
 0x207   : > { %v4039_v4 = vpop.f32.mrf.mxu1  ;;  %v1112_v47 = vadd.f32 %v3695_v28, %v600_v22  ;;  %v1114_v19 = vadd.f32 %v3697_v29, %v600_v22  ;;  %v1124_v28 = vadd.f32 %v3705_v33, %v610_v59  ;;  %v1126_v29 = vadd.f32 %v3707_v34, %v615_v1 }
 0x208   : > { %v1354_v22 = vmul.f32 0.5, %v1122_v27  ;;  %v1358_v34 = vmul.f32 0.5, %v1132_v31  ;;  %v1360_v59 = vmul.f32 0.5, %v1136_v9 }
 0x209   : > { %v4044_v56 = vpop.f32.mrf.mxu1  ;;  %v1350_v11 = vmul.f32 0.5, %v1112_v47  ;;  %v1351_v49 = vmul.f32 0.5, %v1114_v19  ;;  %v1128_v47 = vadd.f32 %v3709_v35, %v615_v1  ;;  %v1355_v19 = vmul.f32 0.5, %v1124_v28 }
 0x20a   : > { %v1356_v32 = vmul.f32 0.5, %v1126_v29  ;;  %v1138_v35 = vadd.f32 %v3717_v39, %v625_v54 }
 0x20b   : > { %v4047_v13 = vpop.f32.mrf.mxu1  ;;  %2990 = vtanh.f32 %v1350_v11  ;;  %v1134_v11 = vadd.f32 %v3713_v37, %v620_v6  ;;  %v1357_v33 = vmul.f32 0.5, %v1128_v47  ;;  %v4814_v6 = vld [vmem:[#allocation2_spill] sm:$0xff] }
 0x20c   : > { %2992 = vtanh.f32 %v1351_v49  ;;  %v4060_v49 = vpop.f32.mrf.mxu0  ;;  %v1142_v1 = vadd.f32 %v4814_v6, %v4003_v3  ;;  %v1361_v27 = vmul.f32 0.5, %v1138_v35  ;;  %v4816_v35 = vld [vmem:[#allocation4_spill] sm:$0xff]  ;;  %v4083_v6 = vadd.f32 %v4027_v15, %v4007_v63 }
 0x20d   : > { %2994 = vtanh.f32 %v1352_v18  ;;  %v4052_v30 = vpop.f32.mrf.mxu1  ;;  %v1359_v18 = vmul.f32 0.5, %v1134_v11  ;;  %v4815_v11 = vld [vmem:[#allocation3_spill] sm:$0xff]  ;;  %v4105_v15 = vadd.f32 %v4044_v56, %v3995_v52 }
 0x20e   : > { %2996 = vtanh.f32 %v1353_v12  ;;  %v4065_v12 = vpop.f32.mrf.mxu0  ;;  %v1362_v47 = vmul.f32 0.5, %v1142_v1  ;;  %4818 = vst [vmem:[#allocation3_spill] sm:$0xff] %v4083_v6 }
 0x20f   : > { %v1331_v46 = vpop.f32.mrf.mxu1  ;;  %2998 = vtanh.f32 %v1354_v22  ;;  %4822 = vst [vmem:[#allocation39_spill] sm:$0xff] %v4105_v15 }
 0x210   : > { %3000 = vtanh.f32 %v1355_v19  ;;  %v4067_v39 = vpop.f32.mrf.mxu0  ;;  %v4123_v15 = vadd.f32 %v1331_v46, %v3982_v25  ;;  %v4829_v46 = vld [vmem:[#allocation6_spill] sm:$0xff] }
 0x211   : > { %3002 = vtanh.f32 %v1356_v32  ;;  %v1333_v36 = vpop.f32.mrf.mxu1  ;;  %v1144_v32 = vadd.f32 %v4815_v11, %v4003_v3  ;;  %v4116_v11 = vadd.f32 %v4052_v30, %v3997_v26 }
 0x212   : > { %3004 = vtanh.f32 %v1357_v33  ;;  %v4071_v33 = vpop.permute.xlu0 %769 }
 0x213   : > { %3006 = vtanh.f32 %v1358_v34  ;;  %v1335_v28 = vpop.f32.mrf.mxu1  ;;  %4824 = vst [vmem:[#allocation41_spill] sm:$0xff] %v4116_v11 }
 0x214   : > { %3008 = vtanh.f32 %v1359_v18  ;;  %v4132_v30 = vadd.f32 %v1335_v28, %v3985_v43 }
 0x215   : > { %3010 = vtanh.f32 %v1360_v59  ;;  %v1337_v9 = vpop.f32.mrf.mxu1  ;;  %v1146_v59 = vadd.f32 %v4816_v35, %v4005_v60 }
 0x216   : > { %3012 = vtanh.f32 %v1361_v27  ;;  %v4093_v27 = vadd.f32 %v4037_v42, %v4009_v21  ;;  %v4120_v35 = vpop.permute.xlu0 %1901  ;;  %4828 = vst [vmem:[#allocation43_spill] sm:$0xff] %v4132_v30 }
 0x217   : > { %3014 = vtanh.f32 %v1362_v47  ;;  %v1363_v47 = vmul.f32 0.5, %v1144_v32  ;;  %v1364_v32 = vmul.f32 0.5, %v1146_v59 }
 0x218   : > { %v2991_v37 = vpop.eup %2990  ;;  %4820 = vst [vmem:[#allocation37_spill] sm:$0xff] %v4093_v27 }
 0x219   : > { %v2993_v38 = vpop.eup %2992  ;;  %v1414_v22 = vadd.f32 1.0, %v2991_v37  ;;  %v4079_v37 = vadd.f32 %v4023_v2, %v4007_v63  ;;  %v4101_v63 = vadd.f32 %v4039_v4, %v3995_v52  ;;  %v4825_v52 = vld [vmem:[#allocation5_spill] sm:$0xff]  ;;  %3016 = vtanh.f32 %v1363_v47 }
 0x21a   : > { %v2995_v29 = vpop.eup %2994  ;;  %v1415_v31 = vadd.f32 1.0, %v2993_v38  ;;  %v4089_v38 = vadd.f32 %v4033_v14, %v4009_v21  ;;  %v4107_v14 = vpop.permute.xlu1 %774  ;;  %v1148_v56 = vadd.f32 %v4825_v52, %v4005_v60  ;;  %4826 = vst [vmem:[#allocation5_spill] sm:$0xff] %v4123_v15  ;;  %3018 = vtanh.f32 %v1364_v32 }
 0x21b   : > { %v2997_v54 = vpop.eup %2996  ;;  %v1416_v19 = vadd.f32 1.0, %v2995_v29  ;;  %v4073_v34 = vmul.f32 0.5, %v1414_v22  ;;  %4817 = vst [vmem:[#allocation2_spill] sm:$0xff] %v4079_v37  ;;  %v4095_v29 = vpop.f32.mrf.mxu0  ;;  %4821 = vst [vmem:[#allocation38_spill] sm:$0xff] %v4101_v63 }
 0x21c   : > { %v2999_v18 = vpop.eup %2998  ;;  %v4085_v1 = vmul.f32 0.5, %v1415_v31  ;;  %v1417_v3 = vadd.f32 1.0, %v2997_v54  ;;  %4819 = vst [vmem:[#allocation4_spill] sm:$0xff] %v4089_v38  ;;  %v1341_v31 = vpop.f32.mrf.mxu1 }
 0x21d   : > { %v3001_v22 = vpop.eup %3000  ;;  %v4097_v2 = vmul.f32 0.5, %v1416_v19  ;;  %v2023_v21 = vsub.f32 1.0, %v4073_v34  ;;  %v1418_v42 = vadd.f32 1.0, %v2999_v18  ;;  %v4112_v19 = vadd.f32 %v4047_v13, %v3997_v26  ;;  %v4134_v59 = vpop.f32.mrf.mxu0 }
 0x21e   : > { %v3003_v54 = vpop.eup %3002  ;;  %v4126_v18 = vadd.f32 %v1333_v36, %v3982_v25  ;;  %v4129_v63 = vmul.f32 0.5, %v1417_v3  ;;  %v1419_v26 = vadd.f32 1.0, %v3001_v22  ;;  %v1152_v25 = vadd.f32 %v4829_v46, %v3991_v57  ;;  %v1343_v36 = vpop.f32.mrf.mxu1 }
 0x21f   : > { %4823 = vst [vmem:[#allocation40_spill] sm:$0xff] %v4112_v19  ;;  %v3005_v4 = vpop.eup %3004  ;;  %v2024_v19 = vsub.f32 1.0, %v4085_v1  ;;  %v2025_v52 = vsub.f32 1.0, %v4097_v2  ;;  %v1420_v11 = vadd.f32 1.0, %v3003_v54  ;;  %v4142_v3 = vmul.f32 0.5, %v1418_v42  ;;  %v4147_v47 = vpop.permute.xlu1 %1906 }
 0x220   : > { %4827 = vst [vmem:[#allocation42_spill] sm:$0xff] %v4126_v18  ;;  %v3007_v13 = vpop.eup %3006  ;;  %v3142_v18 = vld [vmem:[%s3346_s13] sm:$0xff]  ;;  %v1421_v28 = vadd.f32 1.0, %v3005_v4  ;;  %v4145_v22 = vadd.f32 %v1337_v9, %v3985_v43  ;;  %v1365_v54 = vmul.f32 0.5, %v1148_v56  ;;  %v4150_v46 = vadd.f32 %v1341_v31, %v3967_v7  ;;  %v4155_v42 = vpop.f32.mrf.mxu0  ;;  %v3143_v4 = vld [vmem:[%s3346_s13 + $0x8] sm:$0xff]  ;;  %v3144_v43 = vld [vmem:[%s3346_s13 + $0x10] sm:$0xff] }
 0x221   : > { %v3009_v60 = vpop.eup %3008  ;;  %v4140_v15 = vmul.f32 %v3142_v18, %v2023_v21  ;;  %4830 = vst [vmem:[#allocation6_spill] sm:$0xff] %v4142_v3  ;;  %v1422_v27 = vadd.f32 1.0, %v3007_v13  ;;  %v2026_v38 = vsub.f32 1.0, %v4129_v63  ;;  %v4153_v21 = vmul.f32 0.5, %v1419_v26  ;;  %v760_v13 = vpop.permute.xlu0 %759 }
 0x222   : > { %4831 = vst [vmem:[#allocation44_spill] sm:$0xff] %v4145_v22  ;;  %v3011_v30 = vpop.eup %3010  ;;  %4832 = vst [vmem:[#allocation45_spill] sm:$0xff] %v4150_v46  ;;  %v1423_v18 = vadd.f32 1.0, %v3009_v60  ;;  %v4158_v6 = vmul.f32 %v3143_v4, %v2024_v19  ;;  %v4161_v9 = vmul.f32 %v3144_v43, %v2025_v52  ;;  %v4163_v32 = vmul.f32 0.5, %v1420_v11  ;;  %v1345_v46 = vpop.f32.mrf.mxu1  ;;  %v4838_v19 = vld [vmem:[#allocation7_spill] sm:$0xff]  ;;  %v4840_v11 = vld [vmem:[#allocation8_spill] sm:$0xff] }
 0x223   : > { %4833 = vst [vmem:[#allocation46_spill] sm:$0xff] %v4153_v21  ;;  %v1366_v56 = vmul.f32 0.5, %v1152_v25  ;;  %v4166_v31 = vadd.f32 %v1343_v36, %v3967_v7  ;;  %v3013_v26 = vpop.eup %3012  ;;  %v2027_v60 = vsub.f32 1.0, %v4142_v3  ;;  %v4169_v22 = vmul.f32 0.5, %v1421_v28  ;;  %v4185_v3 = vpop.f32.mrf.mxu0 }
 0x224   : > { %4834 = vst [vmem:[#allocation47_spill] sm:$0xff] %v4161_v9  ;;  %4835 = vst [vmem:[#allocation48_spill] sm:$0xff] %v4163_v32  ;;  %v1424_v37 = vadd.f32 1.0, %v3011_v30  ;;  %v1154_v4 = vadd.f32 %v4838_v19, %v3991_v57  ;;  %v4173_v52 = vmul.f32 0.5, %v1422_v27  ;;  %3020 = vtanh.f32 %v1365_v54  ;;  %v3015_v36 = vpop.eup %3014  ;;  %v4842_v30 = vld [vmem:[#allocation9_spill] sm:$0xff] }
 0x225   : > { %4836 = vst [vmem:[#allocation49_spill] sm:$0xff] %v4166_v31  ;;  %4837 = vst [vmem:[#allocation50_spill] sm:$0xff] %v4169_v22  ;;  %v1156_v25 = vadd.f32 %v4840_v11, %v3993_v40  ;;  %v4178_v7 = vadd.f32 %v1345_v46, %v3972_v48  ;;  %v2028_v43 = vsub.f32 1.0, %v4153_v21  ;;  %v4181_v31 = vmul.f32 0.5, %v1423_v18  ;;  %v3145_v57 = vld [vmem:[%s3346_s13 + $0x18] sm:$0xff]  ;;  %v4844_v46 = vld [vmem:[#allocation10_spill] sm:$0xff]  ;;  %v1347_v21 = vpop.f32.mrf.mxu1 }
 0x226   : > { %4839 = vst [vmem:[#allocation7_spill] sm:$0xff] %v4173_v52  ;;  %v1158_v28 = vadd.f32 %v4842_v30, %v3993_v40  ;;  %v4188_v27 = vmul.f32 %v3145_v57, %v2026_v38  ;;  %v2029_v54 = vsub.f32 1.0, %v4163_v32  ;;  %v1425_v19 = vadd.f32 1.0, %v3013_v26  ;;  %v3146_v18 = vld [vmem:[%s3346_s13 + $0x20] sm:$0xff] }
 0x227   : > { %4841 = vst [vmem:[#allocation8_spill] sm:$0xff] %v4178_v7  ;;  %3022 = vtanh.f32 %v1366_v56  ;;  %v1162_v11 = vadd.f32 %v4844_v46, %v3975_v51  ;;  %v765_v7 = vpop.permute.xlu1 %764  ;;  %v4194_v9 = vmul.f32 %v3146_v18, %v2027_v60  ;;  %v2030_v40 = vsub.f32 1.0, %v4169_v22  ;;  %v4847_v56 = vld [vmem:[#allocation11_spill] sm:$0xff]  ;;  %v4202_v46 = vpop.permute.xlu0 %1891 }
 0x228   : > { %4843 = vst [vmem:[#allocation9_spill] sm:$0xff] %v4188_v27  ;;  %v4197_v30 = vmul.f32 0.5, %v1424_v37  ;;  %v1367_v38 = vmul.f32 0.5, %v1154_v4  ;;  %v2031_v57 = vsub.f32 1.0, %v4173_v52  ;;  %v1426_v32 = vadd.f32 1.0, %v3015_v36  ;;  %v4208_v18 = vpop.f32.mrf.mxu0  ;;  %v3147_v37 = vld [vmem:[%s3346_s13 + $0x28] sm:$0xff] }
 0x229   : > { %4845 = vst [vmem:[#allocation10_spill] sm:$0xff] %v4194_v9  ;;  %v1368_v26 = vmul.f32 0.5, %v1156_v25  ;;  %v1164_v27 = vadd.f32 %v4847_v56, %v3975_v51  ;;  %v2032_v55 = vsub.f32 1.0, %v4181_v31  ;;  %v1369_v44 = vmul.f32 0.5, %v1158_v28  ;;  %v3148_v52 = vld [vmem:[%s3346_s13 + $0x30] sm:$0xff]  ;;  %v3017_v9 = vpop.eup %3016 }
 0x22a   : > { %4846 = vst [vmem:[#allocation51_spill] sm:$0xff] %v4197_v30  ;;  %v4206_v60 = vadd.f32 %v1347_v21, %v3972_v48  ;;  %v4211_v4 = vmul.f32 %v3147_v37, %v2028_v43  ;;  %v4214_v36 = vmul.f32 %v3148_v52, %v2029_v54  ;;  %v4216_v25 = vmul.f32 0.5, %v1425_v19  ;;  %v4849_v56 = vld [vmem:[#allocation12_spill] sm:$0xff]  ;;  %v3149_v21 = vld [vmem:[%s3346_s13 + $0x38] sm:$0xff]  ;;  %v3019_v37 = vpop.eup %3018 }
 0x22b   : > { %v1370_v51 = vmul.f32 0.5, %v1162_v11  ;;  %v1166_v22 = vadd.f32 %v4849_v56, %v3980_v10  ;;  %v2033_v28 = vsub.f32 1.0, %v4197_v30  ;;  %3024 = vtanh.f32 %v1367_v38  ;;  %v4230_v19 = vpop.permute.xlu1 %1896  ;;  %v4233_v38 = vpop.f32.mrf.mxu0 }
 0x22c   : > { %4848 = vst [vmem:[#allocation11_spill] sm:$0xff] %v4206_v60  ;;  %v1272_v48 = vadd.f32 %v4057_v45, %v760_v13  ;;  %v4223_v60 = vmul.f32 %v3149_v21, %v2030_v40  ;;  %v4226_v43 = vmul.f32 %v3920_v23, %v2031_v57  ;;  %v4228_v52 = vmul.f32 0.5, %v1426_v32 }
 0x22d   : > { %3026 = vtanh.f32 %v1368_v26  ;;  %v1371_v54 = vmul.f32 0.5, %v1164_v27  ;;  %v1274_v56 = vadd.f32 %v4060_v49, %v760_v13  ;;  %v4236_v40 = vmul.f32 %v3912_v50, %v2032_v55  ;;  %v1882_v26 = vpop.permute.xlu0 %1881  ;;  %v4851_v50 = vld [vmem:[#allocation13_spill] sm:$0xff] }
 0x22e   : > { %3028 = vtanh.f32 %v1369_v44  ;;  %v2034_v23 = vsub.f32 1.0, %v4216_v25  ;;  %v1427_v57 = vadd.f32 1.0, %v3017_v9  ;;  %v1372_v32 = vmul.f32 0.5, %v1166_v22 }
 0x22f   : > { %3030 = vtanh.f32 %v1370_v51  ;;  %v4240_v21 = vmul.f32 %v3916_v8, %v2033_v28  ;;  %v1276_v44 = vadd.f32 %v4065_v12, %v765_v7  ;;  %v2035_v13 = vsub.f32 1.0, %v4228_v52  ;;  %v4247_v51 = vpop.f32.mrf.mxu0  ;;  %v4852_v12 = vld [vmem:[#allocation14_spill] sm:$0xff] }
 0x230   : > { %3032 = vtanh.f32 %v1371_v54  ;;  %v1168_v55 = vadd.f32 %v4851_v50, %v3980_v10  ;;  %v1278_v22 = vadd.f32 %v4067_v39, %v765_v7  ;;  %v1282_v39 = vadd.f32 %v4095_v29, %v4071_v33 }
 0x231   : > { %4850 = vst [vmem:[#allocation12_spill] sm:$0xff] %v4240_v21  ;;  %v3021_v9 = vpop.eup %3020  ;;  %v4249_v21 = vmul.f32 0.5, %v1427_v57  ;;  %v1284_v50 = vadd.f32 %v4134_v59, %v4071_v33  ;;  %v4265_v29 = vmul.f32 %v3908_v20, %v2035_v13 }
 0x232   : > { %v1429_v57 = vadd.f32 1.0, %v3021_v9 }
 0x234   : > { %v3023_v10 = vpop.eup %3022 }
 0x238   : > { %v3025_v33 = vpop.eup %3024 }
 0x28d   : > { %v1752_v11 = vpop.f32.mrf.mxu1 }
 0x28e   : > { %v1831_v45 = vadd.f32 %v1752_v11, %v1272_v48  ;;  %v1428_v48 = vadd.f32 1.0, %v3019_v37  ;;  %v1887_v37 = vpop.permute.xlu1 %1886 }
 0x28f   : > { %v1754_v27 = vpop.f32.mrf.mxu1 }
 0x290   : > { %v1959_v30 = vadd.f32 %v1882_v26, %v1831_v45  ;;  %v1832_v49 = vadd.f32 %v1754_v27, %v1274_v56  ;;  %v1172_v56 = vadd.f32 %v4852_v12, %v3962_v16  ;;  %v4254_v45 = vmul.f32 %v3904_v0, %v2034_v23  ;;  %v1297_v0 = vpop.f32.mrf.mxu0 }
 0x291   : > { %v1756_v11 = vpop.f32.mrf.mxu1  ;;  %v1373_v27 = vmul.f32 0.5, %v1168_v55  ;;  %v1286_v55 = vadd.f32 %v4155_v42, %v4107_v14  ;;  %v4272_v12 = vmul.f32 0.5, %v1429_v57 }
 0x292   : > { %3034 = vtanh.f32 %v1959_v30  ;;  %v1960_v8 = vadd.f32 %v1882_v26, %v1832_v49  ;;  %v1833_v28 = vadd.f32 %v1756_v11, %v1276_v44  ;;  %v4258_v26 = vmul.f32 0.5, %v1428_v48 }
 0x293   : > { %3036 = vtanh.f32 %v1372_v32  ;;  %v1758_v54 = vpop.f32.mrf.mxu1  ;;  %v4853_v32 = vld [vmem:[#allocation15_spill] sm:$0xff]  ;;  %v1430_v48 = vadd.f32 1.0, %v3023_v10 }
 0x294   : > { %3038 = vtanh.f32 %v1960_v8  ;;  %v1961_v7 = vadd.f32 %v1887_v37, %v1833_v28  ;;  %v1834_v30 = vadd.f32 %v1758_v54, %v1278_v22  ;;  %v1174_v44 = vadd.f32 %v4853_v32, %v3962_v16  ;;  %v1301_v54 = vpop.f32.mrf.mxu0 }
 0x295   : > { %v1762_v49 = vpop.f32.mrf.mxu1  ;;  %v2036_v22 = vsub.f32 1.0, %v4249_v21  ;;  %v1374_v8 = vmul.f32 0.5, %v1172_v56  ;;  %v2037_v59 = vsub.f32 1.0, %v4258_v26  ;;  %v1288_v56 = vadd.f32 %v4185_v3, %v4107_v14 }
 0x296   : > { %3040 = vtanh.f32 %v1961_v7  ;;  %v1962_v23 = vadd.f32 %v1887_v37, %v1834_v30  ;;  %v1835_v11 = vadd.f32 %v1762_v49, %v1282_v39  ;;  %v1375_v20 = vmul.f32 0.5, %v1174_v44  ;;  %v3027_v37 = vpop.eup %3026  ;;  %v4854_v30 = vld [vmem:[#allocation16_spill] sm:$0xff] }
 0x297   : > { %v1764_v9 = vpop.f32.mrf.mxu1  ;;  %v3029_v39 = vpop.eup %3028  ;;  %v4277_v7 = vmul.f32 0.5, %v1430_v48  ;;  %v1176_v57 = vadd.f32 %v4854_v30, %v3964_v62  ;;  %v1292_v14 = vadd.f32 %v4208_v18, %v4025_v61  ;;  %v4290_v49 = vmul.f32 %v3900_v58, %v2037_v59 }
 0x298   : > { %3042 = vtanh.f32 %v1962_v23  ;;  %v1963_v16 = vadd.f32 %v4202_v46, %v1835_v11  ;;  %v1836_v28 = vadd.f32 %v1764_v9, %v1284_v50  ;;  %v4284_v44 = vpop.eup %3030  ;;  %v2038_v50 = vsub.f32 1.0, %v4272_v12 }
 0x299   : > { %3044 = vtanh.f32 %v1373_v27  ;;  %v1766_v13 = vpop.f32.mrf.mxu1  ;;  %v4282_v27 = vmul.f32 %v3896_v41, %v2036_v22  ;;  %v1431_v23 = vadd.f32 1.0, %v3025_v33  ;;  %v4293_v48 = vpop.eup %3032  ;;  %v1294_v41 = vadd.f32 %v4233_v38, %v4025_v61 }
 0x29a   : > { %3046 = vtanh.f32 %v1963_v16  ;;  %v1964_v42 = vadd.f32 %v4202_v46, %v1836_v28  ;;  %v1837_v10 = vadd.f32 %v1766_v13, %v1286_v55  ;;  %v1303_v22 = vpop.f32.mrf.mxu0  ;;  %v2039_v55 = vsub.f32 1.0, %v4277_v7  ;;  %v4855_v16 = vld [vmem:[#allocation17_spill] sm:$0xff] }
 0x29b   : > { %3048 = vtanh.f32 %v1374_v8  ;;  %v1768_v32 = vpop.f32.mrf.mxu1  ;;  %v1376_v58 = vmul.f32 0.5, %v1176_v57  ;;  %v1178_v28 = vadd.f32 %v4855_v16, %v3964_v62  ;;  %v1296_v33 = vadd.f32 %v4247_v51, %v4029_v24  ;;  %v4857_v16 = vld [vmem:[#allocation24_spill] sm:$0xff] }
 0x29c   : > { %3050 = vtanh.f32 %v1964_v42  ;;  %v1965_v3 = vadd.f32 %v4230_v19, %v1837_v10  ;;  %v1838_v46 = vadd.f32 %v1768_v32, %v1288_v56  ;;  %v4307_v56 = vmul.f32 0.5, %v1431_v23  ;;  %v1305_v51 = vpop.f32.mrf.mxu0  ;;  %v4856_v23 = vld [vmem:[#allocation18_spill] sm:$0xff] }
 0x29d   : > { %3052 = vtanh.f32 %v1375_v20  ;;  %v1772_v11 = vpop.f32.mrf.mxu1  ;;  %v1432_v42 = vadd.f32 1.0, %v3027_v37  ;;  %v1298_v10 = vadd.f32 %v1297_v0, %v4029_v24  ;;  %v4311_v62 = vmul.f32 %v3888_v53, %v2038_v50 }
 0x29e   : > { %3054 = vtanh.f32 %v1965_v3  ;;  %v1966_v18 = vadd.f32 %v4230_v19, %v1838_v46  ;;  %v1839_v8 = vadd.f32 %v1772_v11, %v1292_v14  ;;  %v1433_v37 = vadd.f32 1.0, %v3029_v39 }
 0x29f   : > { %v3035_v9 = vpop.eup %3034  ;;  %v1774_v59 = vpop.f32.mrf.mxu1  ;;  %v1302_v24 = vadd.f32 %v1301_v54, %v4015_v5  ;;  %v1182_v39 = vadd.f32 %v4856_v23, %v3954_v17  ;;  %v1304_v11 = vadd.f32 %v1303_v22, %v4015_v5  ;;  %v4342_v5 = vmul.f32 %v4857_v16, %v2039_v55  ;;  %v4858_v22 = vld [vmem:[#allocation32_spill] sm:$0xff] }
 0x2a0   : > { %v4303_v20 = vpop.eup %3036  ;;  %3056 = vtanh.f32 %v1966_v18  ;;  %v1967_v61 = vadd.f32 %v4120_v35, %v1839_v8  ;;  %v1840_v38 = vadd.f32 %v1774_v59, %v1294_v41  ;;  %v2087_v19 = vmul.f32 %v3035_v9, %v4073_v34  ;;  %v1307_v18 = vpop.f32.mrf.mxu0  ;;  %v4859_v59 = vld [vmem:[#allocation47_spill] sm:$0xff] }
 0x2a1   : > { %v3039_v13 = vpop.eup %3038  ;;  %v1776_v30 = vpop.f32.mrf.mxu1  ;;  %v1308_v55 = vadd.f32 %v1307_v18, %v4858_v22  ;;  %v4367_v23 = vmul.f32 0.5, %v1433_v37 }
 0x2a2   : > { %3058 = vtanh.f32 %v1967_v61  ;;  %v1968_v57 = vadd.f32 %v4120_v35, %v1840_v38  ;;  %v1841_v34 = vadd.f32 %v1776_v30, %v1296_v33  ;;  %v2088_v32 = vmul.f32 %v3039_v13, %v4085_v1  ;;  %v4861_v13 = vld [vmem:[#allocation6_spill] sm:$0xff] }
 0x2a3   : > { %v3041_v14 = vpop.eup %3040  ;;  %3060 = vtanh.f32 %v1376_v58  ;;  %v1778_v53 = vpop.f32.mrf.mxu1  ;;  %v4323_v0 = vadd.f32 %v2087_v19, %v4140_v15  ;;  %v1377_v1 = vmul.f32 0.5, %v1178_v28  ;;  %v1306_v28 = vadd.f32 %v1305_v51, %v4858_v22  ;;  %v4862_v51 = vld [vmem:[#allocation9_spill] sm:$0xff] }
 0x2a4   : > { %3062 = vtanh.f32 %v1968_v57  ;;  %v1969_v3 = vadd.f32 %v4147_v47, %v1841_v34  ;;  %v1842_v46 = vadd.f32 %v1778_v53, %v1298_v10  ;;  %v4327_v35 = vadd.f32 %v2088_v32, %v4158_v6 }
 0x2a5   : > { %v3043_v50 = vpop.eup %3042  ;;  %v1782_v54 = vpop.f32.mrf.mxu1  ;;  %v2089_v41 = vmul.f32 %v3041_v14, %v4097_v2  ;;  %2151 = vst [vmem:[%s4317_s16] sm:$0xff] %v4323_v0  ;;  %v2040_v2 = vsub.f32 1.0, %v4307_v56  ;;  %v4353_v57 = vmul.f32 0.5, %v1432_v42  ;;  %v4863_v42 = vld [vmem:[#allocation46_spill] sm:$0xff]  ;;  %v1378_v22 = vmul.f32 0.5, %v1182_v39 }
 0x2a6   : > { %v4335_v15 = vpop.eup %3044  ;;  %3064 = vtanh.f32 %v1969_v3  ;;  %v1970_v8 = vadd.f32 %v4147_v47, %v1842_v46  ;;  %v1843_v6 = vadd.f32 %v1782_v54, %v1302_v24  ;;  %v2090_v9 = vmul.f32 %v3043_v50, %v4129_v63  ;;  %2152 = vst [vmem:[%s4317_s16 + $0x8] sm:$0xff] %v4327_v35  ;;  %v4860_v47 = vld [vmem:[#allocation35_spill] sm:$0xff] }
 0x2a7   : > { %v3047_v58 = vpop.eup %3046  ;;  %v1784_v33 = vpop.f32.mrf.mxu1  ;;  %v4347_v61 = vadd.f32 %v2089_v41, %v4859_v59  ;;  %v4864_v41 = vld [vmem:[#allocation10_spill] sm:$0xff] }
 0x2a8   : > { %v4349_v38 = vpop.eup %3048  ;;  %3066 = vtanh.f32 %v1970_v8  ;;  %v1971_v63 = vadd.f32 %v4860_v47, %v1843_v6  ;;  %v1844_v19 = vadd.f32 %v1784_v33, %v1304_v11  ;;  %v2091_v10 = vmul.f32 %v3047_v58, %v4861_v13  ;;  %v4865_v6 = vld [vmem:[#allocation36_spill] sm:$0xff]  ;;  %v4868_v13 = vld [vmem:[#allocation50_spill] sm:$0xff] }
 0x2a9   : > { %v3051_v30 = vpop.eup %3050  ;;  %v1786_v34 = vpop.f32.mrf.mxu1  ;;  %v4357_v32 = vadd.f32 %v2090_v9, %v4862_v51  ;;  %2153 = vst [vmem:[%s4317_s16 + $0x10] sm:$0xff] %v4347_v61  ;;  %v2199_v14 = vpack.c.bf16 %v4347_v61, %v4323_v0  ;;  %v1434_v11 = vadd.f32 1.0, %v4284_v44  ;;  %v2041_v44 = vsub.f32 1.0, %v4353_v57  ;;  %v4866_v33 = vld [vmem:[#allocation48_spill] sm:$0xff]  ;;  %v2921_v0 = vld [vmem:[%s4747_s6 + $0x18] sm:$0xff]   ;;  %v2922_v61 = vld [vmem:[%s4747_s6 + $0x20] sm:$0xff]  }
 0x2aa   : > { %v4363_v24 = vpop.eup %3052  ;;  %3068 = vtanh.f32 %v1971_v63  ;;  %v1972_v53 = vadd.f32 %v4860_v47, %v1844_v19  ;;  %v1845_v3 = vadd.f32 %v1786_v34, %v1306_v28  ;;  %v2092_v46 = vmul.f32 %v3051_v30, %v4863_v42  ;;  %v4867_v63 = vld [vmem:[#allocation2_spill] sm:$0xff]  ;;  %v4871_v42 = vld [vmem:[#allocation33_spill] sm:$0xff] }
 0x2ab   : > { %v3055_v50 = vpop.eup %3054  ;;  %v1788_v54 = vpop.f32.mrf.mxu1  ;;  %v4371_v18 = vadd.f32 %v2091_v10, %v4864_v41  ;;  %2154 = vst [vmem:[%s4317_s16 + $0x18] sm:$0xff] %v4357_v32  ;;  %v2200_v8 = vpack.c.bf16 %v4357_v32, %v4327_v35  ;;  %v2042_v30 = vsub.f32 1.0, %v4367_v23  ;;  %v4870_v34 = vld [vmem:[#allocation22_spill] sm:$0xff]  ;;  %v4873_v41 = vld [vmem:[#allocation7_spill] sm:$0xff]  ;;  %v2920_v35 = vld [vmem:[%s4747_s6 + $0x10] sm:$0xff]  }
 0x2ac   : > { %3070 = vtanh.f32 %v1972_v53  ;;  %v1973_v9 = vadd.f32 %v4865_v6, %v1845_v3  ;;  %v1846_v58 = vadd.f32 %v1788_v54, %v1308_v55  ;;  %v4379_v37 = vadd.f32 %v2092_v46, %v4211_v4  ;;  %v2923_v32 = vld [vmem:[%s4747_s6 + $0x28] sm:$0xff]  }
 0x2ad   : > { %v3057_v16 = vpop.eup %3056  ;;  %3072 = vtanh.f32 %v1377_v1  ;;  %v1792_v28 = vpop.f32.mrf.mxu1  ;;  %v2093_v59 = vmul.f32 %v3055_v50, %v4866_v33  ;;  %2155 = vst [vmem:[%s4317_s16 + $0x20] sm:$0xff] %v4371_v18  ;;  %v4869_v1 = vld [vmem:[#allocation19_spill] sm:$0xff]  ;;  %v4394_v51 = vmul.f32 %v4870_v34, %v2040_v2  ;;  %v4874_v33 = vld [vmem:[#allocation4_spill] sm:$0xff] }
 0x2ae   : > { %3074 = vtanh.f32 %v1973_v9  ;;  %v1974_v47 = vadd.f32 %v4865_v6, %v1846_v58  ;;  %v1847_v19 = vadd.f32 %v1792_v28, %v4867_v63  ;;  %v2094_v10 = vmul.f32 %v3057_v16, %v4868_v13  ;;  %2156 = vst [vmem:[%s4317_s16 + $0x28] sm:$0xff] %v4379_v37  ;;  %v4872_v50 = vld [vmem:[#allocation3_spill] sm:$0xff] }
 0x2af   : > { %v3059_v4 = vpop.eup %3058  ;;  %v1184_v39 = vadd.f32 %v4869_v1, %v3954_v17  ;;  %v1794_v55 = vpop.f32.mrf.mxu1  ;;  %v4397_v53 = vadd.f32 %v2093_v59, %v4214_v36  ;;  %v4404_v58 = vmul.f32 0.5, %v1434_v11  ;;  %v1435_v17 = vadd.f32 1.0, %v4293_v48  ;;  %v4875_v63 = vld [vmem:[#allocation23_spill] sm:$0xff] }
 0x2b0   : > { %v4399_v3 = vpop.eup %3060  ;;  %3076 = vtanh.f32 %v1974_v47  ;;  %v1975_v46 = vadd.f32 %v4871_v42, %v1847_v19  ;;  %v1848_v54 = vadd.f32 %v1794_v55, %v4872_v50  ;;  %v2095_v6 = vmul.f32 %v3059_v4, %v4873_v41 }
 0x2b1   : > { %v3063_v9 = vpop.eup %3062  ;;  %v1796_v2 = vpop.f32.mrf.mxu1  ;;  %v4408_v16 = vadd.f32 %v2094_v10, %v4223_v60  ;;  %2157 = vst [vmem:[%s4317_s16 + $0x30] sm:$0xff] %v4397_v53  ;;  %v2201_v36 = vpack.c.bf16 %v4397_v53, %v4371_v18  ;;  %v4418_v19 = vmul.f32 %v4875_v63, %v2041_v44  ;;  %v4876_v10 = vld [vmem:[#allocation34_spill] sm:$0xff]  ;;  %v1379_v34 = vmul.f32 0.5, %v1184_v39  ;;  %v4883_v63 = vld [vmem:[#allocation12_spill] sm:$0xff]  ;;  %v2919_v18 = vld [vmem:[%s4747_s6 + $0x8] sm:$0xff]  }
 0x2b2   : > { %3078 = vtanh.f32 %v1975_v46  ;;  %v1976_v28 = vadd.f32 %v4871_v42, %v1848_v54  ;;  %v1849_v59 = vadd.f32 %v1796_v2, %v4874_v33  ;;  %v2096_v47 = vmul.f32 %v3063_v9, %v4181_v31  ;;  %v4877_v31 = vld [vmem:[#allocation37_spill] sm:$0xff]  ;;  %v4879_v42 = vld [vmem:[#allocation20_spill] sm:$0xff]  ;;  %v4880_v54 = vld [vmem:[#allocation51_spill] sm:$0xff] }
 0x2b3   : > { %v3065_v11 = vpop.eup %3064  ;;  %3080 = vtanh.f32 %v1378_v22  ;;  %v1798_v60 = vpop.f32.mrf.mxu1  ;;  %v4421_v48 = vadd.f32 %v2095_v6, %v4226_v43  ;;  %2158 = vst [vmem:[%s4317_s16 + $0x38] sm:$0xff] %v4408_v16  ;;  %v2202_v13 = vpack.c.bf16 %v4408_v16, %v4379_v37  ;;  %v2043_v22 = vsub.f32 1.0, %v4404_v58  ;;  %v4878_v43 = vld [vmem:[#allocation25_spill] sm:$0xff]  ;;  %v4881_v9 = vld [vmem:[#allocation38_spill] sm:$0xff] }
 0x2b4   : > { %3082 = vtanh.f32 %v1976_v28  ;;  %v1977_v4 = vadd.f32 %v4876_v10, %v1849_v59  ;;  %v1850_v1 = vadd.f32 %v1798_v60, %v4877_v31  ;;  %v4430_v44 = vadd.f32 %v2096_v47, %v4236_v40  ;;  %v4882_v59 = vld [vmem:[#allocation21_spill] sm:$0xff]  ;;  %v4885_v31 = vld [vmem:[#allocation39_spill] sm:$0xff] }
 0x2b5   : > { %v3067_v55 = vpop.eup %3066  ;;  %v1186_v46 = vadd.f32 %v4879_v42, %v4878_v43  ;;  %v1802_v50 = vpop.f32.mrf.mxu1  ;;  %v2097_v41 = vmul.f32 %v3065_v11, %v4880_v54  ;;  %2159 = vst [vmem:[%s4317_s16 + $0x40] sm:$0xff] %v4421_v48  ;;  %v4443_v39 = vmul.f32 0.5, %v1435_v17  ;;  %v1436_v33 = vadd.f32 1.0, %v4303_v20 }
 0x2b6   : > { %3084 = vtanh.f32 %v1977_v4  ;;  %v1978_v6 = vadd.f32 %v4876_v10, %v1850_v1  ;;  %v1851_v2 = vadd.f32 %v1802_v50, %v4881_v9  ;;  %v2098_v40 = vmul.f32 %v3067_v55, %v4216_v25  ;;  %2160 = vst [vmem:[%s4317_s16 + $0x48] sm:$0xff] %v4430_v44  ;;  %v4884_v10 = vld [vmem:[#allocation30_spill] sm:$0xff] }
 0x2b7   : > { %v3069_v28 = vpop.eup %3068  ;;  %v1188_v47 = vadd.f32 %v4882_v59, %v4878_v43  ;;  %v1804_v11 = vpop.f32.mrf.mxu1  ;;  %v4449_v60 = vadd.f32 %v2097_v41, %v4883_v63  ;;  %v1380_v17 = vmul.f32 0.5, %v1186_v46 }
 0x2b8   : > { %3086 = vtanh.f32 %v1978_v6  ;;  %v1979_v4 = vadd.f32 %v4884_v10, %v1851_v2  ;;  %v1852_v25 = vadd.f32 %v1804_v11, %v4885_v31  ;;  %v2099_v1 = vmul.f32 %v3069_v28, %v4228_v52  ;;  %v4886_v52 = vld [vmem:[#allocation40_spill] sm:$0xff]  ;;  %v3150_v6 = vld [vmem:[%s3346_s13 + $0xa0] sm:$0xff]  ;;  %v3151_v2 = vld [vmem:[%s3346_s13 + $0x98] sm:$0xff] }
 0x2b9   : > { %v3071_v55 = vpop.eup %3070  ;;  %3088 = vtanh.f32 %v1379_v34  ;;  %v1806_v20 = vpop.f32.mrf.mxu1  ;;  %v4455_v43 = vadd.f32 %v2098_v40, %v4254_v45  ;;  %2161 = vst [vmem:[%s4317_s16 + $0x50] sm:$0xff] %v4449_v60  ;;  %v2203_v42 = vpack.c.bf16 %v4449_v60, %v4421_v48  ;;  %v4467_v9 = vmul.f32 %v3150_v6, %v2043_v22  ;;  %v4888_v11 = vld [vmem:[#allocation41_spill] sm:$0xff] }
 0x2ba   : > { %v4461_v50 = vpop.eup %3072  ;;  %3090 = vtanh.f32 %v1979_v4  ;;  %v1980_v54 = vadd.f32 %v4884_v10, %v1852_v25  ;;  %v1853_v41 = vadd.f32 %v1806_v20, %v4886_v52  ;;  %v2100_v34 = vmul.f32 %v3071_v55, %v4249_v21  ;;  %v4887_v21 = vld [vmem:[#allocation31_spill] sm:$0xff]  ;;  %v4889_v20 = vld [vmem:[#allocation5_spill] sm:$0xff] }
 0x2bb   : > { %v3075_v46 = vpop.eup %3074  ;;  %v1808_v45 = vpop.f32.mrf.mxu1  ;;  %v4472_v40 = vmul.f32 %v3151_v2, %v2042_v30  ;;  %v4475_v28 = vadd.f32 %v2099_v1, %v4265_v29  ;;  %2162 = vst [vmem:[%s4317_s16 + $0x58] sm:$0xff] %v4455_v43  ;;  %v2204_v59 = vpack.c.bf16 %v4455_v43, %v4430_v44  ;;  %v2044_v30 = vsub.f32 1.0, %v4443_v39  ;;  %v2918_v44 = vld [vmem:[%s4747_s6] sm:$0xff]  }
 0x2bc   : > { %3092 = vtanh.f32 %v1980_v54  ;;  %v1981_v22 = vadd.f32 %v4887_v21, %v1853_v41  ;;  %v1854_v63 = vadd.f32 %v1808_v45, %v4888_v11  ;;  %v4484_v10 = vadd.f32 %v2100_v34, %v4282_v27  ;;  %v4891_v45 = vld [vmem:[#allocation42_spill] sm:$0xff]  ;;  %v4892_v11 = vld [vmem:[#allocation43_spill] sm:$0xff] }
 0x2bd   : > { %v3077_v4 = vpop.eup %3076  ;;  %v4487_v31 = vmul.f32 0.5, %v1436_v33  ;;  %v1381_v29 = vmul.f32 0.5, %v1188_v47  ;;  %v1812_v25 = vpop.f32.mrf.mxu1  ;;  %v2101_v1 = vmul.f32 %v3075_v46, %v4258_v26  ;;  %2163 = vst [vmem:[%s4317_s16 + $0x60] sm:$0xff] %v4475_v28  ;;  %v1437_v33 = vadd.f32 1.0, %v4335_v15  ;;  %v4890_v46 = vld [vmem:[#allocation28_spill] sm:$0xff] }
 0x2be   : > { %3094 = vtanh.f32 %v1981_v22  ;;  %v1982_v55 = vadd.f32 %v4887_v21, %v1854_v63  ;;  %v1855_v54 = vadd.f32 %v1812_v25, %v4889_v20  ;;  %v2102_v52 = vmul.f32 %v3077_v4, %v4272_v12  ;;  %2164 = vst [vmem:[%s4317_s16 + $0x68] sm:$0xff] %v4484_v10  ;;  %v4893_v20 = vld [vmem:[#allocation29_spill] sm:$0xff] }
 0x2bf   : > { %v3079_v27 = vpop.eup %3078  ;;  %v1438_v47 = vadd.f32 1.0, %v4349_v38  ;;  %3096 = vtanh.f32 %v1380_v17  ;;  %v1814_v41 = vpop.f32.mrf.mxu1  ;;  %v4500_v26 = vadd.f32 %v2101_v1, %v4290_v49  ;;  %v2045_v15 = vsub.f32 1.0, %v4487_v31 }
 0x2c0   : > { %v4502_v34 = vpop.eup %3080  ;;  %3098 = vtanh.f32 %v1982_v55  ;;  %v1983_v6 = vadd.f32 %v4890_v46, %v1855_v54  ;;  %v1856_v12 = vadd.f32 %v1814_v41, %v4891_v45  ;;  %v2103_v2 = vmul.f32 %v3079_v27, %v4277_v7 }
 0x2c1   : > { %v3083_v21 = vpop.eup %3082  ;;  %3100 = vtanh.f32 %v1381_v29  ;;  %v1816_v38 = vpop.f32.mrf.mxu1  ;;  %v4509_v17 = vadd.f32 %v2102_v52, %v4311_v62  ;;  %2165 = vst [vmem:[%s4317_s16 + $0x70] sm:$0xff] %v4500_v26  ;;  %v2205_v49 = vpack.c.bf16 %v4500_v26, %v4475_v28  ;;  %v4518_v29 = vmul.f32 0.5, %v1437_v33 }
 0x2c2   : > { %3102 = vtanh.f32 %v1983_v6  ;;  %v1984_v22 = vadd.f32 %v4890_v46, %v1856_v12  ;;  %v1857_v7 = vadd.f32 %v1816_v38, %v4892_v11  ;;  %v2104_v63 = vmul.f32 %v3083_v21, %v4307_v56  ;;  %v4894_v56 = vld [vmem:[#allocation44_spill] sm:$0xff]  ;;  %v3153_v6 = vld [vmem:[%s3346_s13 + $0xa8] sm:$0xff]  ;;  %v4895_v38 = vld [vmem:[#allocation45_spill] sm:$0xff] }
 0x2c3   : > { %v3085_v4 = vpop.eup %3084  ;;  %v4520_v25 = vmul.f32 0.5, %v1438_v47  ;;  %v1818_v62 = vpop.f32.mrf.mxu1  ;;  %v4523_v1 = vadd.f32 %v2103_v2, %v4342_v5  ;;  %2166 = vst [vmem:[%s4317_s16 + $0x78] sm:$0xff] %v4509_v17  ;;  %v2206_v55 = vpack.c.bf16 %v4509_v17, %v4484_v10  ;;  %v3152_v47 = vld [vmem:[%s3346_s13 + $0xb0] sm:$0xff]  ;;  %v1439_v5 = vadd.f32 1.0, %v4363_v24 }
 0x2c4   : > { %3104 = vtanh.f32 %v1984_v22  ;;  %v1985_v54 = vadd.f32 %v4893_v20, %v1857_v7  ;;  %v1858_v52 = vadd.f32 %v1818_v62, %v4894_v56  ;;  %v4532_v27 = vadd.f32 %v2104_v63, %v4394_v51  ;;  %v4896_v63 = vld [vmem:[#allocation26_spill] sm:$0xff]  ;;  %v4897_v62 = vld [vmem:[#allocation49_spill] sm:$0xff] }
 0x2c5   : > { %v3087_v33 = vpop.eup %3086  ;;  %v4535_v41 = vmul.f32 %v3152_v47, %v2045_v15  ;;  %v1822_v46 = vpop.f32.mrf.mxu1  ;;  %v2076_v45 = vmul.f32 %v3153_v6, %v2044_v30  ;;  %v2105_v12 = vmul.f32 %v3085_v4, %v4353_v57  ;;  %2167 = vst [vmem:[%s4317_s16 + $0x80] sm:$0xff] %v4523_v1  ;;  %v2046_v24 = vsub.f32 1.0, %v4518_v29 }
 0x2c6   : > { %v3089_v2 = vpop.eup %3088  ;;  %3106 = vtanh.f32 %v1985_v54  ;;  %v1986_v21 = vadd.f32 %v4893_v20, %v1858_v52  ;;  %v1859_v51 = vadd.f32 %v1822_v46, %v4895_v38  ;;  %v2106_v22 = vmul.f32 %v3087_v33, %v4367_v23  ;;  %2168 = vst [vmem:[%s4317_s16 + $0x88] sm:$0xff] %v4532_v27  ;;  %v4898_v46 = vld [vmem:[#allocation8_spill] sm:$0xff] }
 0x2c7   : > { %v3091_v15 = vpop.eup %3090  ;;  %v2047_v30 = vsub.f32 1.0, %v4520_v25  ;;  %v1440_v57 = vadd.f32 1.0, %v4399_v3  ;;  %v1824_v11 = vpop.f32.mrf.mxu1  ;;  %v4551_v7 = vadd.f32 %v2105_v12, %v4418_v19  ;;  %v1471_v56 = vmul.f32 0.5, %v1439_v5 }
 0x2c8   : > { %3108 = vtanh.f32 %v1986_v21  ;;  %v1987_v4 = vadd.f32 %v4896_v63, %v1859_v51  ;;  %v1860_v20 = vadd.f32 %v1824_v11, %v4897_v62  ;;  %v2107_v23 = vmul.f32 %v3091_v15, %v4404_v58  ;;  %v4900_v15 = vld [vmem:[#allocation11_spill] sm:$0xff] }
 0x2c9   : > { %v3093_v54 = vpop.eup %3092  ;;  %v1441_v52 = vadd.f32 1.0, %v4461_v50  ;;  %v1826_v33 = vpop.f32.mrf.mxu1  ;;  %v4558_v47 = vadd.f32 %v2106_v22, %v4472_v40  ;;  %2169 = vst [vmem:[%s4317_s16 + $0x90] sm:$0xff] %v4551_v7  ;;  %v2207_v3 = vpack.c.bf16 %v4551_v7, %v4523_v1  ;;  %v1472_v5 = vmul.f32 0.5, %v1440_v57  ;;  %v4899_v22 = vld [vmem:[#allocation27_spill] sm:$0xff] }
 0x2ca   : > { %3110 = vtanh.f32 %v1987_v4  ;;  %v1988_v19 = vadd.f32 %v4896_v63, %v1860_v20  ;;  %v1861_v6 = vadd.f32 %v1826_v33, %v4898_v46  ;;  %v2108_v58 = vmul.f32 %v3093_v54, %v4443_v39  ;;  %v3154_v54 = vld [vmem:[%s3346_s13 + $0xb8] sm:$0xff]  ;;  %v3155_v46 = vld [vmem:[%s3346_s13 + $0xc0] sm:$0xff] }
 0x2cb   : > { %v3095_v12 = vpop.eup %3094  ;;  %v1442_v50 = vadd.f32 1.0, %v4502_v34  ;;  %v1828_v21 = vpop.f32.mrf.mxu1  ;;  %v4569_v40 = vadd.f32 %v2107_v23, %v4467_v9  ;;  %2170 = vst [vmem:[%s4317_s16 + $0x98] sm:$0xff] %v4558_v47  ;;  %v2208_v38 = vpack.c.bf16 %v4558_v47, %v4532_v27  ;;  %v2048_v63 = vsub.f32 1.0, %v1471_v56 }
 0x2cc   : > { %v3097_v51 = vpop.eup %3096  ;;  %3112 = vtanh.f32 %v1988_v19  ;;  %v1989_v39 = vadd.f32 %v4899_v22, %v1861_v6  ;;  %v1862_v57 = vadd.f32 %v1828_v21, %v4900_v15  ;;  %v4577_v11 = vadd.f32 %v2108_v58, %v2076_v45 }
 0x2cd   : > { %v3099_v34 = vpop.eup %3098  ;;  %v1473_v9 = vmul.f32 0.5, %v1441_v52  ;;  %v1443_v4 = vadd.f32 1.0, %v3089_v2  ;;  %v2109_v62 = vmul.f32 %v3095_v12, %v4487_v31  ;;  %2171 = vst [vmem:[%s4317_s16 + $0xa0] sm:$0xff] %v4569_v40  ;;  %v2078_v33 = vmul.f32 %v3154_v54, %v2046_v24 }
 0x2ce   : > { %v3101_v20 = vpop.eup %3100  ;;  %3114 = vtanh.f32 %v1989_v39  ;;  %v1990_v23 = vadd.f32 %v4899_v22, %v1862_v57  ;;  %v2110_v19 = vmul.f32 %v3099_v34, %v4518_v29  ;;  %2172 = vst [vmem:[%s4317_s16 + $0xa8] sm:$0xff] %v4577_v11  ;;  %v2079_v52 = vmul.f32 %v3155_v46, %v2047_v30  ;;  %v3156_v39 = vld [vmem:[%s3346_s13 + $0xc8] sm:$0xff] }
 0x2cf   : > { %v3103_v45 = vpop.eup %3102  ;;  %v2049_v2 = vsub.f32 1.0, %v1472_v5  ;;  %v1474_v6 = vmul.f32 0.5, %v1442_v50  ;;  %v4589_v31 = vadd.f32 %v2109_v62, %v4535_v41  ;;  %v1444_v58 = vadd.f32 1.0, %v3097_v51 }
 0x2d0   : > { %3116 = vtanh.f32 %v1990_v23  ;;  %v2111_v12 = vmul.f32 %v3103_v45, %v4520_v25  ;;  %v4592_v24 = vadd.f32 %v2110_v19, %v2078_v33  ;;  %v2050_v21 = vsub.f32 1.0, %v1473_v9  ;;  %v3158_v33 = vld [vmem:[%s3346_s13 + $0xd8] sm:$0xff] }
 0x2d1   : > { %v3105_v29 = vpop.eup %3104  ;;  %v1475_v22 = vmul.f32 0.5, %v1443_v4  ;;  %v2080_v15 = vmul.f32 %v3156_v39, %v2048_v63  ;;  %2173 = vst [vmem:[%s4317_s16 + $0xb0] sm:$0xff] %v4589_v31  ;;  %v2209_v30 = vpack.c.bf16 %v4589_v31, %v4569_v40  ;;  %v1445_v41 = vadd.f32 1.0, %v3101_v20  ;;  %v3157_v4 = vld [vmem:[%s3346_s13 + $0xd0] sm:$0xff] }
 0x2d2   : > { %v2112_v50 = vmul.f32 %v3105_v29, %v1471_v56  ;;  %v2143_v51 = vadd.f32 %v2111_v12, %v2079_v52  ;;  %2174 = vst [vmem:[%s4317_s16 + $0xb8] sm:$0xff] %v4592_v24  ;;  %v2210_v25 = vpack.c.bf16 %v4592_v24, %v4577_v11  ;;  %v2051_v34 = vsub.f32 1.0, %v1474_v6  ;;  %v3159_v52 = vld [vmem:[%s3346_s13 + $0xe0] sm:$0xff]  ;;  %v3160_v29 = vld [vmem:[%s3346_s13 + $0xe8] sm:$0xff] }
 0x2d3   : > { %v3107_v57 = vpop.eup %3106  ;;  %v2081_v63 = vmul.f32 %v3157_v4, %v2049_v2  ;;  %v1476_v62 = vmul.f32 0.5, %v1444_v58  ;;  %v2052_v20 = vsub.f32 1.0, %v1475_v22  ;;  %v1477_v56 = vmul.f32 0.5, %v1445_v41 }
 0x2d4   : > { %v2144_v23 = vadd.f32 %v2112_v50, %v2080_v15  ;;  %v2113_v54 = vmul.f32 %v3107_v57, %v1472_v5  ;;  %2175 = vst [vmem:[%s4317_s16 + $0xc0] sm:$0xff] %v2143_v51  ;;  %v2082_v19 = vmul.f32 %v3158_v33, %v2050_v21  ;;  %v2083_v31 = vmul.f32 %v3159_v52, %v2051_v34  ;;  %v3161_v57 = vld [vmem:[%s3346_s13 + $0xf0] sm:$0xff] }
 0x2d5   : > { %v3109_v40 = vpop.eup %3108  ;;  %v2053_v2 = vsub.f32 1.0, %v1476_v62  ;;  %v2084_v39 = vmul.f32 %v3160_v29, %v2052_v20  ;;  %v2054_v21 = vsub.f32 1.0, %v1477_v56  ;;  %v4901_v48 = vmov 0  }
 0x2d6   : > { %v2114_v45 = vmul.f32 %v3109_v40, %v1473_v9  ;;  %2176 = vst [vmem:[%s4317_s16 + $0xc8] sm:$0xff] %v2144_v23  ;;  %v2145_v11 = vadd.f32 %v2113_v54, %v2081_v63 }
 0x2d7   : > { %v3111_v46 = vpop.eup %3110  ;;  %v2085_v34 = vmul.f32 %v3161_v57, %v2053_v2 }
 0x2d8   : > { %v2115_v58 = vmul.f32 %v3111_v46, %v1474_v6  ;;  %v2146_v12 = vadd.f32 %v2114_v45, %v2082_v19  ;;  %2177 = vst [vmem:[%s4317_s16 + $0xd0] sm:$0xff] %v2145_v11  ;;  %v2211_v5 = vpack.c.bf16 %v2145_v11, %v2143_v51  ;;  %v3162_v51 = vld [vmem:[%s3346_s13 + $0xf8] sm:$0xff]  ;;  %s4682_s13 = scalar_lea.vmem %s4749_s8, %s2778_s15 }
 0x2d9   : > { %v3113_v24 = vpop.eup %3112  ;;  %v2086_v54 = vmul.f32 %v3162_v51, %v2054_v21 }
 0x2da   : > { %v2116_v9 = vmul.f32 %v3113_v24, %v1475_v22  ;;  %v2147_v15 = vadd.f32 %v2115_v58, %v2083_v31  ;;  %2178 = vst [vmem:[%s4317_s16 + $0xd8] sm:$0xff] %v2146_v12  ;;  %v2212_v41 = vpack.c.bf16 %v2146_v12, %v2144_v23 }
 0x2db   : > { %v3115_v50 = vpop.eup %3114 }
 0x2dc   : > { %v2148_v6 = vadd.f32 %v2116_v9, %v2084_v39  ;;  %v2117_v4 = vmul.f32 %v3115_v50, %v1476_v62  ;;  %2179 = vst [vmem:[%s4317_s16 + $0xe0] sm:$0xff] %v2147_v15 }
 0x2dd   : > { %v3117_v63 = vpop.eup %3116 }
 0x2de   : > { %v2118_v40 = vmul.f32 %v3117_v63, %v1477_v56  ;;  %2180 = vst [vmem:[%s4317_s16 + $0xe8] sm:$0xff] %v2148_v6  ;;  %v2149_v20 = vadd.f32 %v2117_v4, %v2085_v34 }
 0x2e0   : > { %v2150_v33 = vadd.f32 %v2118_v40, %v2086_v54  ;;  %2181 = vst [vmem:[%s4317_s16 + $0xf0] sm:$0xff] %v2149_v20  ;;  %v2213_v22 = vpack.c.bf16 %v2149_v20, %v2147_v15 }
 0x2e2   : > { %2182 = vst [vmem:[%s4317_s16 + $0xf8] sm:$0xff] %v2150_v33  ;;  %v2214_v19 = vpack.c.bf16 %v2150_v33, %v2148_v6 }
 0x2e4   : > { %2263 = vmatprep.subr.bf16.mxu1 %v2214_v19 }
 0x2e5   : > { %2264 = vmatpush1.bf16.msra.mxu1 %v2213_v22 }
 0x2e6   : > { %2265 = vmatprep.subr.bf16.mxu1 %v2212_v41 }
 0x2e9   : > { %2266 = vmatpush1.bf16.msra.mxu1 %v2211_v5 }
 0x2ea   : > { %2267 = vmatprep.subr.bf16.mxu1 %v2210_v25 }
 0x2ed   : > { %2268 = vmatpush1.bf16.msra.mxu1 %v2209_v30 }
 0x2ee   : > { %2269 = vmatprep.subr.bf16.mxu1 %v2208_v38 }
 0x2f1   : > { %2270 = vmatpush1.bf16.msra.mxu1 %v2207_v3 }
 0x2f2   : > { %2271 = vmatprep.subr.bf16.mxu1 %v2206_v55 }
 0x2f5   : > { %2272 = vmatpush1.bf16.msra.mxu1 %v2205_v49 }
 0x2f6   : > { %2273 = vmatprep.subr.bf16.mxu1 %v2204_v59 }
 0x2f9   : > { %2274 = vmatpush1.bf16.msra.mxu1 %v2203_v42 }
 0x2fa   : > { %2275 = vmatprep.subr.bf16.mxu1 %v2202_v13 }
 0x2fd   : > { %2276 = vmatpush1.bf16.msra.mxu1 %v2201_v36 }
 0x2fe   : > { %2277 = vmatprep.subr.bf16.mxu1 %v2200_v8  ;;  %v2925_v8 = vld [vmem:[%s4747_s6 + $0x38] sm:$0xff]  }
 0x301   : > { %2278 = vmatpush1.bf16.msra.mxu1 %v2199_v14  ;;  %v2924_v14 = vld [vmem:[%s4747_s6 + $0x30] sm:$0xff]  }
 0x304   : > { %2296 = vmatmul.mubr.bf16.vlgmr.msra.gmra.mxu1 %v2918_v44 }
 0x305   : > { %2305 = vmatprep.mubr.bf16.mxu1 %v4901_v48 }
 0x30c   : > { %2306 = vmatmul.mubr.bf16.gmra.mxu1 %v2919_v18 }
 0x30d   : > { %2315 = vmatprep.mubr.bf16.mxu1 %v4901_v48 }
 0x314   : > { %2316 = vmatmul.mubr.bf16.gmra.mxu1 %v2920_v35 }
 0x315   : > { %2325 = vmatprep.mubr.bf16.mxu1 %v4901_v48 }
 0x31c   : > { %2326 = vmatmul.mubr.bf16.gmra.mxu1 %v2921_v0 }
 0x31d   : > { %2335 = vmatprep.mubr.bf16.mxu1 %v4901_v48 }
 0x324   : > { %2336 = vmatmul.mubr.bf16.gmra.mxu1 %v2922_v61 }
 0x325   : > { %2345 = vmatprep.mubr.bf16.mxu1 %v4901_v48 }
 0x32c   : > { %2346 = vmatmul.mubr.bf16.gmra.mxu1 %v2923_v32 }
 0x32d   : > { %2355 = vmatprep.mubr.bf16.mxu1 %v4901_v48 }
 0x334   : > { %2356 = vmatmul.mubr.bf16.gmra.mxu1 %v2924_v14 }
 0x335   : > { %2365 = vmatprep.mubr.bf16.mxu1 %v4901_v48 }
 0x33c   : > { %2366 = vmatmul.mubr.bf16.gmra.mxu1 %v2925_v8 }
 0x3c4   : > { %v2297_v37 = vpop.f32.mrf.mxu1 }
 0x3c5   : > { %v2424_v16 = vmul.f32 %v2297_v37, %v2297_v37 }
 0x3c6   : > { %v2299_v53 = vpop.f32.mrf.mxu1 }
 0x3c7   : > { %v2425_v36 = vmul.f32 %v2299_v53, %v2299_v53  ;;  %v2376_v13 = vadd.f32 %v2299_v53, %v2297_v37 }
 0x3c8   : > { %v2301_v60 = vpop.f32.mrf.mxu1 }
 0x3c9   : > { %2377 = vadd.xlane.f32.xlu0 %v2376_v13  ;;  %v2456_v43 = vadd.f32 %v2425_v36, %v2424_v16  ;;  %v2426_v28 = vmul.f32 %v2301_v60, %v2301_v60 }
 0x3ca   : > { %v2303_v42 = vpop.f32.mrf.mxu1 }
 0x3cb   : > { %v2427_v59 = vmul.f32 %v2303_v42, %v2303_v42  ;;  %2457 = vadd.xlane.f32.xlu1 %v2456_v43  ;;  %v2379_v49 = vadd.f32 %v2303_v42, %v2301_v60 }
 0x3cc   : > { %v2307_v10 = vpop.f32.mrf.mxu1 }
 0x3cd   : > { %v2428_v26 = vmul.f32 %v2307_v10, %v2307_v10  ;;  %v2459_v17 = vadd.f32 %v2427_v59, %v2426_v28 }
 0x3ce   : > { %v2309_v1 = vpop.f32.mrf.mxu1 }
 0x3cf   : > { %2460 = vadd.xlane.f32.xlu0 %v2459_v17  ;;  %v2429_v55 = vmul.f32 %v2309_v1, %v2309_v1  ;;  %2380 = vadd.xlane.f32.xlu1 %v2379_v49  ;;  %v2382_v7 = vadd.f32 %v2309_v1, %v2307_v10 }
 0x3d0   : > { %v2311_v27 = vpop.f32.mrf.mxu1 }
 0x3d1   : > { %v2462_v47 = vadd.f32 %v2429_v55, %v2428_v26  ;;  %v2430_v23 = vmul.f32 %v2311_v27, %v2311_v27 }
 0x3d2   : > { %v2313_v3 = vpop.f32.mrf.mxu1 }
 0x3d3   : > { %2383 = vadd.xlane.f32.xlu0 %v2382_v7  ;;  %2463 = vadd.xlane.f32.xlu1 %v2462_v47  ;;  %v2431_v30 = vmul.f32 %v2313_v3, %v2313_v3  ;;  %v2385_v25 = vadd.f32 %v2313_v3, %v2311_v27 }
 0x3d4   : > { %v2317_v38 = vpop.f32.mrf.mxu1 }
 0x3d5   : > { %v2432_v56 = vmul.f32 %v2317_v38, %v2317_v38  ;;  %v2465_v52 = vadd.f32 %v2431_v30, %v2430_v23 }
 0x3d6   : > { %v2319_v62 = vpop.f32.mrf.mxu1 }
 0x3d7   : > { %2386 = vadd.xlane.f32.xlu0 %v2385_v25  ;;  %v2433_v45 = vmul.f32 %v2319_v62, %v2319_v62  ;;  %v2388_v11 = vadd.f32 %v2319_v62, %v2317_v38 }
 0x3d8   : > { %v2321_v46 = vpop.f32.mrf.mxu1 }
 0x3d9   : > { %2389 = vadd.xlane.f32.xlu1 %v2388_v11  ;;  %v2468_v2 = vadd.f32 %v2433_v45, %v2432_v56  ;;  %v2434_v29 = vmul.f32 %v2321_v46, %v2321_v46 }
 0x3da   : > { %v2323_v31 = vpop.f32.mrf.mxu1 }
 0x3db   : > { %2466 = vadd.xlane.f32.xlu0 %v2465_v52  ;;  %v2435_v12 = vmul.f32 %v2323_v31, %v2323_v31  ;;  %v2391_v5 = vadd.f32 %v2323_v31, %v2321_v46 }
 0x3dc   : > { %v2327_v58 = vpop.f32.mrf.mxu1 }
 0x3dd   : > { %2469 = vadd.xlane.f32.xlu1 %v2468_v2  ;;  %v2436_v39 = vmul.f32 %v2327_v58, %v2327_v58  ;;  %v2471_v41 = vadd.f32 %v2435_v12, %v2434_v29 }
 0x3de   : > { %v2329_v24 = vpop.f32.mrf.mxu1 }
 0x3df   : > { %2392 = vadd.xlane.f32.xlu0 %v2391_v5  ;;  %v2437_v21 = vmul.f32 %v2329_v24, %v2329_v24  ;;  %v2394_v9 = vadd.f32 %v2329_v24, %v2327_v58 }
 0x3e0   : > { %v2331_v15 = vpop.f32.mrf.mxu1 }
 0x3e1   : > { %2395 = vadd.xlane.f32.xlu1 %v2394_v9  ;;  %v2474_v57 = vadd.f32 %v2437_v21, %v2436_v39  ;;  %v2438_v51 = vmul.f32 %v2331_v15, %v2331_v15 }
 0x3e2   : > { %v2333_v50 = vpop.f32.mrf.mxu1 }
 0x3e3   : > { %2472 = vadd.xlane.f32.xlu0 %v2471_v41  ;;  %v2439_v6 = vmul.f32 %v2333_v50, %v2333_v50  ;;  %v2397_v4 = vadd.f32 %v2333_v50, %v2331_v15 }
 0x3e4   : > { %v2337_v34 = vpop.f32.mrf.mxu1 }
 0x3e5   : > { %2475 = vadd.xlane.f32.xlu1 %v2474_v57  ;;  %v2440_v54 = vmul.f32 %v2337_v34, %v2337_v34  ;;  %v2477_v22 = vadd.f32 %v2439_v6, %v2438_v51 }
 0x3e6   : > { %v2339_v63 = vpop.f32.mrf.mxu1 }
 0x3e7   : > { %2398 = vadd.xlane.f32.xlu0 %v2397_v4  ;;  %v2441_v40 = vmul.f32 %v2339_v63, %v2339_v63  ;;  %v2400_v20 = vadd.f32 %v2339_v63, %v2337_v34 }
 0x3e8   : > { %v2341_v33 = vpop.f32.mrf.mxu1 }
 0x3e9   : > { %2401 = vadd.xlane.f32.xlu1 %v2400_v20  ;;  %v2480_v44 = vadd.f32 %v2441_v40, %v2440_v54  ;;  %v2442_v61 = vmul.f32 %v2341_v33, %v2341_v33 }
 0x3ea   : > { %v2343_v19 = vpop.f32.mrf.mxu1 }
 0x3eb   : > { %2478 = vadd.xlane.f32.xlu0 %v2477_v22  ;;  %v2443_v18 = vmul.f32 %v2343_v19, %v2343_v19  ;;  %v2403_v35 = vadd.f32 %v2343_v19, %v2341_v33 }
 0x3ec   : > { %v2347_v48 = vpop.f32.mrf.mxu1 }
 0x3ed   : > { %2481 = vadd.xlane.f32.xlu1 %v2480_v44  ;;  %v2444_v32 = vmul.f32 %v2347_v48, %v2347_v48  ;;  %v2483_v53 = vadd.f32 %v2443_v18, %v2442_v61 }
 0x3ee   : > { %v2349_v0 = vpop.f32.mrf.mxu1 }
 0x3ef   : > { %2404 = vadd.xlane.f32.xlu0 %v2403_v35  ;;  %v2445_v14 = vmul.f32 %v2349_v0, %v2349_v0  ;;  %v2406_v8 = vadd.f32 %v2349_v0, %v2347_v48 }
 0x3f0   : > { %v2351_v37 = vpop.f32.mrf.mxu1 }
 0x3f1   : > { %2407 = vadd.xlane.f32.xlu1 %v2406_v8  ;;  %v2486_v36 = vadd.f32 %v2445_v14, %v2444_v32  ;;  %v2446_v28 = vmul.f32 %v2351_v37, %v2351_v37 }
 0x3f2   : > { %v2353_v16 = vpop.f32.mrf.mxu1 }
 0x3f3   : > { %2484 = vadd.xlane.f32.xlu0 %v2483_v53  ;;  %v2447_v60 = vmul.f32 %v2353_v16, %v2353_v16  ;;  %v2409_v43 = vadd.f32 %v2353_v16, %v2351_v37 }
 0x3f4   : > { %v2357_v13 = vpop.f32.mrf.mxu1 }
 0x3f5   : > { %2487 = vadd.xlane.f32.xlu1 %v2486_v36  ;;  %v2448_v59 = vmul.f32 %v2357_v13, %v2357_v13  ;;  %v2489_v49 = vadd.f32 %v2447_v60, %v2446_v28 }
 0x3f6   : > { %v2359_v42 = vpop.f32.mrf.mxu1 }
 0x3f7   : > { %2410 = vadd.xlane.f32.xlu0 %v2409_v43  ;;  %v2449_v10 = vmul.f32 %v2359_v42, %v2359_v42  ;;  %v2412_v26 = vadd.f32 %v2359_v42, %v2357_v13 }
 0x3f8   : > { %v2361_v17 = vpop.f32.mrf.mxu1 }
 0x3f9   : > { %2413 = vadd.xlane.f32.xlu1 %v2412_v26  ;;  %v2492_v55 = vadd.f32 %v2449_v10, %v2448_v59  ;;  %v2450_v38 = vmul.f32 %v2361_v17, %v2361_v17 }
 0x3fa   : > { %v2363_v1 = vpop.f32.mrf.mxu1 }
 0x3fb   : > { %2490 = vadd.xlane.f32.xlu0 %v2489_v49  ;;  %v2451_v7 = vmul.f32 %v2363_v1, %v2363_v1  ;;  %v2415_v47 = vadd.f32 %v2363_v1, %v2361_v17 }
 0x3fc   : > { %v2367_v27 = vpop.f32.mrf.mxu1 }
 0x3fd   : > { %2493 = vadd.xlane.f32.xlu1 %v2492_v55  ;;  %v2452_v30 = vmul.f32 %v2367_v27, %v2367_v27  ;;  %v2495_v56 = vadd.f32 %v2451_v7, %v2450_v38 }
 0x3fe   : > { %v2369_v3 = vpop.f32.mrf.mxu1 }
 0x3ff   : > { %2416 = vadd.xlane.f32.xlu0 %v2415_v47  ;;  %v2453_v25 = vmul.f32 %v2369_v3, %v2369_v3  ;;  %v2418_v62 = vadd.f32 %v2369_v3, %v2367_v27 }
 0x400   : > { %v2371_v23 = vpop.f32.mrf.mxu1 }
 0x401   : > { %2419 = vadd.xlane.f32.xlu1 %v2418_v62  ;;  %v2498_v11 = vadd.f32 %v2453_v25, %v2452_v30  ;;  %v2454_v31 = vmul.f32 %v2371_v23, %v2371_v23 }
 0x402   : > { %v2373_v45 = vpop.f32.mrf.mxu1 }
 0x403   : > { %2496 = vadd.xlane.f32.xlu0 %v2495_v56  ;;  %v2421_v46 = vadd.f32 %v2373_v45, %v2371_v23  ;;  %v2455_v52 = vmul.f32 %v2373_v45, %v2373_v45 }
 0x405   : > { %2499 = vadd.xlane.f32.xlu1 %v2498_v11  ;;  %v2501_v2 = vadd.f32 %v2455_v52, %v2454_v31 }
 0x407   : > { %2422 = vadd.xlane.f32.xlu0 %v2421_v46 }
 0x40b   : > { %2502 = vadd.xlane.f32.xlu0 %v2501_v2 }
 0x452   : > { %v2378_v58 = vpop.xlane.xlu0 %2377 }
 0x454   : > { %v2458_v12 = vpop.xlane.xlu1 %2457 }
 0x455   : > { %v2505_v5 = vsel %vm2504_vm0, %v2378_v58, %v2458_v12 }
 0x456   : > { %2522 = vst.msk [vmem:[%s4682_s13] sm:$0xff] %vm2521_vm1, %v2505_v5 }
 0x458   : > { %v2461_v24 = vpop.xlane.xlu0 %2460  ;;  %v2381_v29 = vpop.xlane.xlu1 %2380 }
 0x459   : > { %v2506_v39 = vsel %vm2504_vm0, %v2381_v29, %v2461_v24 }
 0x45a   : > { %2523 = vst.msk [vmem:[%s4682_s13 + $0x8] sm:$0xff] %vm2521_vm1, %v2506_v39 }
 0x45c   : > { %v2384_v21 = vpop.xlane.xlu0 %2383  ;;  %v2464_v9 = vpop.xlane.xlu1 %2463 }
 0x45d   : > { %v2507_v15 = vsel %vm2504_vm0, %v2384_v21, %v2464_v9 }
 0x45e   : > { %2524 = vst.msk [vmem:[%s4682_s13 + $0x10] sm:$0xff] %vm2521_vm1, %v2507_v15 }
 0x460   : > { %v2387_v41 = vpop.xlane.xlu0 %2386 }
 0x462   : > { %v2390_v50 = vpop.xlane.xlu1 %2389 }
 0x464   : > { %v2467_v57 = vpop.xlane.xlu0 %2466 }
 0x465   : > { %v2508_v34 = vsel %vm2504_vm0, %v2387_v41, %v2467_v57 }
 0x466   : > { %2525 = vst.msk [vmem:[%s4682_s13 + $0x18] sm:$0xff] %vm2521_vm1, %v2508_v34  ;;  %v2470_v6 = vpop.xlane.xlu1 %2469 }
 0x467   : > { %v2509_v4 = vsel %vm2504_vm0, %v2390_v50, %v2470_v6 }
 0x468   : > { %v2393_v63 = vpop.xlane.xlu0 %2392  ;;  %2526 = vst.msk [vmem:[%s4682_s13 + $0x20] sm:$0xff] %vm2521_vm1, %v2509_v4 }
 0x46a   : > { %v2396_v51 = vpop.xlane.xlu1 %2395 }
 0x46c   : > { %v2473_v54 = vpop.xlane.xlu0 %2472 }
 0x46d   : > { %v2510_v40 = vsel %vm2504_vm0, %v2393_v63, %v2473_v54 }
 0x46e   : > { %2527 = vst.msk [vmem:[%s4682_s13 + $0x28] sm:$0xff] %vm2521_vm1, %v2510_v40  ;;  %v2476_v20 = vpop.xlane.xlu1 %2475 }
 0x46f   : > { %v2511_v33 = vsel %vm2504_vm0, %v2396_v51, %v2476_v20 }
 0x470   : > { %v2399_v22 = vpop.xlane.xlu0 %2398  ;;  %2528 = vst.msk [vmem:[%s4682_s13 + $0x30] sm:$0xff] %vm2521_vm1, %v2511_v33 }
 0x472   : > { %v2402_v19 = vpop.xlane.xlu1 %2401 }
 0x474   : > { %v2479_v44 = vpop.xlane.xlu0 %2478 }
 0x475   : > { %v2512_v48 = vsel %vm2504_vm0, %v2399_v22, %v2479_v44 }
 0x476   : > { %2529 = vst.msk [vmem:[%s4682_s13 + $0x38] sm:$0xff] %vm2521_vm1, %v2512_v48  ;;  %v2482_v18 = vpop.xlane.xlu1 %2481 }
 0x477   : > { %v2513_v35 = vsel %vm2504_vm0, %v2402_v19, %v2482_v18 }
 0x478   : > { %v2405_v0 = vpop.xlane.xlu0 %2404  ;;  %2530 = vst.msk [vmem:[%s4682_s13 + $0x40] sm:$0xff] %vm2521_vm1, %v2513_v35 }
 0x47a   : > { %v2408_v61 = vpop.xlane.xlu1 %2407 }
 0x47c   : > { %v2485_v32 = vpop.xlane.xlu0 %2484 }
 0x47d   : > { %v2514_v14 = vsel %vm2504_vm0, %v2405_v0, %v2485_v32 }
 0x47e   : > { %2531 = vst.msk [vmem:[%s4682_s13 + $0x48] sm:$0xff] %vm2521_vm1, %v2514_v14  ;;  %v2488_v8 = vpop.xlane.xlu1 %2487 }
 0x47f   : > { %v2515_v37 = vsel %vm2504_vm0, %v2408_v61, %v2488_v8 }
 0x480   : > { %v2411_v53 = vpop.xlane.xlu0 %2410  ;;  %2532 = vst.msk [vmem:[%s4682_s13 + $0x50] sm:$0xff] %vm2521_vm1, %v2515_v37 }
 0x482   : > { %v2414_v16 = vpop.xlane.xlu1 %2413 }
 0x484   : > { %v2491_v36 = vpop.xlane.xlu0 %2490 }
 0x485   : > { %v2516_v13 = vsel %vm2504_vm0, %v2411_v53, %v2491_v36 }
 0x486   : > { %2533 = vst.msk [vmem:[%s4682_s13 + $0x58] sm:$0xff] %vm2521_vm1, %v2516_v13  ;;  %v2494_v60 = vpop.xlane.xlu1 %2493 }
 0x487   : > { %v2517_v43 = vsel %vm2504_vm0, %v2414_v16, %v2494_v60 }
 0x488   : > { %v2417_v42 = vpop.xlane.xlu0 %2416  ;;  %2534 = vst.msk [vmem:[%s4682_s13 + $0x60] sm:$0xff] %vm2521_vm1, %v2517_v43 }
 0x48a   : > { %v2420_v28 = vpop.xlane.xlu1 %2419 }
 0x48c   : > { %v2497_v59 = vpop.xlane.xlu0 %2496 }
 0x48d   : > { %v2518_v10 = vsel %vm2504_vm0, %v2417_v42, %v2497_v59 }
 0x48e   : > { %2535 = vst.msk [vmem:[%s4682_s13 + $0x68] sm:$0xff] %vm2521_vm1, %v2518_v10  ;;  %v2500_v26 = vpop.xlane.xlu1 %2499 }
 0x48f   : > { %v2519_v17 = vsel %vm2504_vm0, %v2420_v28, %v2500_v26 }
 0x490   : > { %v2423_v49 = vpop.xlane.xlu0 %2422  ;;  %2536 = vst.msk [vmem:[%s4682_s13 + $0x70] sm:$0xff] %vm2521_vm1, %v2519_v17 }
 0x494   : > { %v2503_v1 = vpop.xlane.xlu0 %2502 }
 0x495   : > { %v2520_v55 = vsel %vm2504_vm0, %v2423_v49, %v2503_v1 }
 0x496   : > { %2537 = vst.msk [vmem:[%s4682_s13 + $0x78] sm:$0xff] %vm2521_vm1, %v2520_v55 }
 0x497 PF: > { %s19_s29 = sadd.s32 1, %s3185_s29   ;;  %s4902_s27 = smov %s3181_s28 }
 0x498   : > { %p16_p5 = scmp.ge.s32.totalorder %s19_s29, 4   ;;  %s4903_s28 = smov %s4905_s30 }
 0x49a   :  { %18 = sbr.rel (!%p16_p5) target bundleno = 2 (0x2), region = 93 }

</bundles_post_ra>
